<compile_context>
chip_gen: v7x
topology: tpu7x:2x2x1
jax: 0.10.0
libtpu: 0.0.40
codegen_flags: <defaults>
</compile_context>

<pallas_src>
import jax
import jax.numpy as jnp
from jax.experimental import pallas as pl
from jax.experimental.pallas import tpu as pltpu


_MT_MAX = 256                      # M-tile rows (>=256 fills the 256-wide MXU on v6e/v7x)
_TK_MAX = 2048                     # max K tile (256x2048 bf16 A block = 1 MiB, double-buffered)
_VMEM_LIMIT = 48 * 1024 * 1024     # leaves headroom inside v7x's 64 MiB physical VMEM
_BN_EPS = 1e-5


def _round_up(x, m):
    return (x + m - 1) // m * m


def _pick_tk(kp):
    """Largest multiple of 128 that divides kp (kp is a multiple of 128) and is <= _TK_MAX."""
    best = 128
    t = 128
    while t <= min(kp, _TK_MAX):
        if kp % t == 0:
            best = t
        t += 128
    return best


def _tiling(M, kp):
    Mt = min(_MT_MAX, _round_up(M, 8))
    Mp = _round_up(M, Mt)
    tk = _pick_tk(kp)
    return Mt, Mp, tk


# ----------------------------------------------------------------------------
# Pallas kernels
# ----------------------------------------------------------------------------
def _matmul_stats_kernel(a_ref, w_ref, o_ref, s_ref, acc_ref):
    """o = (A @ W) in bf16; s[:,0,:]/s[:,1,:] = per-column sum / sum-of-squares (f32)."""
    k = pl.program_id(1)
    part = jnp.dot(a_ref[...], w_ref[...], preferred_element_type=jnp.float32)

    @pl.when(k == 0)
    def _():
        acc_ref[...] = part                       # no zero-init pass

    @pl.when(k > 0)
    def _():
        acc_ref[...] += part

    @pl.when(k == pl.num_programs(1) - 1)
    def _():
        acc = acc_ref[...]
        o_ref[...] = acc.astype(o_ref.dtype)
        s1 = jnp.sum(acc, axis=0, keepdims=True)
        s2 = jnp.sum(acc * acc, axis=0, keepdims=True)
        pad = jnp.zeros((6, acc.shape[1]), jnp.float32)
        s_ref[...] = jnp.concatenate([s1, s2, pad], axis=0)[None]


def _scale_shift_relu_kernel(y_ref, sc_ref, sh_ref, o_ref):
    """Second BN pass: y*scale + shift, ReLU, bf16 out (lane-dense)."""
    y = y_ref[...].astype(jnp.float32)
    o_ref[...] = jnp.maximum(y * sc_ref[...] + sh_ref[...], 0.0).astype(o_ref.dtype)


def _matmul_bias_tanh_kernel(a_ref, w_ref, b_ref, o_ref, acc_ref):
    """Final layer: A @ W + bias, tanh."""
    k = pl.program_id(1)
    part = jnp.dot(a_ref[...], w_ref[...], preferred_element_type=jnp.float32)

    @pl.when(k == 0)
    def _():
        acc_ref[...] = part + b_ref[...]          # bias folded into accumulator init

    @pl.when(k > 0)
    def _():
        acc_ref[...] += part

    @pl.when(k == pl.num_programs(1) - 1)
    def _():
        o_ref[...] = jnp.tanh(acc_ref[...]).astype(o_ref.dtype)


# ----------------------------------------------------------------------------
# pallas_call wrappers
# ----------------------------------------------------------------------------
def _matmul_stats(patches, w):
    """patches (M, K) bf16, w (kp, n_tot) bf16 (pre-packed).  Returns pre-BN activation y
    (Mp, n_tot) bf16 and per-M-tile stats (Mg, 8, n_tot) f32 (row 0 = sum, row 1 = sumsq)."""
    M, K = patches.shape
    kp, n_tot = w.shape
    Mt, Mp, tk = _tiling(M, kp)
    Mg, Kg = Mp // Mt, kp // tk

    a = jnp.pad(patches.astype(jnp.bfloat16), ((0, Mp - M), (0, kp - K)))

    return pl.pallas_call(
        _matmul_stats_kernel,
        out_shape=(jax.ShapeDtypeStruct((Mp, n_tot), jnp.bfloat16),
                   jax.ShapeDtypeStruct((Mg, 8, n_tot), jnp.float32)),
        grid_spec=pltpu.PrefetchScalarGridSpec(
            num_scalar_prefetch=0,
            grid=(Mg, Kg),
            in_specs=[pl.BlockSpec((Mt, tk), lambda i, k: (i, k)),
                      pl.BlockSpec((tk, n_tot), lambda i, k: (k, 0))],
            out_specs=[pl.BlockSpec((Mt, n_tot), lambda i, k: (i, 0)),
                       pl.BlockSpec((1, 8, n_tot), lambda i, k: (i, 0, 0))],
            scratch_shapes=[pltpu.VMEM((Mt, n_tot), jnp.float32)]),
        compiler_params=pltpu.CompilerParams(
            dimension_semantics=("parallel", "arbitrary"),
            vmem_limit_bytes=_VMEM_LIMIT),
    )(a, w)


def _scale_shift_relu(y, scale_full, shift_full):
    Mp, n_tot = y.shape
    Mt = min(_MT_MAX, Mp)
    Mg = Mp // Mt
    return pl.pallas_call(
        _scale_shift_relu_kernel,
        out_shape=jax.ShapeDtypeStruct((Mp, n_tot), jnp.bfloat16),
        grid_spec=pltpu.PrefetchScalarGridSpec(
            num_scalar_prefetch=0,
            grid=(Mg,),
            in_specs=[pl.BlockSpec((Mt, n_tot), lambda i: (i, 0)),
                      pl.BlockSpec((1, n_tot), lambda i: (0, 0)),
                      pl.BlockSpec((1, n_tot), lambda i: (0, 0))],
            out_specs=pl.BlockSpec((Mt, n_tot), lambda i: (i, 0))),
        compiler_params=pltpu.CompilerParams(
            dimension_semantics=("parallel",),
            vmem_limit_bytes=_VMEM_LIMIT),
    )(y, scale_full, shift_full)


def _matmul_bn_relu(patches, w, gamma, beta, *, n_groups):
    """conv-as-matmul + training-mode BatchNorm (two-pass) + ReLU."""
    M = patches.shape[0]
    n_tot = w.shape[1]
    oc = gamma.shape[0]
    c_real = n_groups * oc

    y, stats = _matmul_stats(patches, w)

    # Tiny per-channel reduction across M tiles and phase groups (XLA glue).
    s1 = stats[:, 0, :c_real].reshape(-1, n_groups, oc).sum(axis=(0, 1))
    s2 = stats[:, 1, :c_real].reshape(-1, n_groups, oc).sum(axis=(0, 1))
    cnt = jnp.float32(M * n_groups)          # zero-padded M rows contribute nothing (no bias)
    mean = s1 / cnt
    var = jnp.maximum(s2 / cnt - mean * mean, 0.0)
    inv = jax.lax.rsqrt(var + _BN_EPS)
    scale = gamma * inv
    shift = beta - mean * scale
    scale_full = jnp.pad(jnp.tile(scale, n_groups), (0, n_tot - c_real)).reshape(1, n_tot)
    shift_full = jnp.pad(jnp.tile(shift, n_groups), (0, n_tot - c_real)).reshape(1, n_tot)

    out = _scale_shift_relu(y, scale_full, shift_full)
    return out[:M, :c_real]


def _matmul_bias_tanh(patches, w, bias, *, n_groups):
    M, K = patches.shape
    kp, n_tot = w.shape
    oc = bias.shape[0]
    c_real = n_groups * oc
    Mt, Mp, tk = _tiling(M, kp)
    Mg, Kg = Mp // Mt, kp // tk

    a = jnp.pad(patches.astype(jnp.bfloat16), ((0, Mp - M), (0, kp - K)))
    b_full = jnp.pad(jnp.tile(bias, n_groups), (0, n_tot - c_real)).reshape(1, n_tot)

    out = pl.pallas_call(
        _matmul_bias_tanh_kernel,
        out_shape=jax.ShapeDtypeStruct((Mp, n_tot), jnp.float32),
        grid_spec=pltpu.PrefetchScalarGridSpec(
            num_scalar_prefetch=0,
            grid=(Mg, Kg),
            in_specs=[pl.BlockSpec((Mt, tk), lambda i, k: (i, k)),
                      pl.BlockSpec((tk, n_tot), lambda i, k: (k, 0)),
                      pl.BlockSpec((1, n_tot), lambda i, k: (0, 0))],
            out_specs=pl.BlockSpec((Mt, n_tot), lambda i, k: (i, 0)),
            scratch_shapes=[pltpu.VMEM((Mt, n_tot), jnp.float32)]),
        compiler_params=pltpu.CompilerParams(
            dimension_semantics=("parallel", "arbitrary"),
            vmem_limit_bytes=_VMEM_LIMIT),
    )(a, w, b_full)
    return out[:M, :c_real]


# ----------------------------------------------------------------------------
# Layers (NHWC, bf16 activations).  im2col / pixel-shuffle are XLA glue.
# ----------------------------------------------------------------------------
def _conv_patches(x):
    """4x4 / stride-2 / pad-1 im2col: (N,H,W,C) -> (N*H/2*W/2, 16*C) bf16."""
    N, H, W, C = x.shape
    OH, OW = H // 2, W // 2
    xp = jnp.pad(x, ((0, 0), (1, 1), (1, 1), (0, 0)))
    taps = [xp[:, i:i + 2 * OH:2, j:j + 2 * OW:2, :] for i in range(4) for j in range(4)]
    return jnp.stack(taps, axis=3).reshape(N * OH * OW, 16 * C)


def _convT_patches(x):
    """3x3 stride-1 taps of the 1-padded input (sub-pixel ConvTranspose decomposition)."""
    N, H, W, C = x.shape
    xp = jnp.pad(x, ((0, 0), (1, 1), (1, 1), (0, 0)))
    taps = [xp[:, dy:dy + H, dx:dx + W, :] for dy in range(3) for dx in range(3)]
    return jnp.stack(taps, axis=3).reshape(N * H * W, 9 * C)


def _pixel_shuffle(flat, N, H, W, oc):
    """(N*H*W, 4*oc) with (phase_r, phase_s, oc) column order -> (N, 2H, 2W, oc)."""
    out = flat.reshape(N, H, W, 2, 2, oc)
    return jnp.transpose(out, (0, 1, 3, 2, 4, 5)).reshape(N, 2 * H, 2 * W, oc)


def conv2d_bn_relu(x, layer):
    N, H, W, _ = x.shape
    oc = layer["g"].shape[0]
    out = _matmul_bn_relu(_conv_patches(x), layer["w"], layer["g"], layer["be"], n_groups=1)
    return out.reshape(N, H // 2, W // 2, oc)


def conv_transpose2d_bn_relu(x, layer):
    N, H, W, _ = x.shape
    oc = layer["g"].shape[0]
    out = _matmul_bn_relu(_convT_patches(x), layer["w"], layer["g"], layer["be"], n_groups=4)
    return _pixel_shuffle(out, N, H, W, oc)


def conv_transpose2d_tanh(x, layer):
    N, H, W, _ = x.shape
    oc = layer["b"].shape[0]
    out = _matmul_bias_tanh(_convT_patches(x), layer["w"], layer["b"], n_groups=4)
    return _pixel_shuffle(out, N, H, W, oc)


# ----------------------------------------------------------------------------
# Parameters
# ----------------------------------------------------------------------------
def init_params(key, in_channels=1, out_channels=1, base_filters=8):
    bf = base_filters
    ks = jax.random.split(key, 6)

    def conv_w(k, oc, ic):
        return 0.05 * jax.random.normal(k, (oc, ic, 4, 4), jnp.float32)

    def convT_w(k, ic, oc):
        return 0.05 * jax.random.normal(k, (ic, oc, 4, 4), jnp.float32)

    def bn(c):
        return jnp.ones((c,), jnp.float32), jnp.zeros((c,), jnp.float32)

    p = {}
    p["enc1_w"], p["enc1_b"] = conv_w(ks[0], bf, in_channels), jnp.zeros((bf,), jnp.float32)
    p["enc1_g"], p["enc1_be"] = bn(bf)
    p["enc2_w"], p["enc2_b"] = conv_w(ks[1], bf * 2, bf), jnp.zeros((bf * 2,), jnp.float32)
    p["enc2_g"], p["enc2_be"] = bn(bf * 2)
    p["bott_w"], p["bott_b"] = conv_w(ks[2], bf * 4, bf * 2), jnp.zeros((bf * 4,), jnp.float32)
    p["bott_g"], p["bott_be"] = bn(bf * 4)
    p["dec2_w"], p["dec2_b"] = convT_w(ks[3], bf * 4, bf * 2), jnp.zeros((bf * 2,), jnp.float32)
    p["dec2_g"], p["dec2_be"] = bn(bf * 2)
    p["dec1_w"], p["dec1_b"] = convT_w(ks[4], bf * 4, bf), jnp.zeros((bf,), jnp.float32)
    p["dec1_g"], p["dec1_be"] = bn(bf)
    p["fin_w"], p["fin_b"] = convT_w(ks[5], bf * 2, out_channels), jnp.zeros((out_channels,), jnp.float32)
    return p


def pack_params(p):
    """One-time weight packing: matmul (K, n_out) layout, pad to lane multiples, cast bf16.
    Conv biases feeding a training-mode BatchNorm cancel exactly in the mean subtraction and
    are therefore not packed."""
    pk = {}
    for name in ("enc1", "enc2", "bott"):
        w = p[name + "_w"]                               # (OC, IC, 4, 4)
        oc, ic = int(w.shape[0]), int(w.shape[1])
        k = 16 * ic
        kp, n_tot = _round_up(k, 128), _round_up(oc, 128)
        wm = jnp.transpose(w, (2, 3, 1, 0)).reshape(k, oc)
        wm = jnp.pad(wm, ((0, kp - k), (0, n_tot - oc))).astype(jnp.bfloat16)
        pk[name] = {"w": wm, "g": p[name + "_g"], "be": p[name + "_be"]}

    for name in ("dec2", "dec1", "fin"):
        w = p[name + "_w"]                               # (IC, OC, 4, 4)
        ic, oc = int(w.shape[0]), int(w.shape[1])
        k = 9 * ic
        kp, n_tot = _round_up(k, 128), _round_up(4 * oc, 128)
        # out[2m+r, 2l+s, :] += xp[m+r+a, l+s+b, :] @ w[:, :, 3-r-2a, 3-s-2b], a,b in {0,1}
        wc = jnp.zeros((3, 3, ic, 2, 2, oc), jnp.float32)
        for r in range(2):
            for s in range(2):
                for da in range(2):
                    for db in range(2):
                        wc = wc.at[r + da, s + db, :, r, s, :].set(
                            w[:, :, 3 - r - 2 * da, 3 - s - 2 * db])
        wm = wc.reshape(k, 4 * oc)
        wm = jnp.pad(wm, ((0, kp - k), (0, n_tot - 4 * oc))).astype(jnp.bfloat16)
        if name == "fin":
            pk[name] = {"w": wm, "b": p[name + "_b"]}
        else:
            pk[name] = {"w": wm, "g": p[name + "_g"], "be": p[name + "_be"]}
    return pk


# ----------------------------------------------------------------------------
# Forward pass
# ----------------------------------------------------------------------------
def _crop_to_match(source, target):
    """Crop source (NHWC) to target's spatial size — mirrors the PyTorch helper."""
    _, h, w, _ = target.shape
    return source[:, :h, :w, :]


def unet_forward(x_nchw, pk):
    x = jnp.transpose(x_nchw, (0, 2, 3, 1)).astype(jnp.bfloat16)   # NHWC, bf16 activations

    e1 = conv2d_bn_relu(x, pk["enc1"])
    e2 = conv2d_bn_relu(e1, pk["enc2"])
    b = conv2d_bn_relu(e2, pk["bott"])

    d2 = conv_transpose2d_bn_relu(b, pk["dec2"])
    # Literal reference semantics: torch.cat([d2, crop(source=d2, target=e2)], channel dim).
    d2 = jnp.concatenate([d2, _crop_to_match(d2, e2)], axis=-1)

    d1 = conv_transpose2d_bn_relu(d2, pk["dec1"])
    d1 = jnp.concatenate([d1, _crop_to_match(d1, e1)], axis=-1)

    out = conv_transpose2d_tanh(d1, pk["fin"])
    return jnp.transpose(out, (0, 3, 1, 2)).astype(jnp.float32)    # NCHW f32


if __name__ == "__main__":
    key = jax.random.PRNGKey(0)
    k_param, k_x = jax.random.split(key)

    in_channels, out_channels, base_filters = 1, 1, 8
    # 32x32 input -> the first/last layers have M = 512 and exercise the multi-M-tile
    # (cross-tile BatchNorm reduction) path; inner layers exercise the single-tile path.
    x = jax.random.normal(k_x, (2, in_channels, 32, 32), jnp.float32)

    params = init_params(k_param, in_channels, out_channels, base_filters)
    packed = pack_params(params)            # one-time packing, outside the jitted forward

    fwd = jax.jit(unet_forward)
    out = jax.block_until_ready(fwd(x, packed))

    assert out.shape == (2, out_channels, 32, 32), out.shape
    assert jnp.all(jnp.isfinite(out))
    print("KERNEL_OK")
</pallas_src>

<mosaic_0001>
module attributes {stable_mosaic.version = 11 : i64} {
  func.func @_matmul_stats_kernel(%arg0: i32, %arg1: i32, %arg2: memref<256x128xbf16, #tpu.memory_space<vmem>>, %arg3: memref<128x128xbf16, #tpu.memory_space<vmem>>, %arg4: memref<256x128xbf16, #tpu.memory_space<vmem>>, %arg5: memref<1x8x128xf32, #tpu.memory_space<vmem>>, %arg6: memref<256x128xf32, #tpu.memory_space<vmem>>) attributes {dimension_semantics = [#tpu.dimension_semantics<parallel>, #tpu.dimension_semantics<arbitrary>], iteration_bounds = array<i64: 2, 1>, scalar_prefetch = 0 : i64, scratch_operands = 1 : i64, tpu.core_type = #tpu.core_type<tc>, window_params = [{transform_indices = @transform_0, window_bounds = array<i64: 256, 128>}, {transform_indices = @transform_1, window_bounds = array<i64: 128, 128>}, {transform_indices = @transform_2, window_bounds = array<i64: 256, 128>}, {transform_indices = @transform_3, window_bounds = array<i64: 1, 8, 128>}]} {
    %c0 = arith.constant 0 : index
    %c0_0 = arith.constant 0 : index
    %0 = vector.load %arg2[%c0, %c0_0] : memref<256x128xbf16, #tpu.memory_space<vmem>>, vector<256x128xbf16>
    %c0_1 = arith.constant 0 : index
    %c0_2 = arith.constant 0 : index
    %1 = vector.load %arg3[%c0_1, %c0_2] : memref<128x128xbf16, #tpu.memory_space<vmem>>, vector<128x128xbf16>
    %cst = arith.constant dense<0.000000e+00> : vector<256x128xf32>
    %2 = tpu.matmul %0, %1, %cst {dimension_numbers = #tpu.dot_dimension_numbers<[1], [0], [0], [1], [0, 0, 1, 1], [], []>} : vector<256x128xbf16>, vector<128x128xbf16>, vector<256x128xf32> -> vector<256x128xf32>
    %c0_i32 = arith.constant 0 : i32
    %3 = arith.cmpi eq, %arg1, %c0_i32 : i32
    %4 = arith.extui %3 : i1 to i32
    %c0_i32_3 = arith.constant 0 : i32
    %5 = arith.cmpi ne, %4, %c0_i32_3 : i32
    scf.if %5 {
      %c0_8 = arith.constant 0 : index
      %c0_9 = arith.constant 0 : index
      %12 = vector.load %arg6[%c0_8, %c0_9] : memref<256x128xf32, #tpu.memory_space<vmem>>, vector<256x128xf32>
      tpu.vector_store %arg6[%c0_8, %c0_9], %2 {strides = array<i32>} : memref<256x128xf32, #tpu.memory_space<vmem>>, vector<256x128xf32>,
    } else {
    }
    %c0_i32_4 = arith.constant 0 : i32
    %6 = arith.cmpi sgt, %arg1, %c0_i32_4 : i32
    %7 = arith.extui %6 : i1 to i32
    %c0_i32_5 = arith.constant 0 : i32
    %8 = arith.cmpi ne, %7, %c0_i32_5 : i32
    scf.if %8 {
      %c0_8 = arith.constant 0 : index
      %c0_9 = arith.constant 0 : index
      %12 = vector.load %arg6[%c0_8, %c0_9] : memref<256x128xf32, #tpu.memory_space<vmem>>, vector<256x128xf32>
      %13 = arith.addf %12, %2 : vector<256x128xf32>
      %c0_10 = arith.constant 0 : index
      %c0_11 = arith.constant 0 : index
      %14 = vector.load %arg6[%c0_10, %c0_11] : memref<256x128xf32, #tpu.memory_space<vmem>>, vector<256x128xf32>
      tpu.vector_store %arg6[%c0_10, %c0_11], %13 {strides = array<i32>} : memref<256x128xf32, #tpu.memory_space<vmem>>, vector<256x128xf32>,
    } else {
    }
    %c0_i32_6 = arith.constant 0 : i32
    %9 = arith.cmpi eq, %arg1, %c0_i32_6 : i32
    %10 = arith.extui %9 : i1 to i32
    %c0_i32_7 = arith.constant 0 : i32
    %11 = arith.cmpi ne, %10, %c0_i32_7 : i32
    scf.if %11 {
      %c0_8 = arith.constant 0 : index
      %c0_9 = arith.constant 0 : index
      %12 = vector.load %arg6[%c0_8, %c0_9] : memref<256x128xf32, #tpu.memory_space<vmem>>, vector<256x128xf32>
      %13 = arith.truncf %12 : vector<256x128xf32> to vector<256x128xbf16>
      %c0_10 = arith.constant 0 : index
      %c0_11 = arith.constant 0 : index
      %14 = vector.load %arg4[%c0_10, %c0_11] : memref<256x128xbf16, #tpu.memory_space<vmem>>, vector<256x128xbf16>
      tpu.vector_store %arg4[%c0_10, %c0_11], %13 {strides = array<i32>} : memref<256x128xbf16, #tpu.memory_space<vmem>>, vector<256x128xbf16>,
      %cst_12 = arith.constant dense<0.000000e+00> : vector<128xf32>
      %15 = vector.multi_reduction <add>, %12, %cst_12 [0] : vector<256x128xf32> to vector<128xf32>
      %16 = vector.shape_cast %15 : vector<128xf32> to vector<1x128xf32>
      %17 = arith.mulf %12, %12 : vector<256x128xf32>
      %cst_13 = arith.constant dense<0.000000e+00> : vector<128xf32>
      %18 = vector.multi_reduction <add>, %17, %cst_13 [0] : vector<256x128xf32> to vector<128xf32>
      %19 = vector.shape_cast %18 : vector<128xf32> to vector<1x128xf32>
      %cst_14 = arith.constant 0.000000e+00 : f32
      %20 = vector.broadcast %cst_14 : f32 to vector<6x128xf32>
      %21 = tpu.concatenate %16, %19, %20 in 0 : vector<1x128xf32>, vector<1x128xf32>, vector<6x128xf32> -> vector<8x128xf32>
      %22 = vector.shape_cast %21 : vector<8x128xf32> to vector<1x8x128xf32>
      %c0_15 = arith.constant 0 : index
      %c0_16 = arith.constant 0 : index
      %c0_17 = arith.constant 0 : index
      %23 = vector.load %arg5[%c0_15, %c0_16, %c0_17] : memref<1x8x128xf32, #tpu.memory_space<vmem>>, vector<1x8x128xf32>
      tpu.vector_store %arg5[%c0_15, %c0_16, %c0_17], %22 {strides = array<i32>} : memref<1x8x128xf32, #tpu.memory_space<vmem>>, vector<1x8x128xf32>,
    } else {
    }
    return
  }
  func.func @transform_0(%arg0: i32, %arg1: i32) -> (i32, i32) {
    %c0_i32 = arith.constant 0 : i32
    return %arg0, %arg1 : i32, i32
  }
  func.func @transform_1(%arg0: i32, %arg1: i32) -> (i32, i32) {
    %c0_i32 = arith.constant 0 : i32
    %c0_i32_0 = arith.constant 0 : i32
    return %arg1, %c0_i32 : i32, i32
  }
  func.func @transform_2(%arg0: i32, %arg1: i32) -> (i32, i32) {
    %c0_i32 = arith.constant 0 : i32
    %c0_i32_0 = arith.constant 0 : i32
    return %arg0, %c0_i32 : i32, i32
  }
  func.func @transform_3(%arg0: i32, %arg1: i32) -> (i32, i32, i32) {
    %c0_i32 = arith.constant 0 : i32
    %c0_i32_0 = arith.constant 0 : i32
    %c0_i32_1 = arith.constant 0 : i32
    return %arg0, %c0_i32, %c0_i32_0 : i32, i32, i32
  }
}

module attributes {stable_mosaic.version = 11 : i64} {
  func.func @_scale_shift_relu_kernel(%arg0: i32, %arg1: memref<256x128xbf16, #tpu.memory_space<vmem>>, %arg2: memref<1x128xf32, #tpu.memory_space<vmem>>, %arg3: memref<1x128xf32, #tpu.memory_space<vmem>>, %arg4: memref<256x128xbf16, #tpu.memory_space<vmem>>) attributes {dimension_semantics = [#tpu.dimension_semantics<parallel>], iteration_bounds = array<i64: 2>, scalar_prefetch = 0 : i64, scratch_operands = 0 : i64, tpu.core_type = #tpu.core_type<tc>, window_params = [{transform_indices = @transform_0, window_bounds = array<i64: 256, 128>}, {pipeline_mode = #tpu.pipeline_mode<synchronous>, transform_indices = @transform_1, window_bounds = array<i64: 1, 128>}, {pipeline_mode = #tpu.pipeline_mode<synchronous>, transform_indices = @transform_2, window_bounds = array<i64: 1, 128>}, {transform_indices = @transform_3, window_bounds = array<i64: 256, 128>}]} {
    %c0 = arith.constant 0 : index
    %c0_0 = arith.constant 0 : index
    %0 = vector.load %arg1[%c0, %c0_0] : memref<256x128xbf16, #tpu.memory_space<vmem>>, vector<256x128xbf16>
    %1 = arith.extf %0 : vector<256x128xbf16> to vector<256x128xf32>
    %c0_1 = arith.constant 0 : index
    %c0_2 = arith.constant 0 : index
    %2 = vector.load %arg2[%c0_1, %c0_2] : memref<1x128xf32, #tpu.memory_space<vmem>>, vector<1x128xf32>
    %3 = vector.broadcast %2 : vector<1x128xf32> to vector<256x128xf32>
    %4 = arith.mulf %1, %3 : vector<256x128xf32>
    %c0_3 = arith.constant 0 : index
    %c0_4 = arith.constant 0 : index
    %5 = vector.load %arg3[%c0_3, %c0_4] : memref<1x128xf32, #tpu.memory_space<vmem>>, vector<1x128xf32>
    %6 = vector.broadcast %5 : vector<1x128xf32> to vector<256x128xf32>
    %7 = arith.addf %4, %6 : vector<256x128xf32>
    %cst = arith.constant 0.000000e+00 : f32
    %8 = vector.broadcast %cst : f32 to vector<256x128xf32>
    %9 = arith.maximumf %7, %8 : vector<256x128xf32>
    %10 = arith.truncf %9 : vector<256x128xf32> to vector<256x128xbf16>
    %c0_5 = arith.constant 0 : index
    %c0_6 = arith.constant 0 : index
    %11 = vector.load %arg4[%c0_5, %c0_6] : memref<256x128xbf16, #tpu.memory_space<vmem>>, vector<256x128xbf16>
    tpu.vector_store %arg4[%c0_5, %c0_6], %10 {strides = array<i32>} : memref<256x128xbf16, #tpu.memory_space<vmem>>, vector<256x128xbf16>,
    return
  }
  func.func @transform_0(%arg0: i32) -> (i32, i32) {
    %c0_i32 = arith.constant 0 : i32
    %c0_i32_0 = arith.constant 0 : i32
    return %arg0, %c0_i32 : i32, i32
  }
  func.func @transform_1(%arg0: i32) -> (i32, i32) {
    %c0_i32 = arith.constant 0 : i32
    %c0_i32_0 = arith.constant 0 : i32
    %c0_i32_1 = arith.constant 0 : i32
    return %c0_i32, %c0_i32_0 : i32, i32
  }
  func.func @transform_2(%arg0: i32) -> (i32, i32) {
    %c0_i32 = arith.constant 0 : i32
    %c0_i32_0 = arith.constant 0 : i32
    %c0_i32_1 = arith.constant 0 : i32
    return %c0_i32, %c0_i32_0 : i32, i32
  }
  func.func @transform_3(%arg0: i32) -> (i32, i32) {
    %c0_i32 = arith.constant 0 : i32
    %c0_i32_0 = arith.constant 0 : i32
    return %arg0, %c0_i32 : i32, i32
  }
}

module attributes {stable_mosaic.version = 11 : i64} {
  func.func @_matmul_stats_kernel(%arg0: i32, %arg1: i32, %arg2: memref<128x128xbf16, #tpu.memory_space<vmem>>, %arg3: memref<128x128xbf16, #tpu.memory_space<vmem>>, %arg4: memref<128x128xbf16, #tpu.memory_space<vmem>>, %arg5: memref<1x8x128xf32, #tpu.memory_space<vmem>>, %arg6: memref<128x128xf32, #tpu.memory_space<vmem>>) attributes {dimension_semantics = [#tpu.dimension_semantics<parallel>, #tpu.dimension_semantics<arbitrary>], iteration_bounds = array<i64: 1, 1>, scalar_prefetch = 0 : i64, scratch_operands = 1 : i64, tpu.core_type = #tpu.core_type<tc>, window_params = [{transform_indices = @transform_0, window_bounds = array<i64: 128, 128>}, {transform_indices = @transform_1, window_bounds = array<i64: 128, 128>}, {transform_indices = @transform_2, window_bounds = array<i64: 128, 128>}, {transform_indices = @transform_3, window_bounds = array<i64: 1, 8, 128>}]} {
    %c0 = arith.constant 0 : index
    %c0_0 = arith.constant 0 : index
    %0 = vector.load %arg2[%c0, %c0_0] : memref<128x128xbf16, #tpu.memory_space<vmem>>, vector<128x128xbf16>
    %c0_1 = arith.constant 0 : index
    %c0_2 = arith.constant 0 : index
    %1 = vector.load %arg3[%c0_1, %c0_2] : memref<128x128xbf16, #tpu.memory_space<vmem>>, vector<128x128xbf16>
    %cst = arith.constant dense<0.000000e+00> : vector<128x128xf32>
    %2 = tpu.matmul %0, %1, %cst {dimension_numbers = #tpu.dot_dimension_numbers<[1], [0], [0], [1], [0, 0, 1, 1], [], []>} : vector<128x128xbf16>, vector<128x128xbf16>, vector<128x128xf32> -> vector<128x128xf32>
    %c0_i32 = arith.constant 0 : i32
    %3 = arith.cmpi eq, %arg1, %c0_i32 : i32
    %4 = arith.extui %3 : i1 to i32
    %c0_i32_3 = arith.constant 0 : i32
    %5 = arith.cmpi ne, %4, %c0_i32_3 : i32
    scf.if %5 {
      %c0_8 = arith.constant 0 : index
      %c0_9 = arith.constant 0 : index
      %12 = vector.load %arg6[%c0_8, %c0_9] : memref<128x128xf32, #tpu.memory_space<vmem>>, vector<128x128xf32>
      tpu.vector_store %arg6[%c0_8, %c0_9], %2 {strides = array<i32>} : memref<128x128xf32, #tpu.memory_space<vmem>>, vector<128x128xf32>,
    } else {
    }
    %c0_i32_4 = arith.constant 0 : i32
    %6 = arith.cmpi sgt, %arg1, %c0_i32_4 : i32
    %7 = arith.extui %6 : i1 to i32
    %c0_i32_5 = arith.constant 0 : i32
    %8 = arith.cmpi ne, %7, %c0_i32_5 : i32
    scf.if %8 {
      %c0_8 = arith.constant 0 : index
      %c0_9 = arith.constant 0 : index
      %12 = vector.load %arg6[%c0_8, %c0_9] : memref<128x128xf32, #tpu.memory_space<vmem>>, vector<128x128xf32>
      %13 = arith.addf %12, %2 : vector<128x128xf32>
      %c0_10 = arith.constant 0 : index
      %c0_11 = arith.constant 0 : index
      %14 = vector.load %arg6[%c0_10, %c0_11] : memref<128x128xf32, #tpu.memory_space<vmem>>, vector<128x128xf32>
      tpu.vector_store %arg6[%c0_10, %c0_11], %13 {strides = array<i32>} : memref<128x128xf32, #tpu.memory_space<vmem>>, vector<128x128xf32>,
    } else {
    }
    %c0_i32_6 = arith.constant 0 : i32
    %9 = arith.cmpi eq, %arg1, %c0_i32_6 : i32
    %10 = arith.extui %9 : i1 to i32
    %c0_i32_7 = arith.constant 0 : i32
    %11 = arith.cmpi ne, %10, %c0_i32_7 : i32
    scf.if %11 {
      %c0_8 = arith.constant 0 : index
      %c0_9 = arith.constant 0 : index
      %12 = vector.load %arg6[%c0_8, %c0_9] : memref<128x128xf32, #tpu.memory_space<vmem>>, vector<128x128xf32>
      %13 = arith.truncf %12 : vector<128x128xf32> to vector<128x128xbf16>
      %c0_10 = arith.constant 0 : index
      %c0_11 = arith.constant 0 : index
      %14 = vector.load %arg4[%c0_10, %c0_11] : memref<128x128xbf16, #tpu.memory_space<vmem>>, vector<128x128xbf16>
      tpu.vector_store %arg4[%c0_10, %c0_11], %13 {strides = array<i32>} : memref<128x128xbf16, #tpu.memory_space<vmem>>, vector<128x128xbf16>,
      %cst_12 = arith.constant dense<0.000000e+00> : vector<128xf32>
      %15 = vector.multi_reduction <add>, %12, %cst_12 [0] : vector<128x128xf32> to vector<128xf32>
      %16 = vector.shape_cast %15 : vector<128xf32> to vector<1x128xf32>
      %17 = arith.mulf %12, %12 : vector<128x128xf32>
      %cst_13 = arith.constant dense<0.000000e+00> : vector<128xf32>
      %18 = vector.multi_reduction <add>, %17, %cst_13 [0] : vector<128x128xf32> to vector<128xf32>
      %19 = vector.shape_cast %18 : vector<128xf32> to vector<1x128xf32>
      %cst_14 = arith.constant 0.000000e+00 : f32
      %20 = vector.broadcast %cst_14 : f32 to vector<6x128xf32>
      %21 = tpu.concatenate %16, %19, %20 in 0 : vector<1x128xf32>, vector<1x128xf32>, vector<6x128xf32> -> vector<8x128xf32>
      %22 = vector.shape_cast %21 : vector<8x128xf32> to vector<1x8x128xf32>
      %c0_15 = arith.constant 0 : index
      %c0_16 = arith.constant 0 : index
      %c0_17 = arith.constant 0 : index
      %23 = vector.load %arg5[%c0_15, %c0_16, %c0_17] : memref<1x8x128xf32, #tpu.memory_space<vmem>>, vector<1x8x128xf32>
      tpu.vector_store %arg5[%c0_15, %c0_16, %c0_17], %22 {strides = array<i32>} : memref<1x8x128xf32, #tpu.memory_space<vmem>>, vector<1x8x128xf32>,
    } else {
    }
    return
  }
  func.func @transform_0(%arg0: i32, %arg1: i32) -> (i32, i32) {
    %c0_i32 = arith.constant 0 : i32
    return %arg0, %arg1 : i32, i32
  }
  func.func @transform_1(%arg0: i32, %arg1: i32) -> (i32, i32) {
    %c0_i32 = arith.constant 0 : i32
    %c0_i32_0 = arith.constant 0 : i32
    return %arg1, %c0_i32 : i32, i32
  }
  func.func @transform_2(%arg0: i32, %arg1: i32) -> (i32, i32) {
    %c0_i32 = arith.constant 0 : i32
    %c0_i32_0 = arith.constant 0 : i32
    return %arg0, %c0_i32 : i32, i32
  }
  func.func @transform_3(%arg0: i32, %arg1: i32) -> (i32, i32, i32) {
    %c0_i32 = arith.constant 0 : i32
    %c0_i32_0 = arith.constant 0 : i32
    %c0_i32_1 = arith.constant 0 : i32
    return %arg0, %c0_i32, %c0_i32_0 : i32, i32, i32
  }
}

module attributes {stable_mosaic.version = 11 : i64} {
  func.func @_scale_shift_relu_kernel(%arg0: i32, %arg1: memref<128x128xbf16, #tpu.memory_space<vmem>>, %arg2: memref<1x128xf32, #tpu.memory_space<vmem>>, %arg3: memref<1x128xf32, #tpu.memory_space<vmem>>, %arg4: memref<128x128xbf16, #tpu.memory_space<vmem>>) attributes {dimension_semantics = [#tpu.dimension_semantics<parallel>], iteration_bounds = array<i64: 1>, scalar_prefetch = 0 : i64, scratch_operands = 0 : i64, tpu.core_type = #tpu.core_type<tc>, window_params = [{transform_indices = @transform_0, window_bounds = array<i64: 128, 128>}, {pipeline_mode = #tpu.pipeline_mode<synchronous>, transform_indices = @transform_1, window_bounds = array<i64: 1, 128>}, {pipeline_mode = #tpu.pipeline_mode<synchronous>, transform_indices = @transform_2, window_bounds = array<i64: 1, 128>}, {transform_indices = @transform_3, window_bounds = array<i64: 128, 128>}]} {
    %c0 = arith.constant 0 : index
    %c0_0 = arith.constant 0 : index
    %0 = vector.load %arg1[%c0, %c0_0] : memref<128x128xbf16, #tpu.memory_space<vmem>>, vector<128x128xbf16>
    %1 = arith.extf %0 : vector<128x128xbf16> to vector<128x128xf32>
    %c0_1 = arith.constant 0 : index
    %c0_2 = arith.constant 0 : index
    %2 = vector.load %arg2[%c0_1, %c0_2] : memref<1x128xf32, #tpu.memory_space<vmem>>, vector<1x128xf32>
    %3 = vector.broadcast %2 : vector<1x128xf32> to vector<128x128xf32>
    %4 = arith.mulf %1, %3 : vector<128x128xf32>
    %c0_3 = arith.constant 0 : index
    %c0_4 = arith.constant 0 : index
    %5 = vector.load %arg3[%c0_3, %c0_4] : memref<1x128xf32, #tpu.memory_space<vmem>>, vector<1x128xf32>
    %6 = vector.broadcast %5 : vector<1x128xf32> to vector<128x128xf32>
    %7 = arith.addf %4, %6 : vector<128x128xf32>
    %cst = arith.constant 0.000000e+00 : f32
    %8 = vector.broadcast %cst : f32 to vector<128x128xf32>
    %9 = arith.maximumf %7, %8 : vector<128x128xf32>
    %10 = arith.truncf %9 : vector<128x128xf32> to vector<128x128xbf16>
    %c0_5 = arith.constant 0 : index
    %c0_6 = arith.constant 0 : index
    %11 = vector.load %arg4[%c0_5, %c0_6] : memref<128x128xbf16, #tpu.memory_space<vmem>>, vector<128x128xbf16>
    tpu.vector_store %arg4[%c0_5, %c0_6], %10 {strides = array<i32>} : memref<128x128xbf16, #tpu.memory_space<vmem>>, vector<128x128xbf16>,
    return
  }
  func.func @transform_0(%arg0: i32) -> (i32, i32) {
    %c0_i32 = arith.constant 0 : i32
    %c0_i32_0 = arith.constant 0 : i32
    return %arg0, %c0_i32 : i32, i32
  }
  func.func @transform_1(%arg0: i32) -> (i32, i32) {
    %c0_i32 = arith.constant 0 : i32
    %c0_i32_0 = arith.constant 0 : i32
    %c0_i32_1 = arith.constant 0 : i32
    return %c0_i32, %c0_i32_0 : i32, i32
  }
  func.func @transform_2(%arg0: i32) -> (i32, i32) {
    %c0_i32 = arith.constant 0 : i32
    %c0_i32_0 = arith.constant 0 : i32
    %c0_i32_1 = arith.constant 0 : i32
    return %c0_i32, %c0_i32_0 : i32, i32
  }
  func.func @transform_3(%arg0: i32) -> (i32, i32) {
    %c0_i32 = arith.constant 0 : i32
    %c0_i32_0 = arith.constant 0 : i32
    return %arg0, %c0_i32 : i32, i32
  }
}

module attributes {stable_mosaic.version = 11 : i64} {
  func.func @_matmul_stats_kernel(%arg0: i32, %arg1: i32, %arg2: memref<32x256xbf16, #tpu.memory_space<vmem>>, %arg3: memref<256x128xbf16, #tpu.memory_space<vmem>>, %arg4: memref<32x128xbf16, #tpu.memory_space<vmem>>, %arg5: memref<1x8x128xf32, #tpu.memory_space<vmem>>, %arg6: memref<32x128xf32, #tpu.memory_space<vmem>>) attributes {dimension_semantics = [#tpu.dimension_semantics<parallel>, #tpu.dimension_semantics<arbitrary>], iteration_bounds = array<i64: 1, 1>, scalar_prefetch = 0 : i64, scratch_operands = 1 : i64, tpu.core_type = #tpu.core_type<tc>, window_params = [{transform_indices = @transform_0, window_bounds = array<i64: 32, 256>}, {transform_indices = @transform_1, window_bounds = array<i64: 256, 128>}, {transform_indices = @transform_2, window_bounds = array<i64: 32, 128>}, {transform_indices = @transform_3, window_bounds = array<i64: 1, 8, 128>}]} {
    %c0 = arith.constant 0 : index
    %c0_0 = arith.constant 0 : index
    %0 = vector.load %arg2[%c0, %c0_0] : memref<32x256xbf16, #tpu.memory_space<vmem>>, vector<32x256xbf16>
    %c0_1 = arith.constant 0 : index
    %c0_2 = arith.constant 0 : index
    %1 = vector.load %arg3[%c0_1, %c0_2] : memref<256x128xbf16, #tpu.memory_space<vmem>>, vector<256x128xbf16>
    %cst = arith.constant dense<0.000000e+00> : vector<32x128xf32>
    %2 = tpu.matmul %0, %1, %cst {dimension_numbers = #tpu.dot_dimension_numbers<[1], [0], [0], [1], [0, 0, 1, 1], [], []>} : vector<32x256xbf16>, vector<256x128xbf16>, vector<32x128xf32> -> vector<32x128xf32>
    %c0_i32 = arith.constant 0 : i32
    %3 = arith.cmpi eq, %arg1, %c0_i32 : i32
    %4 = arith.extui %3 : i1 to i32
    %c0_i32_3 = arith.constant 0 : i32
    %5 = arith.cmpi ne, %4, %c0_i32_3 : i32
    scf.if %5 {
      %c0_8 = arith.constant 0 : index
      %c0_9 = arith.constant 0 : index
      %12 = vector.load %arg6[%c0_8, %c0_9] : memref<32x128xf32, #tpu.memory_space<vmem>>, vector<32x128xf32>
      tpu.vector_store %arg6[%c0_8, %c0_9], %2 {strides = array<i32>} : memref<32x128xf32, #tpu.memory_space<vmem>>, vector<32x128xf32>,
    } else {
    }
    %c0_i32_4 = arith.constant 0 : i32
    %6 = arith.cmpi sgt, %arg1, %c0_i32_4 : i32
    %7 = arith.extui %6 : i1 to i32
    %c0_i32_5 = arith.constant 0 : i32
    %8 = arith.cmpi ne, %7, %c0_i32_5 : i32
    scf.if %8 {
      %c0_8 = arith.constant 0 : index
      %c0_9 = arith.constant 0 : index
      %12 = vector.load %arg6[%c0_8, %c0_9] : memref<32x128xf32, #tpu.memory_space<vmem>>, vector<32x128xf32>
      %13 = arith.addf %12, %2 : vector<32x128xf32>
      %c0_10 = arith.constant 0 : index
      %c0_11 = arith.constant 0 : index
      %14 = vector.load %arg6[%c0_10, %c0_11] : memref<32x128xf32, #tpu.memory_space<vmem>>, vector<32x128xf32>
      tpu.vector_store %arg6[%c0_10, %c0_11], %13 {strides = array<i32>} : memref<32x128xf32, #tpu.memory_space<vmem>>, vector<32x128xf32>,
    } else {
    }
    %c0_i32_6 = arith.constant 0 : i32
    %9 = arith.cmpi eq, %arg1, %c0_i32_6 : i32
    %10 = arith.extui %9 : i1 to i32
    %c0_i32_7 = arith.constant 0 : i32
    %11 = arith.cmpi ne, %10, %c0_i32_7 : i32
    scf.if %11 {
      %c0_8 = arith.constant 0 : index
      %c0_9 = arith.constant 0 : index
      %12 = vector.load %arg6[%c0_8, %c0_9] : memref<32x128xf32, #tpu.memory_space<vmem>>, vector<32x128xf32>
      %13 = arith.truncf %12 : vector<32x128xf32> to vector<32x128xbf16>
      %c0_10 = arith.constant 0 : index
      %c0_11 = arith.constant 0 : index
      %14 = vector.load %arg4[%c0_10, %c0_11] : memref<32x128xbf16, #tpu.memory_space<vmem>>, vector<32x128xbf16>
      tpu.vector_store %arg4[%c0_10, %c0_11], %13 {strides = array<i32>} : memref<32x128xbf16, #tpu.memory_space<vmem>>, vector<32x128xbf16>,
      %cst_12 = arith.constant dense<0.000000e+00> : vector<128xf32>
      %15 = vector.multi_reduction <add>, %12, %cst_12 [0] : vector<32x128xf32> to vector<128xf32>
      %16 = vector.shape_cast %15 : vector<128xf32> to vector<1x128xf32>
      %17 = arith.mulf %12, %12 : vector<32x128xf32>
      %cst_13 = arith.constant dense<0.000000e+00> : vector<128xf32>
      %18 = vector.multi_reduction <add>, %17, %cst_13 [0] : vector<32x128xf32> to vector<128xf32>
      %19 = vector.shape_cast %18 : vector<128xf32> to vector<1x128xf32>
      %cst_14 = arith.constant 0.000000e+00 : f32
      %20 = vector.broadcast %cst_14 : f32 to vector<6x128xf32>
      %21 = tpu.concatenate %16, %19, %20 in 0 : vector<1x128xf32>, vector<1x128xf32>, vector<6x128xf32> -> vector<8x128xf32>
      %22 = vector.shape_cast %21 : vector<8x128xf32> to vector<1x8x128xf32>
      %c0_15 = arith.constant 0 : index
      %c0_16 = arith.constant 0 : index
      %c0_17 = arith.constant 0 : index
      %23 = vector.load %arg5[%c0_15, %c0_16, %c0_17] : memref<1x8x128xf32, #tpu.memory_space<vmem>>, vector<1x8x128xf32>
      tpu.vector_store %arg5[%c0_15, %c0_16, %c0_17], %22 {strides = array<i32>} : memref<1x8x128xf32, #tpu.memory_space<vmem>>, vector<1x8x128xf32>,
    } else {
    }
    return
  }
  func.func @transform_0(%arg0: i32, %arg1: i32) -> (i32, i32) {
    %c0_i32 = arith.constant 0 : i32
    return %arg0, %arg1 : i32, i32
  }
  func.func @transform_1(%arg0: i32, %arg1: i32) -> (i32, i32) {
    %c0_i32 = arith.constant 0 : i32
    %c0_i32_0 = arith.constant 0 : i32
    return %arg1, %c0_i32 : i32, i32
  }
  func.func @transform_2(%arg0: i32, %arg1: i32) -> (i32, i32) {
    %c0_i32 = arith.constant 0 : i32
    %c0_i32_0 = arith.constant 0 : i32
    return %arg0, %c0_i32 : i32, i32
  }
  func.func @transform_3(%arg0: i32, %arg1: i32) -> (i32, i32, i32) {
    %c0_i32 = arith.constant 0 : i32
    %c0_i32_0 = arith.constant 0 : i32
    %c0_i32_1 = arith.constant 0 : i32
    return %arg0, %c0_i32, %c0_i32_0 : i32, i32, i32
  }
}

module attributes {stable_mosaic.version = 11 : i64} {
  func.func @_scale_shift_relu_kernel(%arg0: i32, %arg1: memref<32x128xbf16, #tpu.memory_space<vmem>>, %arg2: memref<1x128xf32, #tpu.memory_space<vmem>>, %arg3: memref<1x128xf32, #tpu.memory_space<vmem>>, %arg4: memref<32x128xbf16, #tpu.memory_space<vmem>>) attributes {dimension_semantics = [#tpu.dimension_semantics<parallel>], iteration_bounds = array<i64: 1>, scalar_prefetch = 0 : i64, scratch_operands = 0 : i64, tpu.core_type = #tpu.core_type<tc>, window_params = [{transform_indices = @transform_0, window_bounds = array<i64: 32, 128>}, {pipeline_mode = #tpu.pipeline_mode<synchronous>, transform_indices = @transform_1, window_bounds = array<i64: 1, 128>}, {pipeline_mode = #tpu.pipeline_mode<synchronous>, transform_indices = @transform_2, window_bounds = array<i64: 1, 128>}, {transform_indices = @transform_3, window_bounds = array<i64: 32, 128>}]} {
    %c0 = arith.constant 0 : index
    %c0_0 = arith.constant 0 : index
    %0 = vector.load %arg1[%c0, %c0_0] : memref<32x128xbf16, #tpu.memory_space<vmem>>, vector<32x128xbf16>
    %1 = arith.extf %0 : vector<32x128xbf16> to vector<32x128xf32>
    %c0_1 = arith.constant 0 : index
    %c0_2 = arith.constant 0 : index
    %2 = vector.load %arg2[%c0_1, %c0_2] : memref<1x128xf32, #tpu.memory_space<vmem>>, vector<1x128xf32>
    %3 = vector.broadcast %2 : vector<1x128xf32> to vector<32x128xf32>
    %4 = arith.mulf %1, %3 : vector<32x128xf32>
    %c0_3 = arith.constant 0 : index
    %c0_4 = arith.constant 0 : index
    %5 = vector.load %arg3[%c0_3, %c0_4] : memref<1x128xf32, #tpu.memory_space<vmem>>, vector<1x128xf32>
    %6 = vector.broadcast %5 : vector<1x128xf32> to vector<32x128xf32>
    %7 = arith.addf %4, %6 : vector<32x128xf32>
    %cst = arith.constant 0.000000e+00 : f32
    %8 = vector.broadcast %cst : f32 to vector<32x128xf32>
    %9 = arith.maximumf %7, %8 : vector<32x128xf32>
    %10 = arith.truncf %9 : vector<32x128xf32> to vector<32x128xbf16>
    %c0_5 = arith.constant 0 : index
    %c0_6 = arith.constant 0 : index
    %11 = vector.load %arg4[%c0_5, %c0_6] : memref<32x128xbf16, #tpu.memory_space<vmem>>, vector<32x128xbf16>
    tpu.vector_store %arg4[%c0_5, %c0_6], %10 {strides = array<i32>} : memref<32x128xbf16, #tpu.memory_space<vmem>>, vector<32x128xbf16>,
    return
  }
  func.func @transform_0(%arg0: i32) -> (i32, i32) {
    %c0_i32 = arith.constant 0 : i32
    %c0_i32_0 = arith.constant 0 : i32
    return %arg0, %c0_i32 : i32, i32
  }
  func.func @transform_1(%arg0: i32) -> (i32, i32) {
    %c0_i32 = arith.constant 0 : i32
    %c0_i32_0 = arith.constant 0 : i32
    %c0_i32_1 = arith.constant 0 : i32
    return %c0_i32, %c0_i32_0 : i32, i32
  }
  func.func @transform_2(%arg0: i32) -> (i32, i32) {
    %c0_i32 = arith.constant 0 : i32
    %c0_i32_0 = arith.constant 0 : i32
    %c0_i32_1 = arith.constant 0 : i32
    return %c0_i32, %c0_i32_0 : i32, i32
  }
  func.func @transform_3(%arg0: i32) -> (i32, i32) {
    %c0_i32 = arith.constant 0 : i32
    %c0_i32_0 = arith.constant 0 : i32
    return %arg0, %c0_i32 : i32, i32
  }
}

module attributes {stable_mosaic.version = 11 : i64} {
  func.func @_matmul_stats_kernel(%arg0: i32, %arg1: i32, %arg2: memref<32x384xbf16, #tpu.memory_space<vmem>>, %arg3: memref<384x128xbf16, #tpu.memory_space<vmem>>, %arg4: memref<32x128xbf16, #tpu.memory_space<vmem>>, %arg5: memref<1x8x128xf32, #tpu.memory_space<vmem>>, %arg6: memref<32x128xf32, #tpu.memory_space<vmem>>) attributes {dimension_semantics = [#tpu.dimension_semantics<parallel>, #tpu.dimension_semantics<arbitrary>], iteration_bounds = array<i64: 1, 1>, scalar_prefetch = 0 : i64, scratch_operands = 1 : i64, tpu.core_type = #tpu.core_type<tc>, window_params = [{transform_indices = @transform_0, window_bounds = array<i64: 32, 384>}, {transform_indices = @transform_1, window_bounds = array<i64: 384, 128>}, {transform_indices = @transform_2, window_bounds = array<i64: 32, 128>}, {transform_indices = @transform_3, window_bounds = array<i64: 1, 8, 128>}]} {
    %c0 = arith.constant 0 : index
    %c0_0 = arith.constant 0 : index
    %0 = vector.load %arg2[%c0, %c0_0] : memref<32x384xbf16, #tpu.memory_space<vmem>>, vector<32x384xbf16>
    %c0_1 = arith.constant 0 : index
    %c0_2 = arith.constant 0 : index
    %1 = vector.load %arg3[%c0_1, %c0_2] : memref<384x128xbf16, #tpu.memory_space<vmem>>, vector<384x128xbf16>
    %cst = arith.constant dense<0.000000e+00> : vector<32x128xf32>
    %2 = tpu.matmul %0, %1, %cst {dimension_numbers = #tpu.dot_dimension_numbers<[1], [0], [0], [1], [0, 0, 1, 1], [], []>} : vector<32x384xbf16>, vector<384x128xbf16>, vector<32x128xf32> -> vector<32x128xf32>
    %c0_i32 = arith.constant 0 : i32
    %3 = arith.cmpi eq, %arg1, %c0_i32 : i32
    %4 = arith.extui %3 : i1 to i32
    %c0_i32_3 = arith.constant 0 : i32
    %5 = arith.cmpi ne, %4, %c0_i32_3 : i32
    scf.if %5 {
      %c0_8 = arith.constant 0 : index
      %c0_9 = arith.constant 0 : index
      %12 = vector.load %arg6[%c0_8, %c0_9] : memref<32x128xf32, #tpu.memory_space<vmem>>, vector<32x128xf32>
      tpu.vector_store %arg6[%c0_8, %c0_9], %2 {strides = array<i32>} : memref<32x128xf32, #tpu.memory_space<vmem>>, vector<32x128xf32>,
    } else {
    }
    %c0_i32_4 = arith.constant 0 : i32
    %6 = arith.cmpi sgt, %arg1, %c0_i32_4 : i32
    %7 = arith.extui %6 : i1 to i32
    %c0_i32_5 = arith.constant 0 : i32
    %8 = arith.cmpi ne, %7, %c0_i32_5 : i32
    scf.if %8 {
      %c0_8 = arith.constant 0 : index
      %c0_9 = arith.constant 0 : index
      %12 = vector.load %arg6[%c0_8, %c0_9] : memref<32x128xf32, #tpu.memory_space<vmem>>, vector<32x128xf32>
      %13 = arith.addf %12, %2 : vector<32x128xf32>
      %c0_10 = arith.constant 0 : index
      %c0_11 = arith.constant 0 : index
      %14 = vector.load %arg6[%c0_10, %c0_11] : memref<32x128xf32, #tpu.memory_space<vmem>>, vector<32x128xf32>
      tpu.vector_store %arg6[%c0_10, %c0_11], %13 {strides = array<i32>} : memref<32x128xf32, #tpu.memory_space<vmem>>, vector<32x128xf32>,
    } else {
    }
    %c0_i32_6 = arith.constant 0 : i32
    %9 = arith.cmpi eq, %arg1, %c0_i32_6 : i32
    %10 = arith.extui %9 : i1 to i32
    %c0_i32_7 = arith.constant 0 : i32
    %11 = arith.cmpi ne, %10, %c0_i32_7 : i32
    scf.if %11 {
      %c0_8 = arith.constant 0 : index
      %c0_9 = arith.constant 0 : index
      %12 = vector.load %arg6[%c0_8, %c0_9] : memref<32x128xf32, #tpu.memory_space<vmem>>, vector<32x128xf32>
      %13 = arith.truncf %12 : vector<32x128xf32> to vector<32x128xbf16>
      %c0_10 = arith.constant 0 : index
      %c0_11 = arith.constant 0 : index
      %14 = vector.load %arg4[%c0_10, %c0_11] : memref<32x128xbf16, #tpu.memory_space<vmem>>, vector<32x128xbf16>
      tpu.vector_store %arg4[%c0_10, %c0_11], %13 {strides = array<i32>} : memref<32x128xbf16, #tpu.memory_space<vmem>>, vector<32x128xbf16>,
      %cst_12 = arith.constant dense<0.000000e+00> : vector<128xf32>
      %15 = vector.multi_reduction <add>, %12, %cst_12 [0] : vector<32x128xf32> to vector<128xf32>
      %16 = vector.shape_cast %15 : vector<128xf32> to vector<1x128xf32>
      %17 = arith.mulf %12, %12 : vector<32x128xf32>
      %cst_13 = arith.constant dense<0.000000e+00> : vector<128xf32>
      %18 = vector.multi_reduction <add>, %17, %cst_13 [0] : vector<32x128xf32> to vector<128xf32>
      %19 = vector.shape_cast %18 : vector<128xf32> to vector<1x128xf32>
      %cst_14 = arith.constant 0.000000e+00 : f32
      %20 = vector.broadcast %cst_14 : f32 to vector<6x128xf32>
      %21 = tpu.concatenate %16, %19, %20 in 0 : vector<1x128xf32>, vector<1x128xf32>, vector<6x128xf32> -> vector<8x128xf32>
      %22 = vector.shape_cast %21 : vector<8x128xf32> to vector<1x8x128xf32>
      %c0_15 = arith.constant 0 : index
      %c0_16 = arith.constant 0 : index
      %c0_17 = arith.constant 0 : index
      %23 = vector.load %arg5[%c0_15, %c0_16, %c0_17] : memref<1x8x128xf32, #tpu.memory_space<vmem>>, vector<1x8x128xf32>
      tpu.vector_store %arg5[%c0_15, %c0_16, %c0_17], %22 {strides = array<i32>} : memref<1x8x128xf32, #tpu.memory_space<vmem>>, vector<1x8x128xf32>,
    } else {
    }
    return
  }
  func.func @transform_0(%arg0: i32, %arg1: i32) -> (i32, i32) {
    %c0_i32 = arith.constant 0 : i32
    return %arg0, %arg1 : i32, i32
  }
  func.func @transform_1(%arg0: i32, %arg1: i32) -> (i32, i32) {
    %c0_i32 = arith.constant 0 : i32
    %c0_i32_0 = arith.constant 0 : i32
    return %arg1, %c0_i32 : i32, i32
  }
  func.func @transform_2(%arg0: i32, %arg1: i32) -> (i32, i32) {
    %c0_i32 = arith.constant 0 : i32
    %c0_i32_0 = arith.constant 0 : i32
    return %arg0, %c0_i32 : i32, i32
  }
  func.func @transform_3(%arg0: i32, %arg1: i32) -> (i32, i32, i32) {
    %c0_i32 = arith.constant 0 : i32
    %c0_i32_0 = arith.constant 0 : i32
    %c0_i32_1 = arith.constant 0 : i32
    return %arg0, %c0_i32, %c0_i32_0 : i32, i32, i32
  }
}

module attributes {stable_mosaic.version = 11 : i64} {
  func.func @_matmul_stats_kernel(%arg0: i32, %arg1: i32, %arg2: memref<128x384xbf16, #tpu.memory_space<vmem>>, %arg3: memref<384x128xbf16, #tpu.memory_space<vmem>>, %arg4: memref<128x128xbf16, #tpu.memory_space<vmem>>, %arg5: memref<1x8x128xf32, #tpu.memory_space<vmem>>, %arg6: memref<128x128xf32, #tpu.memory_space<vmem>>) attributes {dimension_semantics = [#tpu.dimension_semantics<parallel>, #tpu.dimension_semantics<arbitrary>], iteration_bounds = array<i64: 1, 1>, scalar_prefetch = 0 : i64, scratch_operands = 1 : i64, tpu.core_type = #tpu.core_type<tc>, window_params = [{transform_indices = @transform_0, window_bounds = array<i64: 128, 384>}, {transform_indices = @transform_1, window_bounds = array<i64: 384, 128>}, {transform_indices = @transform_2, window_bounds = array<i64: 128, 128>}, {transform_indices = @transform_3, window_bounds = array<i64: 1, 8, 128>}]} {
    %c0 = arith.constant 0 : index
    %c0_0 = arith.constant 0 : index
    %0 = vector.load %arg2[%c0, %c0_0] : memref<128x384xbf16, #tpu.memory_space<vmem>>, vector<128x384xbf16>
    %c0_1 = arith.constant 0 : index
    %c0_2 = arith.constant 0 : index
    %1 = vector.load %arg3[%c0_1, %c0_2] : memref<384x128xbf16, #tpu.memory_space<vmem>>, vector<384x128xbf16>
    %cst = arith.constant dense<0.000000e+00> : vector<128x128xf32>
    %2 = tpu.matmul %0, %1, %cst {dimension_numbers = #tpu.dot_dimension_numbers<[1], [0], [0], [1], [0, 0, 1, 1], [], []>} : vector<128x384xbf16>, vector<384x128xbf16>, vector<128x128xf32> -> vector<128x128xf32>
    %c0_i32 = arith.constant 0 : i32
    %3 = arith.cmpi eq, %arg1, %c0_i32 : i32
    %4 = arith.extui %3 : i1 to i32
    %c0_i32_3 = arith.constant 0 : i32
    %5 = arith.cmpi ne, %4, %c0_i32_3 : i32
    scf.if %5 {
      %c0_8 = arith.constant 0 : index
      %c0_9 = arith.constant 0 : index
      %12 = vector.load %arg6[%c0_8, %c0_9] : memref<128x128xf32, #tpu.memory_space<vmem>>, vector<128x128xf32>
      tpu.vector_store %arg6[%c0_8, %c0_9], %2 {strides = array<i32>} : memref<128x128xf32, #tpu.memory_space<vmem>>, vector<128x128xf32>,
    } else {
    }
    %c0_i32_4 = arith.constant 0 : i32
    %6 = arith.cmpi sgt, %arg1, %c0_i32_4 : i32
    %7 = arith.extui %6 : i1 to i32
    %c0_i32_5 = arith.constant 0 : i32
    %8 = arith.cmpi ne, %7, %c0_i32_5 : i32
    scf.if %8 {
      %c0_8 = arith.constant 0 : index
      %c0_9 = arith.constant 0 : index
      %12 = vector.load %arg6[%c0_8, %c0_9] : memref<128x128xf32, #tpu.memory_space<vmem>>, vector<128x128xf32>
      %13 = arith.addf %12, %2 : vector<128x128xf32>
      %c0_10 = arith.constant 0 : index
      %c0_11 = arith.constant 0 : index
      %14 = vector.load %arg6[%c0_10, %c0_11] : memref<128x128xf32, #tpu.memory_space<vmem>>, vector<128x128xf32>
      tpu.vector_store %arg6[%c0_10, %c0_11], %13 {strides = array<i32>} : memref<128x128xf32, #tpu.memory_space<vmem>>, vector<128x128xf32>,
    } else {
    }
    %c0_i32_6 = arith.constant 0 : i32
    %9 = arith.cmpi eq, %arg1, %c0_i32_6 : i32
    %10 = arith.extui %9 : i1 to i32
    %c0_i32_7 = arith.constant 0 : i32
    %11 = arith.cmpi ne, %10, %c0_i32_7 : i32
    scf.if %11 {
      %c0_8 = arith.constant 0 : index
      %c0_9 = arith.constant 0 : index
      %12 = vector.load %arg6[%c0_8, %c0_9] : memref<128x128xf32, #tpu.memory_space<vmem>>, vector<128x128xf32>
      %13 = arith.truncf %12 : vector<128x128xf32> to vector<128x128xbf16>
      %c0_10 = arith.constant 0 : index
      %c0_11 = arith.constant 0 : index
      %14 = vector.load %arg4[%c0_10, %c0_11] : memref<128x128xbf16, #tpu.memory_space<vmem>>, vector<128x128xbf16>
      tpu.vector_store %arg4[%c0_10, %c0_11], %13 {strides = array<i32>} : memref<128x128xbf16, #tpu.memory_space<vmem>>, vector<128x128xbf16>,
      %cst_12 = arith.constant dense<0.000000e+00> : vector<128xf32>
      %15 = vector.multi_reduction <add>, %12, %cst_12 [0] : vector<128x128xf32> to vector<128xf32>
      %16 = vector.shape_cast %15 : vector<128xf32> to vector<1x128xf32>
      %17 = arith.mulf %12, %12 : vector<128x128xf32>
      %cst_13 = arith.constant dense<0.000000e+00> : vector<128xf32>
      %18 = vector.multi_reduction <add>, %17, %cst_13 [0] : vector<128x128xf32> to vector<128xf32>
      %19 = vector.shape_cast %18 : vector<128xf32> to vector<1x128xf32>
      %cst_14 = arith.constant 0.000000e+00 : f32
      %20 = vector.broadcast %cst_14 : f32 to vector<6x128xf32>
      %21 = tpu.concatenate %16, %19, %20 in 0 : vector<1x128xf32>, vector<1x128xf32>, vector<6x128xf32> -> vector<8x128xf32>
      %22 = vector.shape_cast %21 : vector<8x128xf32> to vector<1x8x128xf32>
      %c0_15 = arith.constant 0 : index
      %c0_16 = arith.constant 0 : index
      %c0_17 = arith.constant 0 : index
      %23 = vector.load %arg5[%c0_15, %c0_16, %c0_17] : memref<1x8x128xf32, #tpu.memory_space<vmem>>, vector<1x8x128xf32>
      tpu.vector_store %arg5[%c0_15, %c0_16, %c0_17], %22 {strides = array<i32>} : memref<1x8x128xf32, #tpu.memory_space<vmem>>, vector<1x8x128xf32>,
    } else {
    }
    return
  }
  func.func @transform_0(%arg0: i32, %arg1: i32) -> (i32, i32) {
    %c0_i32 = arith.constant 0 : i32
    return %arg0, %arg1 : i32, i32
  }
  func.func @transform_1(%arg0: i32, %arg1: i32) -> (i32, i32) {
    %c0_i32 = arith.constant 0 : i32
    %c0_i32_0 = arith.constant 0 : i32
    return %arg1, %c0_i32 : i32, i32
  }
  func.func @transform_2(%arg0: i32, %arg1: i32) -> (i32, i32) {
    %c0_i32 = arith.constant 0 : i32
    %c0_i32_0 = arith.constant 0 : i32
    return %arg0, %c0_i32 : i32, i32
  }
  func.func @transform_3(%arg0: i32, %arg1: i32) -> (i32, i32, i32) {
    %c0_i32 = arith.constant 0 : i32
    %c0_i32_0 = arith.constant 0 : i32
    %c0_i32_1 = arith.constant 0 : i32
    return %arg0, %c0_i32, %c0_i32_0 : i32, i32, i32
  }
}

module attributes {stable_mosaic.version = 11 : i64} {
  func.func @_matmul_bias_tanh_kernel(%arg0: i32, %arg1: i32, %arg2: memref<256x256xbf16, #tpu.memory_space<vmem>>, %arg3: memref<256x128xbf16, #tpu.memory_space<vmem>>, %arg4: memref<1x128xf32, #tpu.memory_space<vmem>>, %arg5: memref<256x128xf32, #tpu.memory_space<vmem>>, %arg6: memref<256x128xf32, #tpu.memory_space<vmem>>) attributes {dimension_semantics = [#tpu.dimension_semantics<parallel>, #tpu.dimension_semantics<arbitrary>], iteration_bounds = array<i64: 2, 1>, scalar_prefetch = 0 : i64, scratch_operands = 1 : i64, tpu.core_type = #tpu.core_type<tc>, window_params = [{transform_indices = @transform_0, window_bounds = array<i64: 256, 256>}, {transform_indices = @transform_1, window_bounds = array<i64: 256, 128>}, {pipeline_mode = #tpu.pipeline_mode<synchronous>, transform_indices = @transform_2, window_bounds = array<i64: 1, 128>}, {transform_indices = @transform_3, window_bounds = array<i64: 256, 128>}]} {
    %c0 = arith.constant 0 : index
    %c0_0 = arith.constant 0 : index
    %0 = vector.load %arg2[%c0, %c0_0] : memref<256x256xbf16, #tpu.memory_space<vmem>>, vector<256x256xbf16>
    %c0_1 = arith.constant 0 : index
    %c0_2 = arith.constant 0 : index
    %1 = vector.load %arg3[%c0_1, %c0_2] : memref<256x128xbf16, #tpu.memory_space<vmem>>, vector<256x128xbf16>
    %cst = arith.constant dense<0.000000e+00> : vector<256x128xf32>
    %2 = tpu.matmul %0, %1, %cst {dimension_numbers = #tpu.dot_dimension_numbers<[1], [0], [0], [1], [0, 0, 1, 1], [], []>} : vector<256x256xbf16>, vector<256x128xbf16>, vector<256x128xf32> -> vector<256x128xf32>
    %c0_i32 = arith.constant 0 : i32
    %3 = arith.cmpi eq, %arg1, %c0_i32 : i32
    %4 = arith.extui %3 : i1 to i32
    %c0_i32_3 = arith.constant 0 : i32
    %5 = arith.cmpi ne, %4, %c0_i32_3 : i32
    scf.if %5 {
      %c0_8 = arith.constant 0 : index
      %c0_9 = arith.constant 0 : index
      %12 = vector.load %arg4[%c0_8, %c0_9] : memref<1x128xf32, #tpu.memory_space<vmem>>, vector<1x128xf32>
      %13 = vector.broadcast %12 : vector<1x128xf32> to vector<256x128xf32>
      %14 = arith.addf %2, %13 : vector<256x128xf32>
      %c0_10 = arith.constant 0 : index
      %c0_11 = arith.constant 0 : index
      %15 = vector.load %arg6[%c0_10, %c0_11] : memref<256x128xf32, #tpu.memory_space<vmem>>, vector<256x128xf32>
      tpu.vector_store %arg6[%c0_10, %c0_11], %14 {strides = array<i32>} : memref<256x128xf32, #tpu.memory_space<vmem>>, vector<256x128xf32>,
    } else {
    }
    %c0_i32_4 = arith.constant 0 : i32
    %6 = arith.cmpi sgt, %arg1, %c0_i32_4 : i32
    %7 = arith.extui %6 : i1 to i32
    %c0_i32_5 = arith.constant 0 : i32
    %8 = arith.cmpi ne, %7, %c0_i32_5 : i32
    scf.if %8 {
      %c0_8 = arith.constant 0 : index
      %c0_9 = arith.constant 0 : index
      %12 = vector.load %arg6[%c0_8, %c0_9] : memref<256x128xf32, #tpu.memory_space<vmem>>, vector<256x128xf32>
      %13 = arith.addf %12, %2 : vector<256x128xf32>
      %c0_10 = arith.constant 0 : index
      %c0_11 = arith.constant 0 : index
      %14 = vector.load %arg6[%c0_10, %c0_11] : memref<256x128xf32, #tpu.memory_space<vmem>>, vector<256x128xf32>
      tpu.vector_store %arg6[%c0_10, %c0_11], %13 {strides = array<i32>} : memref<256x128xf32, #tpu.memory_space<vmem>>, vector<256x128xf32>,
    } else {
    }
    %c0_i32_6 = arith.constant 0 : i32
    %9 = arith.cmpi eq, %arg1, %c0_i32_6 : i32
    %10 = arith.extui %9 : i1 to i32
    %c0_i32_7 = arith.constant 0 : i32
    %11 = arith.cmpi ne, %10, %c0_i32_7 : i32
    scf.if %11 {
      %c0_8 = arith.constant 0 : index
      %c0_9 = arith.constant 0 : index
      %12 = vector.load %arg6[%c0_8, %c0_9] : memref<256x128xf32, #tpu.memory_space<vmem>>, vector<256x128xf32>
      %13 = math.tanh %12 : vector<256x128xf32>
      %c0_10 = arith.constant 0 : index
      %c0_11 = arith.constant 0 : index
      %14 = vector.load %arg5[%c0_10, %c0_11] : memref<256x128xf32, #tpu.memory_space<vmem>>, vector<256x128xf32>
      tpu.vector_store %arg5[%c0_10, %c0_11], %13 {strides = array<i32>} : memref<256x128xf32, #tpu.memory_space<vmem>>, vector<256x128xf32>,
    } else {
    }
    return
  }
  func.func @transform_0(%arg0: i32, %arg1: i32) -> (i32, i32) {
    %c0_i32 = arith.constant 0 : i32
    return %arg0, %arg1 : i32, i32
  }
  func.func @transform_1(%arg0: i32, %arg1: i32) -> (i32, i32) {
    %c0_i32 = arith.constant 0 : i32
    %c0_i32_0 = arith.constant 0 : i32
    return %arg1, %c0_i32 : i32, i32
  }
  func.func @transform_2(%arg0: i32, %arg1: i32) -> (i32, i32) {
    %c0_i32 = arith.constant 0 : i32
    %c0_i32_0 = arith.constant 0 : i32
    %c0_i32_1 = arith.constant 0 : i32
    return %c0_i32, %c0_i32_0 : i32, i32
  }
  func.func @transform_3(%arg0: i32, %arg1: i32) -> (i32, i32) {
    %c0_i32 = arith.constant 0 : i32
    %c0_i32_0 = arith.constant 0 : i32
    return %arg0, %c0_i32 : i32, i32
  }
}

</mosaic_0001>

<bundles_post_ra>
// kernel: unet_forward.12
= control target key start
LH: loop header
LB: loop body
LE: loop exit
PB: predicated region body
PF: predicated region fallthrough
CT: control target
= control target key end

     0   :  { %s851_s12 = smov 0   ;;  %s985_s0 = inlined_call_operand.vmem [shape: bf16[512,128], index: 0, kind: input, shape index: {}]   ;;  %s986_s1 = inlined_call_operand.vmem [shape: f32[1,128], index: 1, kind: input, shape index: {}]   ;;  %s987_s2 = inlined_call_operand.vmem [shape: f32[1,128], index: 2, kind: input, shape index: {}]   ;;  %s988_s3 = inlined_call_operand.vmem [shape: bf16[512,128], index: 3, kind: output, shape index: {}]  }
   0x1 LB: > { %s564_s13 = sadd.s32 4294967295, %s829_s12   ;;  %p568_p0 = scmp.ge.s32.totalorder %s829_s12, 1  ;;  %s829_s12 = sphi %s851_s12, %s13_s12  }
   0x2   : > { %p138_p1 = scmp.lt.s32.totalorder %s829_s12, 3 }
   0x4   : > { %p139_p2 = pnand %p568_p0, %p138_p1 }
   0x5   : > { %s569_s14 = sshll.u32 (!%p139_p2), %s564_s13, 5  ;;  %v872_v0 = vld [vmem:[%s986_s1] ss:$0 sm:$0xff] (!%p139_p2) }
   0x6   : > { %142 = sbr.rel (%p139_p2) target bundleno = 59 (0x3b), region = 32  ;;  %p163_p3 = scmp.lt.s32.totalorder (!%p139_p2), %s569_s14, 63  ;;  %v881_v9 = vld [vmem:[%s987_s2] ss:$0 sm:$0xff] (!%p139_p2) }
   0xd   : > { %s990_s14 = smov (!%p163_p3, %s569_s14), 63 }
   0xe   : > { %s570_s15 = sshll.u32 %s990_s14, 2 }
   0xf   : > { %s867_s18 = scalar_lea.vmem %s985_s0, %s570_s15  ;;  %s906_s25 = scalar_lea.vmem %s988_s3, %s570_s15 }
  0x10   : > { %v642_v1 = vld [vmem:[%s867_s18] sm:$0xff]   ;;  %v785_v2 = vld [vmem:[%s867_s18 + $0x8] sm:$0xff]   ;;  %v786_v3 = vld [vmem:[%s867_s18 + $0x10] sm:$0xff]  }
  0x11   : > { %v643_v4 = vunpack.c.l.bf16 %v642_v1  ;;  %v644_v5 = vunpack.c.h.bf16 %v642_v1  ;;  %v647_v6 = vunpack.c.l.bf16 %v785_v2  ;;  %v648_v7 = vunpack.c.h.bf16 %v785_v2  ;;  %v787_v8 = vld [vmem:[%s867_s18 + $0x18] sm:$0xff]   ;;  %v788_v30 = vld [vmem:[%s867_s18 + $0x20] sm:$0xff]   ;;  %v789_v35 = vld [vmem:[%s867_s18 + $0x28] sm:$0xff]  }
  0x12   : > { %v651_v10 = vunpack.c.l.bf16 %v786_v3  ;;  %v652_v11 = vunpack.c.h.bf16 %v786_v3  ;;  %v655_v12 = vunpack.c.l.bf16 %v787_v8  ;;  %v656_v13 = vunpack.c.h.bf16 %v787_v8  ;;  %v790_v40 = vld [vmem:[%s867_s18 + $0x30] sm:$0xff]   ;;  %v791_v45 = vld [vmem:[%s867_s18 + $0x38] sm:$0xff]   ;;  %v792_v3 = vld [vmem:[%s867_s18 + $0x40] sm:$0xff]  }
  0x13   : > { %v245_v14 = vmul.f32 %v643_v4, %v872_v0  ;;  %v246_v15 = vmul.f32 %v644_v5, %v872_v0  ;;  %v247_v16 = vmul.f32 %v647_v6, %v872_v0  ;;  %v248_v17 = vmul.f32 %v648_v7, %v872_v0 }
  0x14   : > { %v249_v18 = vmul.f32 %v651_v10, %v872_v0  ;;  %v250_v19 = vmul.f32 %v652_v11, %v872_v0  ;;  %v251_v20 = vmul.f32 %v655_v12, %v872_v0  ;;  %v252_v21 = vmul.f32 %v656_v13, %v872_v0  ;;  %v793_v13 = vld [vmem:[%s867_s18 + $0x48] sm:$0xff]  }
  0x15   : > { %v284_v22 = vadd.f32 %v881_v9, %v245_v14  ;;  %v285_v23 = vadd.f32 %v881_v9, %v246_v15  ;;  %v286_v24 = vadd.f32 %v881_v9, %v247_v16  ;;  %v287_v25 = vadd.f32 %v881_v9, %v248_v17 }
  0x16   : > { %v288_v26 = vadd.f32 %v881_v9, %v249_v18  ;;  %v289_v27 = vadd.f32 %v881_v9, %v250_v19  ;;  %v290_v28 = vadd.f32 %v881_v9, %v251_v20  ;;  %v291_v29 = vadd.f32 %v881_v9, %v252_v21  ;;  %v794_v18 = vld [vmem:[%s867_s18 + $0x50] sm:$0xff]  }
  0x17   : > { %v316_v31 = vmax.f32 %v284_v22, 0.0  ;;  %v317_v32 = vmax.f32 %v285_v23, 0.0  ;;  %v318_v33 = vmax.f32 %v286_v24, 0.0  ;;  %v319_v34 = vmax.f32 %v287_v25, 0.0  ;;  %v795_v23 = vld [vmem:[%s867_s18 + $0x58] sm:$0xff]  }
  0x18   : > { %v320_v36 = vmax.f32 %v288_v26, 0.0  ;;  %v321_v37 = vmax.f32 %v289_v27, 0.0  ;;  %v322_v38 = vmax.f32 %v290_v28, 0.0  ;;  %v323_v39 = vmax.f32 %v291_v29, 0.0 }
  0x19   : > { %v708_v41 = vpack.c.bf16 %v317_v32, %v316_v31  ;;  %v713_v42 = vpack.c.bf16 %v319_v34, %v318_v33  ;;  %v659_v43 = vunpack.c.l.bf16 %v788_v30  ;;  %v660_v44 = vunpack.c.h.bf16 %v788_v30 }
  0x1a   : > { %v718_v46 = vpack.c.bf16 %v321_v37, %v320_v36  ;;  %v723_v47 = vpack.c.bf16 %v323_v39, %v322_v38  ;;  %v663_v48 = vunpack.c.l.bf16 %v789_v35  ;;  %v664_v49 = vunpack.c.h.bf16 %v789_v35 }
  0x1b   : > { %709 = vst [vmem:[%s906_s25] sm:$0xff] %v708_v41   ;;  %800 = vst [vmem:[%s906_s25 + $0x8] sm:$0xff] %v713_v42   ;;  %v253_v50 = vmul.f32 %v659_v43, %v872_v0  ;;  %v254_v51 = vmul.f32 %v660_v44, %v872_v0  ;;  %v667_v52 = vunpack.c.l.bf16 %v790_v40  ;;  %v668_v53 = vunpack.c.h.bf16 %v790_v40  ;;  %v796_v40 = vld [vmem:[%s867_s18 + $0x60] sm:$0xff]  }
  0x1c   : > { %801 = vst [vmem:[%s906_s25 + $0x10] sm:$0xff] %v718_v46   ;;  %802 = vst [vmem:[%s906_s25 + $0x18] sm:$0xff] %v723_v47   ;;  %v255_v54 = vmul.f32 %v663_v48, %v872_v0  ;;  %v256_v55 = vmul.f32 %v664_v49, %v872_v0  ;;  %v671_v56 = vunpack.c.l.bf16 %v791_v45  ;;  %v672_v57 = vunpack.c.h.bf16 %v791_v45 }
  0x1d   : > { %v292_v58 = vadd.f32 %v881_v9, %v253_v50  ;;  %v293_v59 = vadd.f32 %v881_v9, %v254_v51  ;;  %v257_v60 = vmul.f32 %v667_v52, %v872_v0  ;;  %v258_v61 = vmul.f32 %v668_v53, %v872_v0  ;;  %v797_v53 = vld [vmem:[%s867_s18 + $0x68] sm:$0xff]  }
  0x1e   : > { %v294_v62 = vadd.f32 %v881_v9, %v255_v54  ;;  %v295_v63 = vadd.f32 %v881_v9, %v256_v55  ;;  %v259_v1 = vmul.f32 %v671_v56, %v872_v0  ;;  %v260_v2 = vmul.f32 %v672_v57, %v872_v0 }
  0x1f   : > { %v324_v4 = vmax.f32 %v292_v58, 0.0  ;;  %v325_v5 = vmax.f32 %v293_v59, 0.0  ;;  %v296_v6 = vadd.f32 %v881_v9, %v257_v60  ;;  %v297_v7 = vadd.f32 %v881_v9, %v258_v61  ;;  %v798_v58 = vld [vmem:[%s867_s18 + $0x70] sm:$0xff]  }
  0x20   : > { %v326_v8 = vmax.f32 %v294_v62, 0.0  ;;  %v327_v10 = vmax.f32 %v295_v63, 0.0  ;;  %v298_v11 = vadd.f32 %v881_v9, %v259_v1  ;;  %v299_v12 = vadd.f32 %v881_v9, %v260_v2  ;;  %v799_v63 = vld [vmem:[%s867_s18 + $0x78] sm:$0xff]  }
  0x21   : > { %v728_v14 = vpack.c.bf16 %v325_v5, %v324_v4  ;;  %v328_v15 = vmax.f32 %v296_v6, 0.0  ;;  %v329_v16 = vmax.f32 %v297_v7, 0.0  ;;  %v675_v17 = vunpack.c.l.bf16 %v792_v3 }
  0x22   : > { %v733_v19 = vpack.c.bf16 %v327_v10, %v326_v8  ;;  %v330_v20 = vmax.f32 %v298_v11, 0.0  ;;  %v331_v21 = vmax.f32 %v299_v12, 0.0  ;;  %v676_v22 = vunpack.c.h.bf16 %v792_v3 }
  0x23   : > { %803 = vst [vmem:[%s906_s25 + $0x20] sm:$0xff] %v728_v14   ;;  %v738_v24 = vpack.c.bf16 %v329_v16, %v328_v15  ;;  %v261_v25 = vmul.f32 %v675_v17, %v872_v0  ;;  %v679_v26 = vunpack.c.l.bf16 %v793_v13  ;;  %v680_v27 = vunpack.c.h.bf16 %v793_v13 }
  0x24   : > { %804 = vst [vmem:[%s906_s25 + $0x28] sm:$0xff] %v733_v19   ;;  %v743_v28 = vpack.c.bf16 %v331_v21, %v330_v20  ;;  %v262_v29 = vmul.f32 %v676_v22, %v872_v0  ;;  %v683_v30 = vunpack.c.l.bf16 %v794_v18  ;;  %v684_v31 = vunpack.c.h.bf16 %v794_v18 }
  0x25   : > { %805 = vst [vmem:[%s906_s25 + $0x30] sm:$0xff] %v738_v24   ;;  %v300_v32 = vadd.f32 %v881_v9, %v261_v25  ;;  %v263_v33 = vmul.f32 %v679_v26, %v872_v0  ;;  %v264_v34 = vmul.f32 %v680_v27, %v872_v0  ;;  %v687_v35 = vunpack.c.l.bf16 %v795_v23 }
  0x26   : > { %806 = vst [vmem:[%s906_s25 + $0x38] sm:$0xff] %v743_v28   ;;  %v301_v36 = vadd.f32 %v881_v9, %v262_v29  ;;  %v265_v37 = vmul.f32 %v683_v30, %v872_v0  ;;  %v266_v38 = vmul.f32 %v684_v31, %v872_v0  ;;  %v688_v39 = vunpack.c.h.bf16 %v795_v23 }
  0x27   : > { %v332_v41 = vmax.f32 %v300_v32, 0.0  ;;  %v302_v42 = vadd.f32 %v881_v9, %v263_v33  ;;  %v303_v43 = vadd.f32 %v881_v9, %v264_v34  ;;  %v267_v44 = vmul.f32 %v687_v35, %v872_v0 }
  0x28   : > { %v333_v45 = vmax.f32 %v301_v36, 0.0  ;;  %v304_v46 = vadd.f32 %v881_v9, %v265_v37  ;;  %v305_v47 = vadd.f32 %v881_v9, %v266_v38  ;;  %v268_v48 = vmul.f32 %v688_v39, %v872_v0 }
  0x29   : > { %v334_v49 = vmax.f32 %v302_v42, 0.0  ;;  %v335_v50 = vmax.f32 %v303_v43, 0.0  ;;  %v306_v51 = vadd.f32 %v881_v9, %v267_v44  ;;  %v691_v52 = vunpack.c.l.bf16 %v796_v40 }
  0x2a   : > { %v748_v54 = vpack.c.bf16 %v333_v45, %v332_v41  ;;  %v336_v55 = vmax.f32 %v304_v46, 0.0  ;;  %v337_v56 = vmax.f32 %v305_v47, 0.0  ;;  %v307_v57 = vadd.f32 %v881_v9, %v268_v48 }
  0x2b   : > { %v753_v59 = vpack.c.bf16 %v335_v50, %v334_v49  ;;  %v338_v60 = vmax.f32 %v306_v51, 0.0  ;;  %v692_v61 = vunpack.c.h.bf16 %v796_v40  ;;  %v269_v62 = vmul.f32 %v691_v52, %v872_v0 }
  0x2c   : > { %807 = vst [vmem:[%s906_s25 + $0x40] sm:$0xff] %v748_v54   ;;  %v758_v1 = vpack.c.bf16 %v337_v56, %v336_v55  ;;  %v339_v2 = vmax.f32 %v307_v57, 0.0  ;;  %v695_v3 = vunpack.c.l.bf16 %v797_v53  ;;  %v696_v4 = vunpack.c.h.bf16 %v797_v53 }
  0x2d   : > { %808 = vst [vmem:[%s906_s25 + $0x48] sm:$0xff] %v753_v59   ;;  %v270_v5 = vmul.f32 %v692_v61, %v872_v0  ;;  %v308_v6 = vadd.f32 %v881_v9, %v269_v62  ;;  %v699_v7 = vunpack.c.l.bf16 %v798_v58  ;;  %v700_v8 = vunpack.c.h.bf16 %v798_v58 }
  0x2e   : > { %809 = vst [vmem:[%s906_s25 + $0x50] sm:$0xff] %v758_v1   ;;  %v763_v10 = vpack.c.bf16 %v339_v2, %v338_v60  ;;  %v271_v11 = vmul.f32 %v695_v3, %v872_v0  ;;  %v272_v12 = vmul.f32 %v696_v4, %v872_v0  ;;  %v703_v13 = vunpack.c.l.bf16 %v799_v63 }
  0x2f   : > { %v309_v14 = vadd.f32 %v881_v9, %v270_v5  ;;  %v340_v15 = vmax.f32 %v308_v6, 0.0  ;;  %v273_v16 = vmul.f32 %v699_v7, %v872_v0  ;;  %v274_v17 = vmul.f32 %v700_v8, %v872_v0 }
  0x30   : > { %810 = vst [vmem:[%s906_s25 + $0x58] sm:$0xff] %v763_v10   ;;  %v310_v18 = vadd.f32 %v881_v9, %v271_v11  ;;  %v311_v19 = vadd.f32 %v881_v9, %v272_v12  ;;  %v704_v20 = vunpack.c.h.bf16 %v799_v63  ;;  %v275_v21 = vmul.f32 %v703_v13, %v872_v0 }
  0x31   : > { %v341_v22 = vmax.f32 %v309_v14, 0.0  ;;  %v312_v23 = vadd.f32 %v881_v9, %v273_v16  ;;  %v313_v24 = vadd.f32 %v881_v9, %v274_v17 }
  0x32   : > { %v342_v25 = vmax.f32 %v310_v18, 0.0  ;;  %v343_v26 = vmax.f32 %v311_v19, 0.0  ;;  %v276_v27 = vmul.f32 %v704_v20, %v872_v0  ;;  %v314_v28 = vadd.f32 %v881_v9, %v275_v21 }
  0x33   : > { %v768_v29 = vpack.c.bf16 %v341_v22, %v340_v15  ;;  %v344_v30 = vmax.f32 %v312_v23, 0.0  ;;  %v345_v31 = vmax.f32 %v313_v24, 0.0 }
  0x34   : > { %v773_v32 = vpack.c.bf16 %v343_v26, %v342_v25  ;;  %v315_v33 = vadd.f32 %v881_v9, %v276_v27  ;;  %v346_v34 = vmax.f32 %v314_v28, 0.0 }
  0x35   : > { %811 = vst [vmem:[%s906_s25 + $0x60] sm:$0xff] %v768_v29   ;;  %v778_v35 = vpack.c.bf16 %v345_v31, %v344_v30 }
  0x36   : > { %812 = vst [vmem:[%s906_s25 + $0x68] sm:$0xff] %v773_v32   ;;  %v347_v36 = vmax.f32 %v315_v33, 0.0 }
  0x37   : > { %813 = vst [vmem:[%s906_s25 + $0x70] sm:$0xff] %v778_v35  }
  0x38   : > { %v783_v37 = vpack.c.bf16 %v347_v36, %v346_v34 }
  0x3a   : > { %814 = vst [vmem:[%s906_s25 + $0x78] sm:$0xff] %v783_v37  }
  0x3b PF: > { %s13_s12 = sadd.s32 1, %s829_s12  }
  0x3c   : > { %p10_p4 = scmp.ge.s32.totalorder %s13_s12, 4  }
  0x3e   :  { %12 = sbr.rel (!%p10_p4) target bundleno = 1 (0x1), region = 62 }

// kernel: unet_forward.11
= control target key start
LH: loop header
LB: loop body
LE: loop exit
PB: predicated region body
PF: predicated region fallthrough
CT: control target
= control target key end

     0   :  { %9 = vsyncpa [#allocation4], 0  ;;  %s1566_s12 = smov 0   ;;  %s1568_s13 = smov 0   ;;  %s1773_s0 = inlined_call_operand.vmem [shape: bf16[512,128], index: 0, kind: input, shape index: {}]   ;;  %s1774_s1 = inlined_call_operand.hbm [shape: bf16[128,128], index: 1, kind: input, shape index: {}]   ;;  %s1775_s2 = inlined_call_operand.vmem [shape: bf16[512,128], index: 2, kind: output, shape index: {0}]   ;;  %s1776_s3 = inlined_call_operand.vmem [shape: f32[2,8,128], index: 3, kind: output, shape index: {1}]  }
   0x1   :  { %s1570_s14 = smov 0  }
   0x2 LB: > { %s1141_s15 = sadd.s32 4294967295, %s1541_s14   ;;  %s27_s16 = sadd.s32 1, %s1537_s13  ;;  %s1541_s14 = sphi %s1570_s14, %s15_s14   ;;  %s1537_s13 = sphi %s1568_s13, %s1786_s13   ;;  %s1533_s12 = sphi %s1566_s12, %s1785_s12  }
   0x3   : > { %p29_p0 = scmp.ge.s32.totalorder %s27_s16, 2  ;;  %p1143_p1 = scmp.ge.s32.totalorder %s1541_s14, 1 }
   0x4   : > { %p138_p2 = scmp.lt.s32.totalorder %s1541_s14, 3  ;;  %p1591_p4 = scmp.eq.s32.totalorder %s1141_s15, 0 }
   0x5   : > { %s1788_s16 = smov (%p29_p0, %s27_s16), 0  ;;  %s1543_s19 = smov [#allocation3]  }
   0x6   : > { %p1587_p3 = pnand %p1143_p1, %p138_p2  ;;  %s153_s20 = sshll.u32 %s1543_s19, 4  ;;  %s154_s20 = int_to_ptr.vmem [resolvable:$true] %s153_s20 }
   0x7   : > { %s1781_s18 = scalar_select %p1591_p4, 1, 0 }
   0x8   : > { %s1780_s17 = scalar_select %p1587_p3, 1, 0 }
   0x9   : > { %p1430_p5 = pneg %p1587_p3  ;;  %s1487_s24 = scalar_lea.hbm %s1774_s1, 1024 }
   0xa   : > { %p1488_p7 = scmp.ne.s32.totalorder %s1774_s1, %s1487_s24  ;;  %p1494_p11 = scmp.lt.u32.totalorder %s1487_s24, %s1774_s1 }
   0xb   : > { %p1599_p6 = pnand %p1591_p4, %p1430_p5 }
   0xd   : > { %p1489_p8 = pneg %p1599_p6 }
   0xf   : > { %p1490_p9 = pnand %p1489_p8, %p1488_p7 }
  0x11   : > { %p1491_p10 = pneg %p1490_p9 }
  0x13   : > { %p1496_p12 = pnand %p1494_p11, %p1491_p10 }
  0x15   : > { %1499 = shalt.err (!%p1496_p12)
}
  0x16   : > { %s1500_s29 = scalar_lea.vmem %s154_s20, 1024  ;;  %p1508_p2 = scmp.lt.s32.totalorder %s154_s20, %s154_s20 }
  0x17   : > { %p1501_p13 = scmp.ne.s32.totalorder %s154_s20, %s1500_s29  ;;  %p1509_p5 = scmp.lt.s32.totalorder %s1500_s29, %s1500_s29 }
  0x19   : > { %p1503_p0 = pnand %p1501_p13, %p1489_p8  ;;  %p1510_p4 = por %p1509_p5, %p1508_p2 }
  0x1b   : > { %p1504_p1 = pneg %p1503_p0 }
  0x1d   : > { %p1511_p3 = pnand %p1510_p4, %p1504_p1 }
  0x1f   : > { %1514 = shalt.err (!%p1511_p3)
}
  0x20   : > { %s1544_s30 = smov 64   ;;  %s1545_s4 = smov 4  }
  0x21   : > { %1433 = dma.hbm_to_vmem [thread:$0]  (!%p1599_p6), %s1774_s1, 1024, %s154_s20, [#allocation4], %s1544_s30, %s1544_s30, %s1545_s4  }
  0x22   : > { %p1783_p7 = scmp.ne.s32.totalorder %s1780_s17, 0 }
  0x23   : > { %p1784_p9 = scmp.ne.s32.totalorder (!%p1783_p7), %s1781_s18, 0 }
  0x24   : > { %181 = sbr.rel (%p1783_p7) target bundleno = 371 (0x173), region = 28 }
  0x2b   : > { %1528 = dma.done.wait (%p1784_p9), [#allocation4], 1024  }
  0x2c   : > { %1530 = vsyncadd (%p1784_p9), [#allocation4], 4294966272  ;;  %s1148_s7 = sshll.u32 %s1533_s12, 5  ;;  %v1463_v0 = vld [vmem:[#allocation3] sm:$0xff]   ;;  %v1464_v1 = vld [vmem:[#allocation3 + $0x8] sm:$0xff]   ;;  %p228_p4 = scmp.lt.s32.totalorder %s1533_s12, 1 }
  0x2d   : > { %p213_p3 = scmp.lt.s32.totalorder %s1148_s7, 63  ;;  %1362 = vmatprep.subr.bf16.mxu0 %v1463_v0  ;;  %1410 = vmatprep.subr.bf16.mxu1 %v1463_v0  ;;  %v1465_v2 = vld [vmem:[#allocation3 + $0x10] sm:$0xff]   ;;  %v1466_v3 = vld [vmem:[#allocation3 + $0x18] sm:$0xff]   ;;  %v1467_v5 = vld [vmem:[#allocation3 + $0x20] sm:$0xff]   ;;  %vm1023_vm0 = vcmask 1040384   ;;  %vm1025_vm1 = vcmask 1041408  }
  0x2e   : > { %1363 = vmatpush3.bf16.msra.mxu0 %v1463_v0  ;;  %1418 = vmatpush3.bf16.msra.mxu1 %v1463_v0  ;;  %v1468_v6 = vld [vmem:[#allocation3 + $0x28] sm:$0xff]   ;;  %v1469_v8 = vld [vmem:[#allocation3 + $0x30] sm:$0xff]   ;;  %v1470_v9 = vld [vmem:[#allocation3 + $0x38] sm:$0xff]   ;;  %s1792_s12 = smov (!%p228_p4, %s1533_s12), 1 }
  0x2f   : > { %s1790_s7 = smov (!%p213_p3, %s1148_s7), 63  ;;  %1364 = vmatprep.subr.bf16.mxu0 %v1464_v1  ;;  %1411 = vmatprep.subr.bf16.mxu1 %v1464_v1  ;;  %s1152_s19 = sshll.u32 %s1792_s12, 3 }
  0x30   : > { %s1149_s8 = sshll.u32 %s1790_s7, 2  ;;  %s231_s22 = scalar_lea.vmem %s1776_s3, %s1152_s19 }
  0x31   : > { %s1634_s11 = scalar_lea.vmem %s1773_s0, %s1149_s8  ;;  %s1661_s18 = scalar_lea.vmem %s1775_s2, %s1149_s8 }
  0x32   : > { %1365 = vmatpush3.bf16.msra.mxu0 %v1464_v1  ;;  %1419 = vmatpush3.bf16.msra.mxu1 %v1464_v1  ;;  %v1471_v4 = vld [vmem:[%s1634_s11] sm:$0xff]   ;;  %v1472_v10 = vld [vmem:[%s1634_s11 + $0x8] sm:$0xff]   ;;  %v1473_v12 = vld [vmem:[%s1634_s11 + $0x10] sm:$0xff]  }
  0x33   : > { %1366 = vmatprep.subr.bf16.mxu0 %v1465_v2  ;;  %1412 = vmatprep.subr.bf16.mxu1 %v1465_v2  ;;  %v1479_v7 = vld [vmem:[%s1634_s11 + $0x40] sm:$0xff]   ;;  %v1480_v11 = vld [vmem:[%s1634_s11 + $0x48] sm:$0xff]   ;;  %v1481_v13 = vld [vmem:[%s1634_s11 + $0x50] sm:$0xff]  }
  0x34   : > { %1378 = vmatprep.mubr.bf16.mxu0 %v1471_v4  ;;  %1394 = vmatprep.mubr.bf16.mxu1 %v1479_v7  ;;  %v1474_v14 = vld [vmem:[%s1634_s11 + $0x18] sm:$0xff]   ;;  %v1475_v16 = vld [vmem:[%s1634_s11 + $0x20] sm:$0xff]   ;;  %v1476_v18 = vld [vmem:[%s1634_s11 + $0x28] sm:$0xff]  }
  0x35   : > { %v1482_v15 = vld [vmem:[%s1634_s11 + $0x58] sm:$0xff]   ;;  %v1483_v17 = vld [vmem:[%s1634_s11 + $0x60] sm:$0xff]   ;;  %v1484_v19 = vld [vmem:[%s1634_s11 + $0x68] sm:$0xff]  }
  0x36   : > { %1367 = vmatpush3.bf16.msra.mxu0 %v1465_v2  ;;  %1420 = vmatpush3.bf16.msra.mxu1 %v1465_v2  ;;  %v1477_v20 = vld [vmem:[%s1634_s11 + $0x30] sm:$0xff]   ;;  %v1478_v22 = vld [vmem:[%s1634_s11 + $0x38] sm:$0xff]  }
  0x37   : > { %1368 = vmatprep.subr.bf16.mxu0 %v1466_v3  ;;  %1413 = vmatprep.subr.bf16.mxu1 %v1466_v3  ;;  %v1485_v21 = vld [vmem:[%s1634_s11 + $0x70] sm:$0xff]   ;;  %v1486_v23 = vld [vmem:[%s1634_s11 + $0x78] sm:$0xff]  }
  0x3a   : > { %1369 = vmatpush3.bf16.msra.mxu0 %v1466_v3  ;;  %1421 = vmatpush3.bf16.msra.mxu1 %v1466_v3 }
  0x3b   : > { %1370 = vmatprep.subr.bf16.mxu0 %v1467_v5  ;;  %1414 = vmatprep.subr.bf16.mxu1 %v1467_v5 }
  0x3e   : > { %1371 = vmatpush3.bf16.msra.mxu0 %v1467_v5  ;;  %1422 = vmatpush3.bf16.msra.mxu1 %v1467_v5 }
  0x3f   : > { %1372 = vmatprep.subr.bf16.mxu0 %v1468_v6  ;;  %1415 = vmatprep.subr.bf16.mxu1 %v1468_v6 }
  0x42   : > { %1373 = vmatpush3.bf16.msra.mxu0 %v1468_v6  ;;  %1423 = vmatpush3.bf16.msra.mxu1 %v1468_v6 }
  0x43   : > { %1374 = vmatprep.subr.bf16.mxu0 %v1469_v8  ;;  %1416 = vmatprep.subr.bf16.mxu1 %v1469_v8 }
  0x46   : > { %1375 = vmatpush3.bf16.msra.mxu0 %v1469_v8  ;;  %1424 = vmatpush3.bf16.msra.mxu1 %v1469_v8 }
  0x47   : > { %1376 = vmatprep.subr.bf16.mxu0 %v1470_v9  ;;  %1417 = vmatprep.subr.bf16.mxu1 %v1470_v9 }
  0x4a   : > { %1377 = vmatpush3.bf16.msra.mxu0 %v1470_v9  ;;  %1425 = vmatpush3.bf16.msra.mxu1 %v1470_v9 }
  0x4d   : > { %1379 = vmatmul.mubr.bf16.vlgmr.msra.gmra.mrb[0].mxu0 %v1472_v10  ;;  %1395 = vmatmul.mubr.bf16.vlgmr.msra.gmra.mrb[0].mxu1 %v1480_v11 }
  0x4e   : > { %1382 = vmatprep.mubr.bf16.mxu0 %v1473_v12  ;;  %1398 = vmatprep.mubr.bf16.mxu1 %v1481_v13 }
  0x55   : > { %1383 = vmatmul.mubr.bf16.gmra.mrb[4].mxu0 %v1474_v14  ;;  %1399 = vmatmul.mubr.bf16.gmra.mrb[4].mxu1 %v1482_v15 }
  0x56   : > { %1386 = vmatprep.mubr.bf16.mxu0 %v1475_v16  ;;  %1402 = vmatprep.mubr.bf16.mxu1 %v1483_v17 }
  0x5d   : > { %1387 = vmatmul.mubr.bf16.gmra.mrb[8].mxu0 %v1476_v18  ;;  %1403 = vmatmul.mubr.bf16.gmra.mrb[8].mxu1 %v1484_v19 }
  0x5e   : > { %1390 = vmatprep.mubr.bf16.mxu0 %v1477_v20  ;;  %1406 = vmatprep.mubr.bf16.mxu1 %v1485_v21 }
  0x65   : > { %1391 = vmatmul.mubr.bf16.gmra.mrb[12].mxu0 %v1478_v22  ;;  %1407 = vmatmul.mubr.bf16.gmra.mrb[12].mxu1 %v1486_v23 }
 0x120   : > { %v1380_v24 = vpop.f32.mrb[0].mxu0  ;;  %v1652_v25 = vpop.f32.mrb[0].mxu1 }
 0x121   : > { %v459_v26 = vpop.f32.mrb[1].mxu0  ;;  %v1654_v27 = vpop.f32.mrb[1].mxu1  ;;  %v956_v39 = vmul.f32 %v1380_v24, %v1380_v24 }
 0x122   : > { %v1381_v28 = vpop.f32.mrb[2].mxu0  ;;  %v1663_v29 = vpop.f32.mrb[2].mxu1  ;;  %v954_v30 = vmul.f32 %v459_v26, %v459_v26 }
 0x123   : > { %v1251_v31 = vpack.c.bf16 %v1381_v28, %v1380_v24  ;;  %v462_v32 = vpop.f32.mrb[3].mxu0  ;;  %v1291_v33 = vpack.c.bf16 %v1663_v29, %v1652_v25  ;;  %v1667_v34 = vpop.f32.mrb[3].mxu1  ;;  %v957_v42 = vmul.f32 %v1381_v28, %v1381_v28 }
 0x124   : > { %v1246_v35 = vpack.c.bf16 %v462_v32, %v459_v26  ;;  %v917_v36 = vadd.f32 %v462_v32, %v459_v26  ;;  %v955_v37 = vmul.f32 %v462_v32, %v462_v32  ;;  %v1286_v38 = vpack.c.bf16 %v1667_v34, %v1654_v27 }
 0x125   : > { %1323 = vst [vmem:[%s1661_s18 + $0x8] sm:$0xff] %v1251_v31   ;;  %1331 = vst [vmem:[%s1661_s18 + $0x48] sm:$0xff] %v1291_v33  }
 0x126   : > { %1247 = vst [vmem:[%s1661_s18] sm:$0xff] %v1246_v35   ;;  %v918_v40 = vadd.f32 %v1380_v24, %v917_v36  ;;  %v986_v41 = vadd.f32 %v955_v37, %v954_v30  ;;  %1330 = vst [vmem:[%s1661_s18 + $0x40] sm:$0xff] %v1286_v38  }
 0x128   : > { %v987_v43 = vadd.f32 %v986_v41, %v956_v39  ;;  %v1384_v44 = vpop.f32.mrb[4].mxu0  ;;  %v919_v45 = vadd.f32 %v1381_v28, %v918_v40  ;;  %v1675_v46 = vpop.f32.mrb[4].mxu1 }
 0x129   : > { %v475_v47 = vpop.f32.mrb[5].mxu0  ;;  %v1677_v48 = vpop.f32.mrb[5].mxu1  ;;  %v960_v63 = vmul.f32 %v1384_v44, %v1384_v44 }
 0x12a   : > { %v920_v49 = vadd.f32 %v919_v45, %v475_v47  ;;  %v958_v50 = vmul.f32 %v475_v47, %v475_v47  ;;  %v988_v51 = vadd.f32 %v987_v43, %v957_v42  ;;  %v1385_v52 = vpop.f32.mrb[6].mxu0  ;;  %v1679_v53 = vpop.f32.mrb[6].mxu1 }
 0x12b   : > { %v1261_v54 = vpack.c.bf16 %v1385_v52, %v1384_v44  ;;  %v478_v55 = vpop.f32.mrb[7].mxu0  ;;  %v1301_v56 = vpack.c.bf16 %v1679_v53, %v1675_v46  ;;  %v1683_v57 = vpop.f32.mrb[7].mxu1  ;;  %v961_v2 = vmul.f32 %v1385_v52, %v1385_v52 }
 0x12c   : > { %v989_v58 = vadd.f32 %v988_v51, %v958_v50  ;;  %v1256_v59 = vpack.c.bf16 %v478_v55, %v475_v47  ;;  %v921_v60 = vadd.f32 %v920_v49, %v478_v55  ;;  %v959_v61 = vmul.f32 %v478_v55, %v478_v55 }
 0x12d   : > { %1325 = vst [vmem:[%s1661_s18 + $0x18] sm:$0xff] %v1261_v54   ;;  %1333 = vst [vmem:[%s1661_s18 + $0x58] sm:$0xff] %v1301_v56   ;;  %v1296_v62 = vpack.c.bf16 %v1683_v57, %v1677_v48 }
 0x12e   : > { %1324 = vst [vmem:[%s1661_s18 + $0x10] sm:$0xff] %v1256_v59   ;;  %v922_v0 = vadd.f32 %v1384_v44, %v921_v60  ;;  %v990_v1 = vadd.f32 %v989_v58, %v959_v61  ;;  %v970_v61 = vmul.f32 %v1654_v27, %v1654_v27 }
 0x12f   : > { %1332 = vst [vmem:[%s1661_s18 + $0x50] sm:$0xff] %v1296_v62  }
 0x130   : > { %v991_v3 = vadd.f32 %v990_v1, %v960_v63  ;;  %v1388_v4 = vpop.f32.mrb[8].mxu0  ;;  %v923_v5 = vadd.f32 %v1385_v52, %v922_v0  ;;  %v1691_v6 = vpop.f32.mrb[8].mxu1 }
 0x131   : > { %v491_v7 = vpop.f32.mrb[9].mxu0  ;;  %v1693_v8 = vpop.f32.mrb[9].mxu1  ;;  %v964_v23 = vmul.f32 %v1388_v4, %v1388_v4 }
 0x132   : > { %v924_v9 = vadd.f32 %v923_v5, %v491_v7  ;;  %v962_v10 = vmul.f32 %v491_v7, %v491_v7  ;;  %v992_v11 = vadd.f32 %v991_v3, %v961_v2  ;;  %v1389_v12 = vpop.f32.mrb[10].mxu0  ;;  %v1695_v13 = vpop.f32.mrb[10].mxu1  ;;  %v971_v2 = vmul.f32 %v1667_v34, %v1667_v34 }
 0x133   : > { %v1271_v14 = vpack.c.bf16 %v1389_v12, %v1388_v4  ;;  %v494_v15 = vpop.f32.mrb[11].mxu0  ;;  %v1311_v16 = vpack.c.bf16 %v1695_v13, %v1691_v6  ;;  %v1699_v17 = vpop.f32.mrb[11].mxu1  ;;  %v965_v28 = vmul.f32 %v1389_v12, %v1389_v12  ;;  %v972_v3 = vmul.f32 %v1652_v25, %v1652_v25 }
 0x134   : > { %v993_v18 = vadd.f32 %v992_v11, %v962_v10  ;;  %v1266_v19 = vpack.c.bf16 %v494_v15, %v491_v7  ;;  %v925_v20 = vadd.f32 %v924_v9, %v494_v15  ;;  %v963_v21 = vmul.f32 %v494_v15, %v494_v15 }
 0x135   : > { %1327 = vst [vmem:[%s1661_s18 + $0x28] sm:$0xff] %v1271_v14   ;;  %1335 = vst [vmem:[%s1661_s18 + $0x68] sm:$0xff] %v1311_v16   ;;  %v1306_v22 = vpack.c.bf16 %v1699_v17, %v1693_v8  ;;  %v973_v7 = vmul.f32 %v1663_v29, %v1663_v29  ;;  %v975_v15 = vmul.f32 %v1683_v57, %v1683_v57 }
 0x136   : > { %1326 = vst [vmem:[%s1661_s18 + $0x20] sm:$0xff] %v1266_v19   ;;  %v926_v24 = vadd.f32 %v1388_v4, %v925_v20  ;;  %v994_v26 = vadd.f32 %v993_v18, %v963_v21 }
 0x137   : > { %1334 = vst [vmem:[%s1661_s18 + $0x60] sm:$0xff] %v1306_v22  }
 0x138   : > { %v995_v30 = vadd.f32 %v994_v26, %v964_v23  ;;  %v1392_v31 = vpop.f32.mrb[12].mxu0  ;;  %v927_v32 = vadd.f32 %v1389_v12, %v926_v24  ;;  %v1707_v33 = vpop.f32.mrb[12].mxu1  ;;  %v979_v24 = vmul.f32 %v1699_v17, %v1699_v17 }
 0x139   : > { %v507_v35 = vpop.f32.mrb[13].mxu0  ;;  %v571_v36 = vpop.f32.mrb[13].mxu1  ;;  %v968_v54 = vmul.f32 %v1392_v31, %v1392_v31 }
 0x13a   : > { %v928_v37 = vadd.f32 %v927_v32, %v507_v35  ;;  %v966_v38 = vmul.f32 %v507_v35, %v507_v35  ;;  %v996_v39 = vadd.f32 %v995_v30, %v965_v28  ;;  %v1393_v40 = vpop.f32.mrb[14].mxu0  ;;  %v1709_v41 = vpop.f32.mrb[14].mxu1 }
 0x13b   : > { %v1281_v42 = vpack.c.bf16 %v1393_v40, %v1392_v31  ;;  %v510_v43 = vpop.f32.mrb[15].mxu0  ;;  %v1321_v44 = vpack.c.bf16 %v1709_v41, %v1707_v33  ;;  %v574_v45 = vpop.f32.mrb[15].mxu1  ;;  %v969_v58 = vmul.f32 %v1393_v40, %v1393_v40 }
 0x13c   : > { %v997_v47 = vadd.f32 %v996_v39, %v966_v38  ;;  %v1276_v49 = vpack.c.bf16 %v510_v43, %v507_v35  ;;  %v929_v50 = vadd.f32 %v928_v37, %v510_v43  ;;  %v967_v51 = vmul.f32 %v510_v43, %v510_v43 }
 0x13d   : > { %1329 = vst [vmem:[%s1661_s18 + $0x38] sm:$0xff] %v1281_v42   ;;  %1337 = vst [vmem:[%s1661_s18 + $0x78] sm:$0xff] %v1321_v44   ;;  %v1316_v52 = vpack.c.bf16 %v574_v45, %v571_v36  ;;  %v984_v39 = vmul.f32 %v1707_v33, %v1707_v33  ;;  %v985_v42 = vmul.f32 %v1709_v41, %v1709_v41 }
 0x13e   : > { %1328 = vst [vmem:[%s1661_s18 + $0x30] sm:$0xff] %v1276_v49   ;;  %v930_v55 = vadd.f32 %v1392_v31, %v929_v50  ;;  %v998_v56 = vadd.f32 %v997_v47, %v967_v51  ;;  %v982_v31 = vmul.f32 %v571_v36, %v571_v36 }
 0x13f   : > { %1336 = vst [vmem:[%s1661_s18 + $0x70] sm:$0xff] %v1316_v52  }
 0x140   : > { %v999_v59 = vadd.f32 %v998_v56, %v968_v54  ;;  %v931_v60 = vadd.f32 %v1393_v40, %v930_v55 }
 0x142   : > { %v932_v62 = vadd.f32 %v931_v60, %v1654_v27  ;;  %v1000_v63 = vadd.f32 %v999_v59, %v969_v58  ;;  %v974_v27 = vmul.f32 %v1677_v48, %v1677_v48 }
 0x144   : > { %v1001_v0 = vadd.f32 %v1000_v63, %v970_v61  ;;  %v933_v1 = vadd.f32 %v932_v62, %v1667_v34 }
 0x146   : > { %v934_v4 = vadd.f32 %v1652_v25, %v933_v1  ;;  %v1002_v5 = vadd.f32 %v1001_v0, %v971_v2  ;;  %v976_v25 = vmul.f32 %v1675_v46, %v1675_v46 }
 0x148   : > { %v1003_v9 = vadd.f32 %v1002_v5, %v972_v3  ;;  %v935_v10 = vadd.f32 %v1663_v29, %v934_v4  ;;  %v977_v29 = vmul.f32 %v1679_v53, %v1679_v53 }
 0x14a   : > { %v936_v11 = vadd.f32 %v935_v10, %v1677_v48  ;;  %v1004_v12 = vadd.f32 %v1003_v9, %v973_v7  ;;  %v978_v48 = vmul.f32 %v1693_v8, %v1693_v8 }
 0x14c   : > { %v1005_v14 = vadd.f32 %v1004_v12, %v974_v27  ;;  %v937_v34 = vadd.f32 %v936_v11, %v1683_v57 }
 0x14e   : > { %v938_v16 = vadd.f32 %v1675_v46, %v937_v34  ;;  %v1006_v18 = vadd.f32 %v1005_v14, %v975_v15  ;;  %v980_v46 = vmul.f32 %v1691_v6, %v1691_v6 }
 0x150   : > { %v1007_v19 = vadd.f32 %v1006_v18, %v976_v25  ;;  %v939_v20 = vadd.f32 %v1679_v53, %v938_v16  ;;  %v981_v53 = vmul.f32 %v1695_v13, %v1695_v13 }
 0x152   : > { %v940_v21 = vadd.f32 %v939_v20, %v1693_v8  ;;  %v1008_v22 = vadd.f32 %v1007_v19, %v977_v29 }
 0x154   : > { %v1009_v23 = vadd.f32 %v1008_v22, %v978_v48  ;;  %v941_v57 = vadd.f32 %v940_v21, %v1699_v17  ;;  %v983_v17 = vmul.f32 %v574_v45, %v574_v45 }
 0x156   : > { %v942_v26 = vadd.f32 %v1691_v6, %v941_v57  ;;  %v1010_v28 = vadd.f32 %v1009_v23, %v979_v24 }
 0x158   : > { %v1011_v30 = vadd.f32 %v1010_v28, %v980_v46  ;;  %v943_v8 = vadd.f32 %v1695_v13, %v942_v26 }
 0x15a   : > { %v944_v32 = vadd.f32 %v943_v8, %v571_v36  ;;  %v1012_v35 = vadd.f32 %v1011_v30, %v981_v53 }
 0x15c   : > { %v1013_v37 = vadd.f32 %v1012_v35, %v982_v31  ;;  %v945_v38 = vadd.f32 %v944_v32, %v574_v45 }
 0x15e   : > { %v946_v6 = vadd.f32 %v1707_v33, %v945_v38  ;;  %v1014_v40 = vadd.f32 %v1013_v37, %v983_v17 }
 0x160   : > { %v947_v43 = vadd.f32 %v1709_v41, %v946_v6  ;;  %v1015_v44 = vadd.f32 %v1014_v40, %v984_v39 }
 0x162   : > { %v948_v13 = vrot.slane %v947_v43, 4  ;;  %v1016_v47 = vadd.f32 %v1015_v44, %v985_v42 }
 0x164   : > { %v949_v36 = vadd.f32 %v948_v13, %v947_v43  ;;  %v1017_v49 = vrot.slane %v1016_v47, 4 }
 0x166   : > { %v950_v50 = vrot.slane %v949_v36, 2  ;;  %v1018_v51 = vadd.f32 %v1017_v49, %v1016_v47 }
 0x168   : > { %v951_v45 = vadd.f32 %v950_v50, %v949_v36  ;;  %v1019_v52 = vrot.slane %v1018_v51, 2 }
 0x16a   : > { %v952_v54 = vrot.slane %v951_v45, 1  ;;  %v1020_v55 = vadd.f32 %v1019_v52, %v1018_v51 }
 0x16c   : > { %v1021_v33 = vrot.slane %v1020_v55, 1  ;;  %v953_v56 = vadd.f32 %v952_v54, %v951_v45 }
 0x16e   : > { %v1022_v58 = vadd.f32 %v1021_v33, %v1020_v55 }
 0x170   : > { %v1024_v41 = vsel %vm1023_vm0, %v953_v56, %v1022_v58 }
 0x171   : > { %v1026_v59 = vsel %vm1025_vm1, %v1024_v41, 0.0 }
 0x172   : > { %1027 = vst [vmem:[%s231_s22] sm:$0xff] %v1026_v59 }
 0x173 PF: > { %s15_s14 = sadd.s32 1, %s1541_s14   ;;  %s1785_s12 = smov %s1537_s13 }
 0x174   : > { %p12_p6 = scmp.ge.s32.totalorder %s15_s14, 4   ;;  %s1786_s13 = smov %s1788_s16 }
 0x176   :  { %14 = sbr.rel (!%p12_p6) target bundleno = 2 (0x2), region = 88 }
 0x17d   :  { %1064 = vsyncpa [#allocation4], 1 }
 0x17e   :  { %1066 = vsyncpa [#allocation4 + $0x1], 1 }

// kernel: unet_forward.14
= control target key start
LH: loop header
LB: loop body
LE: loop exit
PB: predicated region body
PF: predicated region fallthrough
CT: control target
= control target key end

     0   :  { %s422_s0 = inlined_call_operand.vmem [shape: bf16[128,128], index: 0, kind: input, shape index: {}]   ;;  %s423_s1 = inlined_call_operand.vmem [shape: f32[1,128], index: 1, kind: input, shape index: {}]   ;;  %s424_s2 = inlined_call_operand.vmem [shape: f32[1,128], index: 2, kind: input, shape index: {}]   ;;  %s425_s3 = inlined_call_operand.vmem [shape: bf16[128,128], index: 3, kind: output, shape index: {}]  }
   0x1   :  { %v227_v0 = vld [vmem:[%s422_s0] sm:$0xff]   ;;  %v298_v4 = vld [vmem:[%s422_s0 + $0x8] sm:$0xff]   ;;  %v299_v5 = vld [vmem:[%s422_s0 + $0x10] sm:$0xff]  }
   0x2   :  { %v338_v1 = vld [vmem:[%s423_s1] ss:$0 sm:$0xff]  ;;  %v228_v2 = vunpack.c.l.bf16 %v227_v0  ;;  %v229_v3 = vunpack.c.h.bf16 %v227_v0  ;;  %v300_v6 = vld [vmem:[%s422_s0 + $0x18] sm:$0xff]   ;;  %v232_v8 = vunpack.c.l.bf16 %v298_v4  ;;  %v233_v9 = vunpack.c.h.bf16 %v298_v4  ;;  %v302_v33 = vld [vmem:[%s422_s0 + $0x28] sm:$0xff]  }
   0x3   :  { %v352_v7 = vld [vmem:[%s424_s2] ss:$0 sm:$0xff]  ;;  %v236_v10 = vunpack.c.l.bf16 %v299_v5  ;;  %v237_v11 = vunpack.c.h.bf16 %v299_v5  ;;  %v240_v14 = vunpack.c.l.bf16 %v300_v6  ;;  %v241_v15 = vunpack.c.h.bf16 %v300_v6  ;;  %v303_v38 = vld [vmem:[%s422_s0 + $0x30] sm:$0xff]   ;;  %v304_v43 = vld [vmem:[%s422_s0 + $0x38] sm:$0xff]  }
   0x4   :  { %v53_v12 = vmul.f32 %v228_v2, %v338_v1  ;;  %v54_v13 = vmul.f32 %v229_v3, %v338_v1  ;;  %v55_v16 = vmul.f32 %v232_v8, %v338_v1  ;;  %v56_v17 = vmul.f32 %v233_v9, %v338_v1  ;;  %v301_v28 = vld [vmem:[%s422_s0 + $0x20] sm:$0xff]  }
   0x5   :  { %v57_v18 = vmul.f32 %v236_v10, %v338_v1  ;;  %v58_v19 = vmul.f32 %v237_v11, %v338_v1  ;;  %v59_v22 = vmul.f32 %v240_v14, %v338_v1  ;;  %v60_v23 = vmul.f32 %v241_v15, %v338_v1 }
   0x6   :  { %v76_v20 = vadd.f32 %v352_v7, %v53_v12  ;;  %v77_v21 = vadd.f32 %v352_v7, %v54_v13  ;;  %v78_v24 = vadd.f32 %v352_v7, %v55_v16  ;;  %v79_v25 = vadd.f32 %v352_v7, %v56_v17 }
   0x7   :  { %v80_v26 = vadd.f32 %v352_v7, %v57_v18  ;;  %v81_v27 = vadd.f32 %v352_v7, %v58_v19  ;;  %v82_v31 = vadd.f32 %v352_v7, %v59_v22  ;;  %v83_v32 = vadd.f32 %v352_v7, %v60_v23 }
   0x8   :  { %v92_v29 = vmax.f32 %v76_v20, 0.0  ;;  %v93_v30 = vmax.f32 %v77_v21, 0.0  ;;  %v94_v34 = vmax.f32 %v78_v24, 0.0  ;;  %v95_v35 = vmax.f32 %v79_v25, 0.0 }
   0x9   :  { %v96_v36 = vmax.f32 %v80_v26, 0.0  ;;  %v97_v37 = vmax.f32 %v81_v27, 0.0  ;;  %v98_v40 = vmax.f32 %v82_v31, 0.0  ;;  %v99_v41 = vmax.f32 %v83_v32, 0.0 }
   0xa   :  { %v261_v39 = vpack.c.bf16 %v93_v30, %v92_v29  ;;  %v244_v42 = vunpack.c.l.bf16 %v301_v28  ;;  %v266_v44 = vpack.c.bf16 %v95_v35, %v94_v34  ;;  %v245_v46 = vunpack.c.h.bf16 %v301_v28 }
   0xb   :  { %v271_v45 = vpack.c.bf16 %v97_v37, %v96_v36  ;;  %v248_v47 = vunpack.c.l.bf16 %v302_v33  ;;  %v276_v48 = vpack.c.bf16 %v99_v41, %v98_v40  ;;  %v249_v50 = vunpack.c.h.bf16 %v302_v33 }
   0xc   :  { %262 = vst [vmem:[%s425_s3] sm:$0xff] %v261_v39   ;;  %v61_v49 = vmul.f32 %v244_v42, %v338_v1  ;;  %v252_v51 = vunpack.c.l.bf16 %v303_v38  ;;  %305 = vst [vmem:[%s425_s3 + $0x8] sm:$0xff] %v266_v44   ;;  %v62_v52 = vmul.f32 %v245_v46, %v338_v1  ;;  %v253_v54 = vunpack.c.h.bf16 %v303_v38 }
   0xd   :  { %306 = vst [vmem:[%s425_s3 + $0x10] sm:$0xff] %v271_v45   ;;  %v63_v53 = vmul.f32 %v248_v47, %v338_v1  ;;  %v256_v55 = vunpack.c.l.bf16 %v304_v43  ;;  %307 = vst [vmem:[%s425_s3 + $0x18] sm:$0xff] %v276_v48   ;;  %v64_v57 = vmul.f32 %v249_v50, %v338_v1  ;;  %v257_v59 = vunpack.c.h.bf16 %v304_v43 }
   0xe   :  { %v84_v56 = vadd.f32 %v352_v7, %v61_v49  ;;  %v65_v58 = vmul.f32 %v252_v51, %v338_v1  ;;  %v85_v60 = vadd.f32 %v352_v7, %v62_v52  ;;  %v66_v62 = vmul.f32 %v253_v54, %v338_v1 }
   0xf   :  { %v86_v61 = vadd.f32 %v352_v7, %v63_v53  ;;  %v67_v63 = vmul.f32 %v256_v55, %v338_v1  ;;  %v87_v2 = vadd.f32 %v352_v7, %v64_v57  ;;  %v68_v4 = vmul.f32 %v257_v59, %v338_v1 }
  0x10   :  { %v100_v0 = vmax.f32 %v84_v56, 0.0  ;;  %v88_v3 = vadd.f32 %v352_v7, %v65_v58  ;;  %v101_v5 = vmax.f32 %v85_v60, 0.0  ;;  %v89_v8 = vadd.f32 %v352_v7, %v66_v62 }
  0x11   :  { %v102_v6 = vmax.f32 %v86_v61, 0.0  ;;  %v90_v9 = vadd.f32 %v352_v7, %v67_v63  ;;  %v103_v10 = vmax.f32 %v87_v2, 0.0  ;;  %v91_v12 = vadd.f32 %v352_v7, %v68_v4 }
  0x12   :  { %v104_v11 = vmax.f32 %v88_v3, 0.0  ;;  %v281_v13 = vpack.c.bf16 %v101_v5, %v100_v0  ;;  %v105_v14 = vmax.f32 %v89_v8, 0.0 }
  0x13   :  { %v106_v15 = vmax.f32 %v90_v9, 0.0  ;;  %v286_v16 = vpack.c.bf16 %v103_v10, %v102_v6  ;;  %v107_v17 = vmax.f32 %v91_v12, 0.0 }
  0x14   :  { %308 = vst [vmem:[%s425_s3 + $0x20] sm:$0xff] %v281_v13   ;;  %v291_v1 = vpack.c.bf16 %v105_v14, %v104_v11 }
  0x15   :  { %309 = vst [vmem:[%s425_s3 + $0x28] sm:$0xff] %v286_v16   ;;  %v296_v18 = vpack.c.bf16 %v107_v17, %v106_v15 }
  0x16   :  { %310 = vst [vmem:[%s425_s3 + $0x30] sm:$0xff] %v291_v1  }
  0x17   :  { %311 = vst [vmem:[%s425_s3 + $0x38] sm:$0xff] %v296_v18  }

// kernel: unet_forward.13
= control target key start
LH: loop header
LB: loop body
LE: loop exit
PB: predicated region body
PF: predicated region fallthrough
CT: control target
= control target key end

     0   :  { %vm468_vm0 = vcmask 1040384   ;;  %vm470_vm1 = vcmask 1041408   ;;  %s751_s1 = inlined_call_operand.vmem [shape: bf16[128,128], index: 1, kind: input, shape index: {}]   ;;  %s752_s0 = inlined_call_operand.vmem [shape: bf16[128,128], index: 0, kind: input, shape index: {}]   ;;  %s753_s2 = inlined_call_operand.vmem [shape: bf16[128,128], index: 2, kind: output, shape index: {0}]   ;;  %s754_s3 = inlined_call_operand.vmem [shape: f32[1,8,128], index: 3, kind: output, shape index: {1}]  }
   0x1   :  { %v640_v0 = vld [vmem:[%s751_s1] sm:$0xff]   ;;  %v641_v1 = vld [vmem:[%s751_s1 + $0x8] sm:$0xff]   ;;  %v642_v2 = vld [vmem:[%s751_s1 + $0x10] sm:$0xff]  }
   0x2   :  { %592 = vmatprep.subr.bf16.mxu0 %v640_v0  ;;  %624 = vmatprep.subr.bf16.mxu1 %v640_v0  ;;  %v643_v3 = vld [vmem:[%s751_s1 + $0x18] sm:$0xff]   ;;  %v648_v4 = vld [vmem:[%s752_s0] sm:$0xff]   ;;  %v645_v7 = vld [vmem:[%s751_s1 + $0x28] sm:$0xff]  }
   0x3   :  { %593 = vmatpush3.bf16.msra.mxu0 %v640_v0  ;;  %632 = vmatpush3.bf16.msra.mxu1 %v640_v0  ;;  %v644_v5 = vld [vmem:[%s751_s1 + $0x20] sm:$0xff]   ;;  %v646_v8 = vld [vmem:[%s751_s1 + $0x30] sm:$0xff]   ;;  %v647_v9 = vld [vmem:[%s751_s1 + $0x38] sm:$0xff]  }
   0x4   :  { %594 = vmatprep.subr.bf16.mxu0 %v641_v1  ;;  %625 = vmatprep.subr.bf16.mxu1 %v641_v1  ;;  %v652_v6 = vld [vmem:[%s752_s0 + $0x20] sm:$0xff]   ;;  %v649_v10 = vld [vmem:[%s752_s0 + $0x8] sm:$0xff]   ;;  %v650_v12 = vld [vmem:[%s752_s0 + $0x10] sm:$0xff]  }
   0x5   :  { %608 = vmatprep.mubr.bf16.mxu0 %v648_v4  ;;  %616 = vmatprep.mubr.bf16.mxu1 %v652_v6  ;;  %v653_v11 = vld [vmem:[%s752_s0 + $0x28] sm:$0xff]   ;;  %v654_v13 = vld [vmem:[%s752_s0 + $0x30] sm:$0xff]   ;;  %v651_v14 = vld [vmem:[%s752_s0 + $0x18] sm:$0xff]  }
   0x6   :  { %v655_v15 = vld [vmem:[%s752_s0 + $0x38] sm:$0xff]  }
   0x7   :  { %595 = vmatpush3.bf16.msra.mxu0 %v641_v1  ;;  %633 = vmatpush3.bf16.msra.mxu1 %v641_v1 }
   0x8   :  { %596 = vmatprep.subr.bf16.mxu0 %v642_v2  ;;  %626 = vmatprep.subr.bf16.mxu1 %v642_v2 }
   0xb   :  { %597 = vmatpush3.bf16.msra.mxu0 %v642_v2  ;;  %634 = vmatpush3.bf16.msra.mxu1 %v642_v2 }
   0xc   :  { %598 = vmatprep.subr.bf16.mxu0 %v643_v3  ;;  %627 = vmatprep.subr.bf16.mxu1 %v643_v3 }
   0xf   :  { %599 = vmatpush3.bf16.msra.mxu0 %v643_v3  ;;  %635 = vmatpush3.bf16.msra.mxu1 %v643_v3 }
  0x10   :  { %600 = vmatprep.subr.bf16.mxu0 %v644_v5  ;;  %628 = vmatprep.subr.bf16.mxu1 %v644_v5 }
  0x13   :  { %601 = vmatpush3.bf16.msra.mxu0 %v644_v5  ;;  %636 = vmatpush3.bf16.msra.mxu1 %v644_v5 }
  0x14   :  { %602 = vmatprep.subr.bf16.mxu0 %v645_v7  ;;  %629 = vmatprep.subr.bf16.mxu1 %v645_v7 }
  0x17   :  { %603 = vmatpush3.bf16.msra.mxu0 %v645_v7  ;;  %637 = vmatpush3.bf16.msra.mxu1 %v645_v7 }
  0x18   :  { %604 = vmatprep.subr.bf16.mxu0 %v646_v8  ;;  %630 = vmatprep.subr.bf16.mxu1 %v646_v8 }
  0x1b   :  { %605 = vmatpush3.bf16.msra.mxu0 %v646_v8  ;;  %638 = vmatpush3.bf16.msra.mxu1 %v646_v8 }
  0x1c   :  { %606 = vmatprep.subr.bf16.mxu0 %v647_v9  ;;  %631 = vmatprep.subr.bf16.mxu1 %v647_v9 }
  0x1f   :  { %607 = vmatpush3.bf16.msra.mxu0 %v647_v9  ;;  %639 = vmatpush3.bf16.msra.mxu1 %v647_v9 }
  0x22   :  { %609 = vmatmul.mubr.bf16.vlgmr.msra.gmra.mrb[0].mxu0 %v649_v10  ;;  %617 = vmatmul.mubr.bf16.vlgmr.msra.gmra.mrb[0].mxu1 %v653_v11 }
  0x23   :  { %612 = vmatprep.mubr.bf16.mxu0 %v650_v12  ;;  %620 = vmatprep.mubr.bf16.mxu1 %v654_v13 }
  0x2a   :  { %613 = vmatmul.mubr.bf16.gmra.mrb[4].mxu0 %v651_v14  ;;  %621 = vmatmul.mubr.bf16.gmra.mrb[4].mxu1 %v655_v15 }
  0xf5   :  { %v610_v16 = vpop.f32.mrb[0].mxu0  ;;  %v618_v17 = vpop.f32.mrb[0].mxu1 }
  0xf6   :  { %v176_v18 = vpop.f32.mrb[1].mxu0  ;;  %v208_v19 = vpop.f32.mrb[1].mxu1  ;;  %v433_v31 = vmul.f32 %v610_v16, %v610_v16  ;;  %v441_v3 = vmul.f32 %v618_v17, %v618_v17 }
  0xf7   :  { %v611_v20 = vpop.f32.mrb[2].mxu0  ;;  %v619_v21 = vpop.f32.mrb[2].mxu1  ;;  %v431_v22 = vmul.f32 %v176_v18, %v176_v18  ;;  %v439_v61 = vmul.f32 %v208_v19, %v208_v19 }
  0xf8   :  { %v537_v23 = vpack.c.bf16 %v611_v20, %v610_v16  ;;  %v179_v24 = vpop.f32.mrb[3].mxu0  ;;  %v557_v25 = vpack.c.bf16 %v619_v21, %v618_v17  ;;  %v211_v26 = vpop.f32.mrb[3].mxu1  ;;  %v434_v34 = vmul.f32 %v611_v20, %v611_v20  ;;  %v442_v6 = vmul.f32 %v619_v21, %v619_v21 }
  0xf9   :  { %v532_v27 = vpack.c.bf16 %v179_v24, %v176_v18  ;;  %v410_v28 = vadd.f32 %v179_v24, %v176_v18  ;;  %v432_v29 = vmul.f32 %v179_v24, %v179_v24  ;;  %v552_v30 = vpack.c.bf16 %v211_v26, %v208_v19 }
  0xfa   :  { %569 = vst [vmem:[%s753_s2 + $0x8] sm:$0xff] %v537_v23   ;;  %573 = vst [vmem:[%s753_s2 + $0x28] sm:$0xff] %v557_v25   ;;  %v440_v2 = vmul.f32 %v211_v26, %v211_v26 }
  0xfb   :  { %533 = vst [vmem:[%s753_s2] sm:$0xff] %v532_v27   ;;  %v411_v32 = vadd.f32 %v610_v16, %v410_v28  ;;  %v447_v33 = vadd.f32 %v432_v29, %v431_v22  ;;  %572 = vst [vmem:[%s753_s2 + $0x20] sm:$0xff] %v552_v30  }
  0xfd   :  { %v448_v35 = vadd.f32 %v447_v33, %v433_v31  ;;  %v614_v36 = vpop.f32.mrb[4].mxu0  ;;  %v412_v37 = vadd.f32 %v611_v20, %v411_v32  ;;  %v622_v38 = vpop.f32.mrb[4].mxu1 }
  0xfe   :  { %v192_v39 = vpop.f32.mrb[5].mxu0  ;;  %v224_v40 = vpop.f32.mrb[5].mxu1  ;;  %v437_v55 = vmul.f32 %v614_v36, %v614_v36  ;;  %v445_v15 = vmul.f32 %v622_v38, %v622_v38 }
  0xff   :  { %v413_v41 = vadd.f32 %v412_v37, %v192_v39  ;;  %v435_v42 = vmul.f32 %v192_v39, %v192_v39  ;;  %v449_v43 = vadd.f32 %v448_v35, %v434_v34  ;;  %v615_v44 = vpop.f32.mrb[6].mxu0  ;;  %v623_v45 = vpop.f32.mrb[6].mxu1  ;;  %v443_v9 = vmul.f32 %v224_v40, %v224_v40 }
 0x100   :  { %v547_v46 = vpack.c.bf16 %v615_v44, %v614_v36  ;;  %v195_v47 = vpop.f32.mrb[7].mxu0  ;;  %v567_v48 = vpack.c.bf16 %v623_v45, %v622_v38  ;;  %v227_v49 = vpop.f32.mrb[7].mxu1  ;;  %v438_v58 = vmul.f32 %v615_v44, %v615_v44 }
 0x101   :  { %v450_v50 = vadd.f32 %v449_v43, %v435_v42  ;;  %v542_v51 = vpack.c.bf16 %v195_v47, %v192_v39  ;;  %v414_v52 = vadd.f32 %v413_v41, %v195_v47  ;;  %v436_v53 = vmul.f32 %v195_v47, %v195_v47 }
 0x102   :  { %571 = vst [vmem:[%s753_s2 + $0x18] sm:$0xff] %v547_v46   ;;  %575 = vst [vmem:[%s753_s2 + $0x38] sm:$0xff] %v567_v48   ;;  %v562_v54 = vpack.c.bf16 %v227_v49, %v224_v40  ;;  %v444_v14 = vmul.f32 %v227_v49, %v227_v49 }
 0x103   :  { %570 = vst [vmem:[%s753_s2 + $0x10] sm:$0xff] %v542_v51   ;;  %v415_v56 = vadd.f32 %v614_v36, %v414_v52  ;;  %v451_v57 = vadd.f32 %v450_v50, %v436_v53 }
 0x104   :  { %574 = vst [vmem:[%s753_s2 + $0x30] sm:$0xff] %v562_v54  }
 0x105   :  { %v452_v59 = vadd.f32 %v451_v57, %v437_v55  ;;  %v416_v60 = vadd.f32 %v615_v44, %v415_v56 }
 0x107   :  { %v417_v62 = vadd.f32 %v416_v60, %v208_v19  ;;  %v453_v63 = vadd.f32 %v452_v59, %v438_v58  ;;  %v446_v19 = vmul.f32 %v623_v45, %v623_v45 }
 0x109   :  { %v454_v0 = vadd.f32 %v453_v63, %v439_v61  ;;  %v418_v1 = vadd.f32 %v417_v62, %v211_v26 }
 0x10b   :  { %v419_v4 = vadd.f32 %v618_v17, %v418_v1  ;;  %v455_v5 = vadd.f32 %v454_v0, %v440_v2 }
 0x10d   :  { %v456_v7 = vadd.f32 %v455_v5, %v441_v3  ;;  %v420_v8 = vadd.f32 %v619_v21, %v419_v4 }
 0x10f   :  { %v421_v10 = vadd.f32 %v420_v8, %v224_v40  ;;  %v457_v11 = vadd.f32 %v456_v7, %v442_v6 }
 0x111   :  { %v458_v12 = vadd.f32 %v457_v11, %v443_v9  ;;  %v422_v13 = vadd.f32 %v421_v10, %v227_v49 }
 0x113   :  { %v423_v16 = vadd.f32 %v622_v38, %v422_v13  ;;  %v459_v18 = vadd.f32 %v458_v12, %v444_v14 }
 0x115   :  { %v424_v20 = vadd.f32 %v623_v45, %v423_v16  ;;  %v460_v22 = vadd.f32 %v459_v18, %v445_v15 }
 0x117   :  { %v425_v23 = vrot.slane %v424_v20, 4  ;;  %v461_v24 = vadd.f32 %v460_v22, %v446_v19 }
 0x119   :  { %v426_v25 = vadd.f32 %v425_v23, %v424_v20  ;;  %v462_v17 = vrot.slane %v461_v24, 4 }
 0x11b   :  { %v427_v26 = vrot.slane %v426_v25, 2  ;;  %v463_v27 = vadd.f32 %v462_v17, %v461_v24 }
 0x11d   :  { %v428_v28 = vadd.f32 %v427_v26, %v426_v25  ;;  %v464_v21 = vrot.slane %v463_v27, 2 }
 0x11f   :  { %v429_v29 = vrot.slane %v428_v28, 1  ;;  %v465_v30 = vadd.f32 %v464_v21, %v463_v27 }
 0x121   :  { %v466_v31 = vrot.slane %v465_v30, 1  ;;  %v430_v32 = vadd.f32 %v429_v29, %v428_v28 }
 0x123   :  { %v467_v33 = vadd.f32 %v466_v31, %v465_v30 }
 0x125   :  { %v469_v34 = vsel %vm468_vm0, %v430_v32, %v467_v33 }
 0x126   :  { %v471_v35 = vsel %vm470_vm1, %v469_v34, 0.0 }
 0x127   :  { %472 = vst [vmem:[%s754_s3] sm:$0xff] %v471_v35 }

// kernel: unet_forward.15
= control target key start
LH: loop header
LB: loop body
LE: loop exit
PB: predicated region body
PF: predicated region fallthrough
CT: control target
= control target key end

     0   :  { %vm288_vm0 = vcmask 1040384   ;;  %vm290_vm1 = vcmask 1041408   ;;  %s495_s1 = inlined_call_operand.vmem [shape: bf16[256,128], index: 1, kind: input, shape index: {}]   ;;  %s496_s0 = inlined_call_operand.vmem [shape: bf16[32,256], index: 0, kind: input, shape index: {}]   ;;  %s497_s2 = inlined_call_operand.vmem [shape: bf16[32,128], index: 2, kind: output, shape index: {0}]   ;;  %s498_s3 = inlined_call_operand.vmem [shape: f32[1,8,128], index: 3, kind: output, shape index: {1}]  }
   0x1   :  { %v384_v0 = vld [vmem:[%s495_s1 + $0x40] sm:$0xff]   ;;  %v386_v2 = vld [vmem:[%s495_s1 + $0x48] sm:$0xff]   ;;  %v388_v4 = vld [vmem:[%s495_s1 + $0x50] sm:$0xff]  }
   0x2   :  { %v385_v1 = vld [vmem:[%s495_s1] sm:$0xff]   ;;  %340 = vmatprep.subr.bf16.mxu0 %v384_v0  ;;  %368 = vmatprep.subr.bf16.mxu1 %v384_v0  ;;  %v387_v3 = vld [vmem:[%s495_s1 + $0x8] sm:$0xff]   ;;  %v389_v5 = vld [vmem:[%s495_s1 + $0x10] sm:$0xff]  }
   0x3   :  { %341 = vmatpush3.bf16.msra.mxu0 %v385_v1  ;;  %376 = vmatpush3.bf16.msra.mxu1 %v385_v1  ;;  %v390_v6 = vld [vmem:[%s495_s1 + $0x58] sm:$0xff]   ;;  %v392_v8 = vld [vmem:[%s495_s1 + $0x60] sm:$0xff]   ;;  %v394_v10 = vld [vmem:[%s495_s1 + $0x68] sm:$0xff]  }
   0x4   :  { %342 = vmatprep.subr.bf16.mxu0 %v386_v2  ;;  %369 = vmatprep.subr.bf16.mxu1 %v386_v2  ;;  %v391_v7 = vld [vmem:[%s495_s1 + $0x18] sm:$0xff]   ;;  %v393_v9 = vld [vmem:[%s495_s1 + $0x20] sm:$0xff]   ;;  %v395_v13 = vld [vmem:[%s495_s1 + $0x28] sm:$0xff]  }
   0x5   :  { %v402_v11 = vld [vmem:[%s496_s0 + $0x4] ss:$8 sps:$4 sm:$0xff]   ;;  %v405_v12 = vld [vmem:[%s496_s0 + $0x14] ss:$8 sps:$4 sm:$0xff]   ;;  %v400_v18 = vld [vmem:[%s496_s0] ss:$8 sps:$4 sm:$0xff]  }
   0x6   :  { %v396_v14 = vld [vmem:[%s495_s1 + $0x70] sm:$0xff]   ;;  %198 = vmatprep.mubr.bf16.mxu0 %v402_v11  ;;  %206 = vmatprep.mubr.bf16.mxu1 %v405_v12  ;;  %v398_v16 = vld [vmem:[%s495_s1 + $0x78] sm:$0xff]  }
   0x7   :  { %343 = vmatpush3.bf16.msra.mxu0 %v387_v3  ;;  %377 = vmatpush3.bf16.msra.mxu1 %v387_v3  ;;  %v397_v15 = vld [vmem:[%s495_s1 + $0x30] sm:$0xff]   ;;  %v399_v17 = vld [vmem:[%s495_s1 + $0x38] sm:$0xff]  }
   0x8   :  { %344 = vmatprep.subr.bf16.mxu0 %v388_v4  ;;  %370 = vmatprep.subr.bf16.mxu1 %v388_v4  ;;  %v403_v19 = vld [vmem:[%s496_s0 + $0x10] ss:$8 sps:$4 sm:$0xff]  }
   0xb   :  { %345 = vmatpush3.bf16.msra.mxu0 %v389_v5  ;;  %378 = vmatpush3.bf16.msra.mxu1 %v389_v5 }
   0xc   :  { %346 = vmatprep.subr.bf16.mxu0 %v390_v6  ;;  %371 = vmatprep.subr.bf16.mxu1 %v390_v6 }
   0xf   :  { %347 = vmatpush3.bf16.msra.mxu0 %v391_v7  ;;  %379 = vmatpush3.bf16.msra.mxu1 %v391_v7 }
  0x10   :  { %348 = vmatprep.subr.bf16.mxu0 %v392_v8  ;;  %372 = vmatprep.subr.bf16.mxu1 %v392_v8 }
  0x13   :  { %349 = vmatpush3.bf16.msra.mxu0 %v393_v9  ;;  %380 = vmatpush3.bf16.msra.mxu1 %v393_v9 }
  0x14   :  { %350 = vmatprep.subr.bf16.mxu0 %v394_v10  ;;  %373 = vmatprep.subr.bf16.mxu1 %v394_v10 }
  0x17   :  { %351 = vmatpush3.bf16.msra.mxu0 %v395_v13  ;;  %381 = vmatpush3.bf16.msra.mxu1 %v395_v13 }
  0x18   :  { %352 = vmatprep.subr.bf16.mxu0 %v396_v14  ;;  %374 = vmatprep.subr.bf16.mxu1 %v396_v14 }
  0x1b   :  { %353 = vmatpush3.bf16.msra.mxu0 %v397_v15  ;;  %382 = vmatpush3.bf16.msra.mxu1 %v397_v15 }
  0x1c   :  { %354 = vmatprep.subr.bf16.mxu0 %v398_v16  ;;  %375 = vmatprep.subr.bf16.mxu1 %v398_v16 }
  0x1f   :  { %355 = vmatpush3.bf16.msra.mxu0 %v399_v17  ;;  %383 = vmatpush3.bf16.msra.mxu1 %v399_v17 }
  0x22   :  { %199 = vmatmul.mubr.bf16.vlgmr.msra.gmra.mrb[0].mxu0 %v400_v18  ;;  %207 = vmatmul.mubr.bf16.vlgmr.msra.gmra.mrb[0].mxu1 %v403_v19 }
  0xf5   :  { %v356_v20 = vpop.f32.mrb[0].mxu0  ;;  %v362_v21 = vpop.f32.mrb[0].mxu1 }
  0xf6   :  { %v357_v22 = vpop.f32.mrb[1].mxu0  ;;  %v363_v23 = vpop.f32.mrb[1].mxu1 }
  0xf7   :  { %v358_v24 = vadd.f32 %v357_v22, %v356_v20  ;;  %v359_v25 = vpop.f32.mrb[2].mxu0  ;;  %v364_v26 = vadd.f32 %v363_v23, %v362_v21  ;;  %v365_v27 = vpop.f32.mrb[2].mxu1 }
  0xf8   :  { %v360_v28 = vpop.f32.mrb[3].mxu0  ;;  %v366_v29 = vpop.f32.mrb[3].mxu1 }
  0xf9   :  { %v361_v30 = vadd.f32 %v360_v28, %v359_v25  ;;  %v367_v31 = vadd.f32 %v366_v29, %v365_v27  ;;  %v275_v32 = vmul.f32 %v358_v24, %v358_v24  ;;  %v277_v33 = vmul.f32 %v364_v26, %v364_v26 }
  0xfb   :  { %v332_v34 = vpack.c.bf16 %v361_v30, %v358_v24  ;;  %v266_v35 = vadd.f32 %v361_v30, %v358_v24  ;;  %v276_v36 = vmul.f32 %v361_v30, %v361_v30  ;;  %v337_v37 = vpack.c.bf16 %v367_v31, %v364_v26 }
  0xfc   :  { %v278_v41 = vmul.f32 %v367_v31, %v367_v31 }
  0xfd   :  { %333 = vst [vmem:[%s497_s2] sm:$0xff] %v332_v34   ;;  %v279_v38 = vadd.f32 %v276_v36, %v275_v32  ;;  %339 = vst [vmem:[%s497_s2 + $0x8] sm:$0xff] %v337_v37   ;;  %v267_v39 = vadd.f32 %v364_v26, %v266_v35 }
  0xff   :  { %v268_v40 = vadd.f32 %v367_v31, %v267_v39  ;;  %v280_v42 = vadd.f32 %v279_v38, %v277_v33 }
 0x101   :  { %v269_v43 = vrot.slane %v268_v40, 4  ;;  %v281_v44 = vadd.f32 %v280_v42, %v278_v41 }
 0x103   :  { %v270_v45 = vadd.f32 %v269_v43, %v268_v40  ;;  %v282_v46 = vrot.slane %v281_v44, 4 }
 0x105   :  { %v271_v47 = vrot.slane %v270_v45, 2  ;;  %v283_v48 = vadd.f32 %v282_v46, %v281_v44 }
 0x107   :  { %v272_v49 = vadd.f32 %v271_v47, %v270_v45  ;;  %v284_v50 = vrot.slane %v283_v48, 2 }
 0x109   :  { %v273_v51 = vrot.slane %v272_v49, 1  ;;  %v285_v52 = vadd.f32 %v284_v50, %v283_v48 }
 0x10b   :  { %v286_v53 = vrot.slane %v285_v52, 1  ;;  %v274_v54 = vadd.f32 %v273_v51, %v272_v49 }
 0x10d   :  { %v287_v55 = vadd.f32 %v286_v53, %v285_v52 }
 0x10f   :  { %v289_v56 = vsel %vm288_vm0, %v274_v54, %v287_v55 }
 0x110   :  { %v291_v57 = vsel %vm290_vm1, %v289_v56, 0.0 }
 0x111   :  { %292 = vst [vmem:[%s498_s3] sm:$0xff] %v291_v57 }

// kernel: unet_forward.16
= control target key start
LH: loop header
LB: loop body
LE: loop exit
PB: predicated region body
PF: predicated region fallthrough
CT: control target
= control target key end

     0   :  { %s140_s0 = inlined_call_operand.vmem [shape: bf16[32,128], index: 0, kind: input, shape index: {}]   ;;  %s141_s1 = inlined_call_operand.vmem [shape: f32[1,128], index: 1, kind: input, shape index: {}]   ;;  %s142_s2 = inlined_call_operand.vmem [shape: f32[1,128], index: 2, kind: input, shape index: {}]   ;;  %s143_s3 = inlined_call_operand.vmem [shape: bf16[32,128], index: 3, kind: output, shape index: {}]  }
   0x1   :  { %v83_v0 = vld [vmem:[%s140_s0] sm:$0xff]   ;;  %v100_v4 = vld [vmem:[%s140_s0 + $0x8] sm:$0xff]  }
   0x2   :  { %v72_v1 = vld [vmem:[%s141_s1] ss:$0 sm:$0xff]  ;;  %v84_v2 = vunpack.c.l.bf16 %v83_v0  ;;  %v85_v3 = vunpack.c.h.bf16 %v83_v0  ;;  %v88_v6 = vunpack.c.l.bf16 %v100_v4  ;;  %v89_v7 = vunpack.c.h.bf16 %v100_v4 }
   0x3   :  { %v73_v5 = vld [vmem:[%s142_s2] ss:$0 sm:$0xff] }
   0x4   :  { %v29_v8 = vmul.f32 %v84_v2, %v72_v1  ;;  %v30_v9 = vmul.f32 %v85_v3, %v72_v1  ;;  %v31_v10 = vmul.f32 %v88_v6, %v72_v1  ;;  %v32_v11 = vmul.f32 %v89_v7, %v72_v1 }
   0x6   :  { %v40_v12 = vadd.f32 %v73_v5, %v29_v8  ;;  %v41_v13 = vadd.f32 %v73_v5, %v30_v9  ;;  %v42_v14 = vadd.f32 %v73_v5, %v31_v10  ;;  %v43_v15 = vadd.f32 %v73_v5, %v32_v11 }
   0x8   :  { %v44_v16 = vmax.f32 %v40_v12, 0.0  ;;  %v45_v17 = vmax.f32 %v41_v13, 0.0  ;;  %v46_v18 = vmax.f32 %v42_v14, 0.0  ;;  %v47_v19 = vmax.f32 %v43_v15, 0.0 }
   0xa   :  { %v93_v20 = vpack.c.bf16 %v45_v17, %v44_v16  ;;  %v98_v21 = vpack.c.bf16 %v47_v19, %v46_v18 }
   0xc   :  { %94 = vst [vmem:[%s143_s3] sm:$0xff] %v93_v20   ;;  %101 = vst [vmem:[%s143_s3 + $0x8] sm:$0xff] %v98_v21  }

// kernel: squeeze.5
= control target key start
LH: loop header
LB: loop body
LE: loop exit
PB: predicated region body
PF: predicated region fallthrough
CT: control target
= control target key end

     0   :  { %s37_s8 = smov 80   ;;  %vm7_vm0 = vcmask 130048   ;;  %s38_s9 = smov 96   ;;  %s55_s0 = inlined_call_operand.vmem [shape: f32[64], index: 0, kind: input, shape index: {}]   ;;  %s56_s1 = inlined_call_operand.vmem [shape: f32[4,16], index: 1, kind: output, shape index: {}]  }
   0x1   :  { %v4_v0 = vld [vmem:[%s55_s0] sm:$0x1]  ;;  %s36_s0 = smov 112  }
   0x2   :  { %5 = vst [vmem:[#allocation1] sm:$0x1] %v4_v0 }
   0x9   :  { %v9_v1 = vld [vmem:[#allocation1] sm:$0x1]  }
   0xa   :  { %v21_v2 = vld [vmem:[#allocation1] sm:$0x1]   ;;  %10 = vrot.lane.b32.xlu0 %v9_v1, %s36_s0 }
   0xb   :  { %22 = vrot.lane.b32.xlu1 %v21_v2, %s37_s8  ;;  %v6_v3 = vld [vmem:[#allocation1] sm:$0x1]  }
   0xc   :  { %v15_v4 = vld [vmem:[#allocation1] sm:$0x1]   ;;  %8 = vst.msk [vmem:[#allocation0] sm:$0x1] %vm7_vm0, %v6_v3  }
   0xe   :  { %16 = vrot.lane.b32.xlu0 %v15_v4, %s38_s9 }
  0x7c   :  { %v11_v5 = vpop.permute.xlu0 %10  }
  0x7d   :  { %v23_v6 = vpop.permute.xlu1 %22   ;;  %14 = vst.msk [vmem:[#allocation0 + $0x1] sm:$0x1] %vm7_vm0, %v11_v5  }
  0x7e   :  { %26 = vst.msk [vmem:[#allocation0 + $0x3] sm:$0x1] %vm7_vm0, %v23_v6  }
  0x80   :  { %v17_v7 = vpop.permute.xlu0 %16  }
  0x81   :  { %20 = vst.msk [vmem:[#allocation0 + $0x2] sm:$0x1] %vm7_vm0, %v17_v7  }
  0x88   :  { %v30_v8 = vld [vmem:[#allocation0] sm:$0xf] }
  0x89   :  { %32 = vst [vmem:[%s56_s1] sm:$0xf] %v30_v8 }

// kernel: tile.33
= control target key start
LH: loop header
LB: loop body
LE: loop exit
PB: predicated region body
PF: predicated region fallthrough
CT: control target
= control target key end

     0   :  { %s22_s0 = inlined_call_operand.vmem [shape: f32[16], index: 0, kind: input, shape index: {}]   ;;  %s23_s1 = inlined_call_operand.vmem [shape: f32[4,16], index: 1, kind: output, shape index: {}]  }
   0x1   :  { %v4_v0 = vld [vmem:[%s22_s0] ss:$0 sm:$0xff] }
   0x2   :  { %5 = vst [vmem:[%s23_s1] sm:$0xf] %v4_v0 }

// kernel: tile.34
= control target key start
LH: loop header
LB: loop body
LE: loop exit
PB: predicated region body
PF: predicated region fallthrough
CT: control target
= control target key end

     0   :  { %vm7_vm0 = vcmask 130048   ;;  %s37_s8 = smov 16   ;;  %s38_s9 = smov 32   ;;  %vm13_vm1 = vcmask 523648   ;;  %vm19_vm2 = vcmask 392448   ;;  %vm25_vm3 = vcmask 261248   ;;  %s55_s0 = inlined_call_operand.vmem [shape: f32[4,16], index: 0, kind: input, shape index: {}]   ;;  %s56_s1 = inlined_call_operand.vmem [shape: f32[64], index: 1, kind: output, shape index: {}]  }
   0x1   :  { %v4_v0 = vld [vmem:[%s55_s0] sm:$0xf]  ;;  %s36_s0 = smov 48  }
   0x2   :  { %5 = vst [vmem:[#allocation1] sm:$0xf] %v4_v0 }
   0x9   :  { %v10_v1 = vld [vmem:[#allocation1 + $0x3] sm:$0x1]   ;;  %v22_v2 = vld [vmem:[#allocation1 + $0x1] sm:$0x1]   ;;  %v6_v3 = vld [vmem:[#allocation1] sm:$0x1]  }
   0xa   :  { %11 = vrot.lane.b32.xlu0 %v10_v1, %s36_s0  ;;  %23 = vrot.lane.b32.xlu1 %v22_v2, %s37_s8  ;;  %v16_v4 = vld [vmem:[#allocation1 + $0x2] sm:$0x1]   ;;  %8 = vst.msk [vmem:[#allocation0] sm:$0x1] %vm7_vm0, %v6_v3  }
   0xe   :  { %17 = vrot.lane.b32.xlu0 %v16_v4, %s38_s9 }
  0x7c   :  { %v12_v5 = vpop.permute.xlu0 %11   ;;  %v24_v6 = vpop.permute.xlu1 %23  }
  0x7d   :  { %14 = vst.msk [vmem:[#allocation0] sm:$0x1] %vm13_vm1, %v12_v5  }
  0x80   :  { %v18_v7 = vpop.permute.xlu0 %17  }
  0x81   :  { %20 = vst.msk [vmem:[#allocation0] sm:$0x1] %vm19_vm2, %v18_v7  }
  0x82   :  { %26 = vst.msk [vmem:[#allocation0] sm:$0x1] %vm25_vm3, %v24_v6  }
  0x89   :  { %v30_v8 = vld [vmem:[#allocation0] sm:$0x1] }
  0x8a   :  { %32 = vst [vmem:[%s56_s1] sm:$0x1] %v30_v8 }

// kernel: unet_forward.17
= control target key start
LH: loop header
LB: loop body
LE: loop exit
PB: predicated region body
PF: predicated region fallthrough
CT: control target
= control target key end

     0   :  { %vm417_vm0 = vcmask 1040384   ;;  %vm419_vm1 = vcmask 1041408   ;;  %s688_s1 = inlined_call_operand.vmem [shape: bf16[384,128], index: 1, kind: input, shape index: {}]   ;;  %s689_s0 = inlined_call_operand.vmem [shape: bf16[32,384], index: 0, kind: input, shape index: {}]   ;;  %s690_s2 = inlined_call_operand.vmem [shape: bf16[32,128], index: 2, kind: output, shape index: {0}]   ;;  %s691_s3 = inlined_call_operand.vmem [shape: f32[1,8,128], index: 3, kind: output, shape index: {1}]  }
   0x1   :  { %v537_v0 = vld [vmem:[%s688_s1 + $0x40] sm:$0xff]   ;;  %v540_v3 = vld [vmem:[%s688_s1 + $0x48] sm:$0xff]   ;;  %v543_v6 = vld [vmem:[%s688_s1 + $0x50] sm:$0xff]  }
   0x2   :  { %v538_v1 = vld [vmem:[%s688_s1] sm:$0xff]   ;;  %479 = vmatprep.subr.bf16.mxu0 %v537_v0  ;;  %v541_v4 = vld [vmem:[%s688_s1 + $0x8] sm:$0xff]   ;;  %v544_v7 = vld [vmem:[%s688_s1 + $0x10] sm:$0xff]  }
   0x3   :  { %v539_v2 = vld [vmem:[%s688_s1 + $0x80] sm:$0xff]   ;;  %480 = vmatpush3.bf16.msra.mxu0 %v538_v1  ;;  %v542_v5 = vld [vmem:[%s688_s1 + $0x88] sm:$0xff]   ;;  %v545_v8 = vld [vmem:[%s688_s1 + $0x90] sm:$0xff]  }
   0x4   :  { %517 = vmatprep.subr.bf16.mxu1 %v539_v2  ;;  %481 = vmatprep.subr.bf16.mxu0 %v540_v3  ;;  %v546_v9 = vld [vmem:[%s688_s1 + $0x58] sm:$0xff]   ;;  %v549_v12 = vld [vmem:[%s688_s1 + $0x60] sm:$0xff]   ;;  %v552_v15 = vld [vmem:[%s688_s1 + $0x68] sm:$0xff]  }
   0x5   :  { %518 = vmatpush3.bf16.msra.mxu1 %v539_v2  ;;  %v547_v10 = vld [vmem:[%s688_s1 + $0x18] sm:$0xff]   ;;  %v551_v13 = vld [vmem:[%s688_s1 + $0xa0] sm:$0xff]   ;;  %v554_v16 = vld [vmem:[%s688_s1 + $0xa8] sm:$0xff]  }
   0x6   :  { %519 = vmatprep.subr.bf16.mxu1 %v542_v5  ;;  %v548_v11 = vld [vmem:[%s688_s1 + $0x98] sm:$0xff]   ;;  %v550_v14 = vld [vmem:[%s688_s1 + $0x20] sm:$0xff]   ;;  %v553_v17 = vld [vmem:[%s688_s1 + $0x28] sm:$0xff]  }
   0x7   :  { %482 = vmatpush3.bf16.msra.mxu0 %v541_v4  ;;  %v555_v18 = vld [vmem:[%s688_s1 + $0x70] sm:$0xff]   ;;  %v558_v21 = vld [vmem:[%s688_s1 + $0x78] sm:$0xff]   ;;  %v561_v26 = vld [vmem:[%s689_s0] ss:$12 sps:$4 sm:$0xff]  }
   0x8   :  { %483 = vmatprep.subr.bf16.mxu0 %v543_v6  ;;  %v556_v19 = vld [vmem:[%s688_s1 + $0x30] sm:$0xff]   ;;  %v560_v22 = vld [vmem:[%s688_s1 + $0xb8] sm:$0xff]   ;;  %v565_v28 = vld [vmem:[%s689_s0 + $0x20] ss:$12 sps:$4 sm:$0xff]  }
   0x9   :  { %520 = vmatpush3.bf16.msra.mxu1 %v542_v5  ;;  %v557_v20 = vld [vmem:[%s688_s1 + $0xb0] sm:$0xff]   ;;  %v559_v25 = vld [vmem:[%s688_s1 + $0x38] sm:$0xff]  }
   0xa   :  { %521 = vmatprep.subr.bf16.mxu1 %v545_v8  ;;  %v563_v23 = vld [vmem:[%s689_s0 + $0x4] ss:$12 sps:$4 sm:$0xff]   ;;  %v564_v24 = vld [vmem:[%s689_s0 + $0x8] ss:$12 sps:$4 sm:$0xff]  }
   0xb   :  { %484 = vmatpush3.bf16.msra.mxu0 %v544_v7  ;;  %278 = vmatprep.mubr.bf16.mxu0 %v563_v23  ;;  %v566_v27 = vld [vmem:[%s689_s0 + $0x1c] ss:$12 sps:$4 sm:$0xff]   ;;  %v568_v29 = vld [vmem:[%s689_s0 + $0x18] ss:$12 sps:$4 sm:$0xff]  }
   0xc   :  { %485 = vmatprep.subr.bf16.mxu0 %v546_v9  ;;  %533 = vmatprep.mubr.bf16.mxu1 %v564_v24 }
   0xd   :  { %522 = vmatpush3.bf16.msra.mxu1 %v545_v8 }
   0xe   :  { %523 = vmatprep.subr.bf16.mxu1 %v548_v11 }
   0xf   :  { %486 = vmatpush3.bf16.msra.mxu0 %v547_v10 }
  0x10   :  { %487 = vmatprep.subr.bf16.mxu0 %v549_v12 }
  0x11   :  { %524 = vmatpush3.bf16.msra.mxu1 %v548_v11 }
  0x12   :  { %525 = vmatprep.subr.bf16.mxu1 %v551_v13 }
  0x13   :  { %488 = vmatpush3.bf16.msra.mxu0 %v550_v14 }
  0x14   :  { %489 = vmatprep.subr.bf16.mxu0 %v552_v15 }
  0x15   :  { %526 = vmatpush3.bf16.msra.mxu1 %v551_v13 }
  0x16   :  { %527 = vmatprep.subr.bf16.mxu1 %v554_v16 }
  0x17   :  { %490 = vmatpush3.bf16.msra.mxu0 %v553_v17 }
  0x18   :  { %491 = vmatprep.subr.bf16.mxu0 %v555_v18 }
  0x19   :  { %528 = vmatpush3.bf16.msra.mxu1 %v554_v16 }
  0x1a   :  { %529 = vmatprep.subr.bf16.mxu1 %v557_v20 }
  0x1b   :  { %492 = vmatpush3.bf16.msra.mxu0 %v556_v19 }
  0x1c   :  { %493 = vmatprep.subr.bf16.mxu0 %v558_v21 }
  0x1d   :  { %530 = vmatpush3.bf16.msra.mxu1 %v557_v20 }
  0x1e   :  { %531 = vmatprep.subr.bf16.mxu1 %v560_v22 }
  0x1f   :  { %494 = vmatpush3.bf16.msra.mxu0 %v559_v25 }
  0x21   :  { %532 = vmatpush3.bf16.msra.mxu1 %v560_v22 }
  0x22   :  { %279 = vmatmul.mubr.bf16.vlgmr.msra.gmra.mrb[0].mxu0 %v561_v26 }
  0x23   :  { %286 = vmatprep.mubr.bf16.mxu0 %v566_v27 }
  0x24   :  { %534 = vmatmul.mubr.bf16.vlgmr.msra.gmra.mrb[0].mxu1 %v565_v28 }
  0x2a   :  { %287 = vmatmul.mubr.bf16.gmra.mrb[4].mxu0 %v568_v29 }
  0xf5   :  { %v495_v30 = vpop.f32.mrb[0].mxu0 }
  0xf6   :  { %v496_v31 = vpop.f32.mrb[1].mxu0 }
  0xf7   :  { %v497_v32 = vadd.f32 %v496_v31, %v495_v30  ;;  %v498_v33 = vpop.f32.mrb[2].mxu0  ;;  %v535_v34 = vpop.f32.mrb[0].mxu1 }
  0xf8   :  { %v499_v35 = vpop.f32.mrb[3].mxu0  ;;  %v329_v36 = vpop.f32.mrb[1].mxu1 }
  0xf9   :  { %v500_v37 = vadd.f32 %v499_v35, %v498_v33  ;;  %v330_v38 = vadd.f32 %v497_v32, %v329_v36  ;;  %v536_v39 = vpop.f32.mrb[2].mxu1 }
  0xfa   :  { %v332_v40 = vpop.f32.mrb[3].mxu1 }
  0xfb   :  { %v333_v41 = vadd.f32 %v500_v37, %v332_v40  ;;  %v404_v42 = vmul.f32 %v330_v38, %v330_v38 }
  0xfd   :  { %v471_v43 = vpack.c.bf16 %v333_v41, %v330_v38  ;;  %v395_v44 = vadd.f32 %v333_v41, %v330_v38  ;;  %v405_v45 = vmul.f32 %v333_v41, %v333_v41  ;;  %v501_v46 = vpop.f32.mrb[4].mxu0 }
  0xfe   :  { %v502_v47 = vpop.f32.mrb[5].mxu0 }
  0xff   :  { %472 = vst [vmem:[%s690_s2] sm:$0xff] %v471_v43   ;;  %v408_v48 = vadd.f32 %v405_v45, %v404_v42  ;;  %v503_v49 = vadd.f32 %v502_v47, %v501_v46  ;;  %v504_v50 = vpop.f32.mrb[6].mxu0 }
 0x100   :  { %v505_v51 = vpop.f32.mrb[7].mxu0 }
 0x101   :  { %v338_v52 = vadd.f32 %v535_v34, %v503_v49  ;;  %v506_v53 = vadd.f32 %v505_v51, %v504_v50 }
 0x103   :  { %v396_v54 = vadd.f32 %v395_v44, %v338_v52  ;;  %v406_v55 = vmul.f32 %v338_v52, %v338_v52  ;;  %v341_v56 = vadd.f32 %v536_v39, %v506_v53 }
 0x105   :  { %v409_v57 = vadd.f32 %v408_v48, %v406_v55  ;;  %v476_v58 = vpack.c.bf16 %v341_v56, %v338_v52  ;;  %v397_v59 = vadd.f32 %v396_v54, %v341_v56  ;;  %v407_v60 = vmul.f32 %v341_v56, %v341_v56 }
 0x107   :  { %478 = vst [vmem:[%s690_s2 + $0x8] sm:$0xff] %v476_v58   ;;  %v398_v61 = vrot.slane %v397_v59, 4  ;;  %v410_v62 = vadd.f32 %v409_v57, %v407_v60 }
 0x109   :  { %v399_v63 = vadd.f32 %v398_v61, %v397_v59  ;;  %v411_v0 = vrot.slane %v410_v62, 4 }
 0x10b   :  { %v400_v1 = vrot.slane %v399_v63, 2  ;;  %v412_v2 = vadd.f32 %v411_v0, %v410_v62 }
 0x10d   :  { %v401_v3 = vadd.f32 %v400_v1, %v399_v63  ;;  %v413_v4 = vrot.slane %v412_v2, 2 }
 0x10f   :  { %v402_v5 = vrot.slane %v401_v3, 1  ;;  %v414_v6 = vadd.f32 %v413_v4, %v412_v2 }
 0x111   :  { %v415_v7 = vrot.slane %v414_v6, 1  ;;  %v403_v8 = vadd.f32 %v402_v5, %v401_v3 }
 0x113   :  { %v416_v9 = vadd.f32 %v415_v7, %v414_v6 }
 0x115   :  { %v418_v10 = vsel %vm417_vm0, %v403_v8, %v416_v9 }
 0x116   :  { %v420_v11 = vsel %vm419_vm1, %v418_v10, 0.0 }
 0x117   :  { %421 = vst [vmem:[%s691_s3] sm:$0xff] %v420_v11 }

// kernel: squeeze.7
= control target key start
LH: loop header
LB: loop body
LE: loop exit
PB: predicated region body
PF: predicated region fallthrough
CT: control target
= control target key end

     0   :  { %s37_s8 = smov 104   ;;  %vm7_vm0 = vcmask 64512   ;;  %s38_s9 = smov 112   ;;  %s55_s0 = inlined_call_operand.vmem [shape: f32[32], index: 0, kind: input, shape index: {}]   ;;  %s56_s1 = inlined_call_operand.vmem [shape: f32[4,8], index: 1, kind: output, shape index: {}]  }
   0x1   :  { %v4_v0 = vld [vmem:[%s55_s0] sm:$0x1]  ;;  %s36_s0 = smov 120  }
   0x2   :  { %5 = vst [vmem:[#allocation1] sm:$0x1] %v4_v0 }
   0x9   :  { %v9_v1 = vld [vmem:[#allocation1] sm:$0x1]  }
   0xa   :  { %v21_v2 = vld [vmem:[#allocation1] sm:$0x1]   ;;  %10 = vrot.lane.b32.xlu0 %v9_v1, %s36_s0 }
   0xb   :  { %22 = vrot.lane.b32.xlu1 %v21_v2, %s37_s8  ;;  %v6_v3 = vld [vmem:[#allocation1] sm:$0x1]  }
   0xc   :  { %v15_v4 = vld [vmem:[#allocation1] sm:$0x1]   ;;  %8 = vst.msk [vmem:[#allocation0] sm:$0x1] %vm7_vm0, %v6_v3  }
   0xe   :  { %16 = vrot.lane.b32.xlu0 %v15_v4, %s38_s9 }
  0x7c   :  { %v11_v5 = vpop.permute.xlu0 %10  }
  0x7d   :  { %v23_v6 = vpop.permute.xlu1 %22   ;;  %14 = vst.msk [vmem:[#allocation0 + $0x1] sm:$0x1] %vm7_vm0, %v11_v5  }
  0x7e   :  { %26 = vst.msk [vmem:[#allocation0 + $0x3] sm:$0x1] %vm7_vm0, %v23_v6  }
  0x80   :  { %v17_v7 = vpop.permute.xlu0 %16  }
  0x81   :  { %20 = vst.msk [vmem:[#allocation0 + $0x2] sm:$0x1] %vm7_vm0, %v17_v7  }
  0x88   :  { %v30_v8 = vld [vmem:[#allocation0] sm:$0xf] }
  0x89   :  { %32 = vst [vmem:[%s56_s1] sm:$0xf] %v30_v8 }

// kernel: tile.43
= control target key start
LH: loop header
LB: loop body
LE: loop exit
PB: predicated region body
PF: predicated region fallthrough
CT: control target
= control target key end

     0   :  { %s22_s0 = inlined_call_operand.vmem [shape: f32[8], index: 0, kind: input, shape index: {}]   ;;  %s23_s1 = inlined_call_operand.vmem [shape: f32[4,8], index: 1, kind: output, shape index: {}]  }
   0x1   :  { %v4_v0 = vld [vmem:[%s22_s0] ss:$0 sm:$0xff] }
   0x2   :  { %5 = vst [vmem:[%s23_s1] sm:$0xf] %v4_v0 }

// kernel: tile.44
= control target key start
LH: loop header
LB: loop body
LE: loop exit
PB: predicated region body
PF: predicated region fallthrough
CT: control target
= control target key end

     0   :  { %vm7_vm0 = vcmask 64512   ;;  %s37_s8 = smov 8   ;;  %s38_s9 = smov 16   ;;  %vm13_vm1 = vcmask 261312   ;;  %vm19_vm2 = vcmask 195712   ;;  %vm25_vm3 = vcmask 130112   ;;  %s55_s0 = inlined_call_operand.vmem [shape: f32[4,8], index: 0, kind: input, shape index: {}]   ;;  %s56_s1 = inlined_call_operand.vmem [shape: f32[32], index: 1, kind: output, shape index: {}]  }
   0x1   :  { %v4_v0 = vld [vmem:[%s55_s0] sm:$0xf]  ;;  %s36_s0 = smov 24  }
   0x2   :  { %5 = vst [vmem:[#allocation1] sm:$0xf] %v4_v0 }
   0x9   :  { %v10_v1 = vld [vmem:[#allocation1 + $0x3] sm:$0x1]   ;;  %v22_v2 = vld [vmem:[#allocation1 + $0x1] sm:$0x1]   ;;  %v6_v3 = vld [vmem:[#allocation1] sm:$0x1]  }
   0xa   :  { %11 = vrot.lane.b32.xlu0 %v10_v1, %s36_s0  ;;  %23 = vrot.lane.b32.xlu1 %v22_v2, %s37_s8  ;;  %v16_v4 = vld [vmem:[#allocation1 + $0x2] sm:$0x1]   ;;  %8 = vst.msk [vmem:[#allocation0] sm:$0x1] %vm7_vm0, %v6_v3  }
   0xe   :  { %17 = vrot.lane.b32.xlu0 %v16_v4, %s38_s9 }
  0x7c   :  { %v12_v5 = vpop.permute.xlu0 %11   ;;  %v24_v6 = vpop.permute.xlu1 %23  }
  0x7d   :  { %14 = vst.msk [vmem:[#allocation0] sm:$0x1] %vm13_vm1, %v12_v5  }
  0x80   :  { %v18_v7 = vpop.permute.xlu0 %17  }
  0x81   :  { %20 = vst.msk [vmem:[#allocation0] sm:$0x1] %vm19_vm2, %v18_v7  }
  0x82   :  { %26 = vst.msk [vmem:[#allocation0] sm:$0x1] %vm25_vm3, %v24_v6  }
  0x89   :  { %v30_v8 = vld [vmem:[#allocation0] sm:$0x1] }
  0x8a   :  { %32 = vst [vmem:[%s56_s1] sm:$0x1] %v30_v8 }

// kernel: unet_forward.19
= control target key start
LH: loop header
LB: loop body
LE: loop exit
PB: predicated region body
PF: predicated region fallthrough
CT: control target
= control target key end

     0   :  { %vm789_vm0 = vcmask 1040384   ;;  %vm791_vm1 = vcmask 1041408   ;;  %s1294_s1 = inlined_call_operand.vmem [shape: bf16[384,128], index: 1, kind: input, shape index: {}]   ;;  %s1295_s0 = inlined_call_operand.vmem [shape: bf16[128,384], index: 0, kind: input, shape index: {}]   ;;  %s1296_s2 = inlined_call_operand.vmem [shape: bf16[128,128], index: 2, kind: output, shape index: {0}]   ;;  %s1297_s3 = inlined_call_operand.vmem [shape: f32[1,8,128], index: 3, kind: output, shape index: {1}]  }
   0x1   :  { %v1041_v0 = vld [vmem:[%s1294_s1 + $0x40] sm:$0xff]   ;;  %v1044_v3 = vld [vmem:[%s1294_s1 + $0x48] sm:$0xff]   ;;  %v1047_v6 = vld [vmem:[%s1294_s1 + $0x50] sm:$0xff]  }
   0x2   :  { %v1042_v1 = vld [vmem:[%s1294_s1] sm:$0xff]   ;;  %929 = vmatprep.subr.bf16.mxu0 %v1041_v0  ;;  %v1045_v4 = vld [vmem:[%s1294_s1 + $0x8] sm:$0xff]   ;;  %v1048_v7 = vld [vmem:[%s1294_s1 + $0x10] sm:$0xff]  }
   0x3   :  { %v1043_v2 = vld [vmem:[%s1294_s1 + $0x80] sm:$0xff]   ;;  %930 = vmatpush3.bf16.msra.mxu0 %v1042_v1  ;;  %v1046_v5 = vld [vmem:[%s1294_s1 + $0x88] sm:$0xff]   ;;  %v1049_v8 = vld [vmem:[%s1294_s1 + $0x90] sm:$0xff]  }
   0x4   :  { %1009 = vmatprep.subr.bf16.mxu1 %v1043_v2  ;;  %931 = vmatprep.subr.bf16.mxu0 %v1044_v3  ;;  %v1050_v9 = vld [vmem:[%s1294_s1 + $0x58] sm:$0xff]   ;;  %v1053_v12 = vld [vmem:[%s1294_s1 + $0x60] sm:$0xff]   ;;  %v1056_v15 = vld [vmem:[%s1294_s1 + $0x68] sm:$0xff]  }
   0x5   :  { %1010 = vmatpush3.bf16.msra.mxu1 %v1043_v2  ;;  %v1051_v10 = vld [vmem:[%s1294_s1 + $0x18] sm:$0xff]   ;;  %v1055_v13 = vld [vmem:[%s1294_s1 + $0xa0] sm:$0xff]   ;;  %v1058_v16 = vld [vmem:[%s1294_s1 + $0xa8] sm:$0xff]  }
   0x6   :  { %1011 = vmatprep.subr.bf16.mxu1 %v1046_v5  ;;  %v1052_v11 = vld [vmem:[%s1294_s1 + $0x98] sm:$0xff]   ;;  %v1054_v14 = vld [vmem:[%s1294_s1 + $0x20] sm:$0xff]   ;;  %v1057_v17 = vld [vmem:[%s1294_s1 + $0x28] sm:$0xff]  }
   0x7   :  { %932 = vmatpush3.bf16.msra.mxu0 %v1045_v4  ;;  %v1059_v18 = vld [vmem:[%s1294_s1 + $0x70] sm:$0xff]   ;;  %v1062_v21 = vld [vmem:[%s1294_s1 + $0x78] sm:$0xff]   ;;  %v1065_v26 = vld [vmem:[%s1295_s0] ss:$12 sps:$4 sm:$0xff]  }
   0x8   :  { %933 = vmatprep.subr.bf16.mxu0 %v1047_v6  ;;  %v1060_v19 = vld [vmem:[%s1294_s1 + $0x30] sm:$0xff]   ;;  %v1064_v22 = vld [vmem:[%s1294_s1 + $0xb8] sm:$0xff]   ;;  %v1069_v28 = vld [vmem:[%s1295_s0 + $0x20] ss:$12 sps:$4 sm:$0xff]  }
   0x9   :  { %1012 = vmatpush3.bf16.msra.mxu1 %v1046_v5  ;;  %v1061_v20 = vld [vmem:[%s1294_s1 + $0xb0] sm:$0xff]   ;;  %v1063_v25 = vld [vmem:[%s1294_s1 + $0x38] sm:$0xff]   ;;  %v1085_v36 = vld [vmem:[%s1295_s0 + $0x80] ss:$12 sps:$4 sm:$0xff]  }
   0xa   :  { %1013 = vmatprep.subr.bf16.mxu1 %v1049_v8  ;;  %v1067_v23 = vld [vmem:[%s1295_s0 + $0x4] ss:$12 sps:$4 sm:$0xff]   ;;  %v1068_v24 = vld [vmem:[%s1295_s0 + $0x8] ss:$12 sps:$4 sm:$0xff]   ;;  %v1078_v35 = vld [vmem:[%s1295_s0 + $0x4c] ss:$12 sps:$4 sm:$0xff]  }
   0xb   :  { %934 = vmatpush3.bf16.msra.mxu0 %v1048_v7  ;;  %398 = vmatprep.mubr.bf16.mxu0 %v1067_v23  ;;  %v1070_v27 = vld [vmem:[%s1295_s0 + $0x1c] ss:$12 sps:$4 sm:$0xff]   ;;  %v1076_v29 = vld [vmem:[%s1295_s0 + $0x38] ss:$12 sps:$4 sm:$0xff]   ;;  %v1073_v31 = vld [vmem:[%s1295_s0 + $0x34] ss:$12 sps:$4 sm:$0xff]  }
   0xc   :  { %935 = vmatprep.subr.bf16.mxu0 %v1050_v9  ;;  %1025 = vmatprep.mubr.bf16.mxu1 %v1068_v24  ;;  %v1072_v30 = vld [vmem:[%s1295_s0 + $0x18] ss:$12 sps:$4 sm:$0xff]   ;;  %v1077_v32 = vld [vmem:[%s1295_s0 + $0x50] ss:$12 sps:$4 sm:$0xff]   ;;  %v1084_v33 = vld [vmem:[%s1295_s0 + $0x68] ss:$12 sps:$4 sm:$0xff]  }
   0xd   :  { %1014 = vmatpush3.bf16.msra.mxu1 %v1049_v8  ;;  %v1075_v34 = vld [vmem:[%s1295_s0 + $0x30] ss:$12 sps:$4 sm:$0xff]   ;;  %v1092_v37 = vld [vmem:[%s1295_s0 + $0x98] ss:$12 sps:$4 sm:$0xff]   ;;  %v1080_v38 = vld [vmem:[%s1295_s0 + $0x48] ss:$12 sps:$4 sm:$0xff]  }
   0xe   :  { %1015 = vmatprep.subr.bf16.mxu1 %v1052_v11  ;;  %v1081_v39 = vld [vmem:[%s1295_s0 + $0x64] ss:$12 sps:$4 sm:$0xff]   ;;  %v1083_v41 = vld [vmem:[%s1295_s0 + $0x60] ss:$12 sps:$4 sm:$0xff]   ;;  %v1086_v42 = vld [vmem:[%s1295_s0 + $0x7c] ss:$12 sps:$4 sm:$0xff]  }
   0xf   :  { %936 = vmatpush3.bf16.msra.mxu0 %v1051_v10  ;;  %v1093_v40 = vld [vmem:[%s1295_s0 + $0xb0] ss:$12 sps:$4 sm:$0xff]   ;;  %v1088_v43 = vld [vmem:[%s1295_s0 + $0x78] ss:$12 sps:$4 sm:$0xff]   ;;  %v1089_v44 = vld [vmem:[%s1295_s0 + $0x94] ss:$12 sps:$4 sm:$0xff]  }
  0x10   :  { %937 = vmatprep.subr.bf16.mxu0 %v1053_v12  ;;  %v1091_v45 = vld [vmem:[%s1295_s0 + $0x90] ss:$12 sps:$4 sm:$0xff]   ;;  %v1094_v46 = vld [vmem:[%s1295_s0 + $0xac] ss:$12 sps:$4 sm:$0xff]   ;;  %v1096_v47 = vld [vmem:[%s1295_s0 + $0xa8] ss:$12 sps:$4 sm:$0xff]  }
  0x11   :  { %1016 = vmatpush3.bf16.msra.mxu1 %v1052_v11 }
  0x12   :  { %1017 = vmatprep.subr.bf16.mxu1 %v1055_v13 }
  0x13   :  { %938 = vmatpush3.bf16.msra.mxu0 %v1054_v14 }
  0x14   :  { %939 = vmatprep.subr.bf16.mxu0 %v1056_v15 }
  0x15   :  { %1018 = vmatpush3.bf16.msra.mxu1 %v1055_v13 }
  0x16   :  { %1019 = vmatprep.subr.bf16.mxu1 %v1058_v16 }
  0x17   :  { %940 = vmatpush3.bf16.msra.mxu0 %v1057_v17 }
  0x18   :  { %941 = vmatprep.subr.bf16.mxu0 %v1059_v18 }
  0x19   :  { %1020 = vmatpush3.bf16.msra.mxu1 %v1058_v16 }
  0x1a   :  { %1021 = vmatprep.subr.bf16.mxu1 %v1061_v20 }
  0x1b   :  { %942 = vmatpush3.bf16.msra.mxu0 %v1060_v19 }
  0x1c   :  { %943 = vmatprep.subr.bf16.mxu0 %v1062_v21 }
  0x1d   :  { %1022 = vmatpush3.bf16.msra.mxu1 %v1061_v20 }
  0x1e   :  { %1023 = vmatprep.subr.bf16.mxu1 %v1064_v22 }
  0x1f   :  { %944 = vmatpush3.bf16.msra.mxu0 %v1063_v25 }
  0x21   :  { %1024 = vmatpush3.bf16.msra.mxu1 %v1064_v22 }
  0x22   :  { %399 = vmatmul.mubr.bf16.vlgmr.msra.gmra.mrb[0].mxu0 %v1065_v26 }
  0x23   :  { %406 = vmatprep.mubr.bf16.mxu0 %v1070_v27 }
  0x24   :  { %1026 = vmatmul.mubr.bf16.vlgmr.msra.gmra.mrb[0].mxu1 %v1069_v28 }
  0x25   :  { %1029 = vmatprep.mubr.bf16.mxu1 %v1076_v29 }
  0x2a   :  { %407 = vmatmul.mubr.bf16.gmra.mrb[4].mxu0 %v1072_v30 }
  0x2b   :  { %414 = vmatprep.mubr.bf16.mxu0 %v1073_v31 }
  0x2c   :  { %1030 = vmatmul.mubr.bf16.gmra.mrb[4].mxu1 %v1077_v32 }
  0x2d   :  { %1033 = vmatprep.mubr.bf16.mxu1 %v1084_v33 }
  0x32   :  { %415 = vmatmul.mubr.bf16.gmra.mrb[8].mxu0 %v1075_v34 }
  0x33   :  { %422 = vmatprep.mubr.bf16.mxu0 %v1078_v35 }
  0x34   :  { %1034 = vmatmul.mubr.bf16.gmra.mrb[8].mxu1 %v1085_v36 }
  0x35   :  { %1037 = vmatprep.mubr.bf16.mxu1 %v1092_v37 }
  0x3a   :  { %423 = vmatmul.mubr.bf16.gmra.mrb[12].mxu0 %v1080_v38 }
  0x3b   :  { %430 = vmatprep.mubr.bf16.mxu0 %v1081_v39 }
  0x3c   :  { %1038 = vmatmul.mubr.bf16.gmra.mrb[12].mxu1 %v1093_v40 }
  0x42   :  { %431 = vmatmul.mubr.bf16.gmra.mrb[16].mxu0 %v1083_v41 }
  0x43   :  { %438 = vmatprep.mubr.bf16.mxu0 %v1086_v42 }
  0x4a   :  { %439 = vmatmul.mubr.bf16.gmra.mrb[20].mxu0 %v1088_v43 }
  0x4b   :  { %446 = vmatprep.mubr.bf16.mxu0 %v1089_v44 }
  0x52   :  { %447 = vmatmul.mubr.bf16.gmra.mrb[24].mxu0 %v1091_v45 }
  0x53   :  { %454 = vmatprep.mubr.bf16.mxu0 %v1094_v46 }
  0x5a   :  { %455 = vmatmul.mubr.bf16.gmra.mrb[28].mxu0 %v1096_v47 }
  0xf5   :  { %v945_v48 = vpop.f32.mrb[0].mxu0 }
  0xf6   :  { %v946_v49 = vpop.f32.mrb[1].mxu0 }
  0xf7   :  { %v947_v50 = vadd.f32 %v946_v49, %v945_v48  ;;  %v948_v51 = vpop.f32.mrb[2].mxu0  ;;  %v1027_v52 = vpop.f32.mrb[0].mxu1 }
  0xf8   :  { %v949_v53 = vpop.f32.mrb[3].mxu0  ;;  %v497_v54 = vpop.f32.mrb[1].mxu1 }
  0xf9   :  { %v950_v55 = vadd.f32 %v949_v53, %v948_v51  ;;  %v498_v56 = vadd.f32 %v947_v50, %v497_v54  ;;  %v1028_v57 = vpop.f32.mrb[2].mxu1 }
  0xfa   :  { %v500_v58 = vpop.f32.mrb[3].mxu1 }
  0xfb   :  { %v501_v59 = vadd.f32 %v950_v55, %v500_v58  ;;  %v752_v60 = vmul.f32 %v498_v56, %v498_v56 }
  0xfd   :  { %v885_v61 = vpack.c.bf16 %v501_v59, %v498_v56  ;;  %v731_v62 = vadd.f32 %v501_v59, %v498_v56  ;;  %v753_v63 = vmul.f32 %v501_v59, %v501_v59  ;;  %v951_v0 = vpop.f32.mrb[4].mxu0 }
  0xfe   :  { %v952_v1 = vpop.f32.mrb[5].mxu0 }
  0xff   :  { %886 = vst [vmem:[%s1296_s2] sm:$0xff] %v885_v61   ;;  %v768_v2 = vadd.f32 %v753_v63, %v752_v60  ;;  %v953_v3 = vadd.f32 %v952_v1, %v951_v0  ;;  %v954_v4 = vpop.f32.mrb[6].mxu0  ;;  %v1031_v5 = vpop.f32.mrb[4].mxu1 }
 0x100   :  { %v955_v6 = vpop.f32.mrb[7].mxu0  ;;  %v513_v7 = vpop.f32.mrb[5].mxu1 }
 0x101   :  { %v506_v8 = vadd.f32 %v1027_v52, %v953_v3  ;;  %v956_v9 = vadd.f32 %v955_v6, %v954_v4  ;;  %v1032_v10 = vpop.f32.mrb[6].mxu1 }
 0x102   :  { %v516_v11 = vpop.f32.mrb[7].mxu1 }
 0x103   :  { %v732_v12 = vadd.f32 %v731_v62, %v506_v8  ;;  %v754_v13 = vmul.f32 %v506_v8, %v506_v8  ;;  %v509_v14 = vadd.f32 %v1028_v57, %v956_v9 }
 0x105   :  { %v769_v15 = vadd.f32 %v768_v2, %v754_v13  ;;  %v890_v16 = vpack.c.bf16 %v509_v14, %v506_v8  ;;  %v755_v17 = vmul.f32 %v509_v14, %v509_v14  ;;  %v957_v18 = vpop.f32.mrb[8].mxu0  ;;  %v733_v19 = vadd.f32 %v732_v12, %v509_v14 }
 0x106   :  { %v958_v20 = vpop.f32.mrb[9].mxu0 }
 0x107   :  { %922 = vst [vmem:[%s1296_s2 + $0x8] sm:$0xff] %v890_v16   ;;  %v959_v21 = vadd.f32 %v958_v20, %v957_v18  ;;  %v960_v22 = vpop.f32.mrb[10].mxu0  ;;  %v770_v23 = vadd.f32 %v769_v15, %v755_v17  ;;  %v1035_v24 = vpop.f32.mrb[8].mxu1 }
 0x108   :  { %v961_v25 = vpop.f32.mrb[11].mxu0  ;;  %v529_v26 = vpop.f32.mrb[9].mxu1 }
 0x109   :  { %v962_v27 = vadd.f32 %v961_v25, %v960_v22  ;;  %v514_v28 = vadd.f32 %v959_v21, %v513_v7  ;;  %v1036_v29 = vpop.f32.mrb[10].mxu1 }
 0x10a   :  { %v532_v30 = vpop.f32.mrb[11].mxu1 }
 0x10b   :  { %v734_v31 = vadd.f32 %v733_v19, %v514_v28  ;;  %v756_v32 = vmul.f32 %v514_v28, %v514_v28  ;;  %v517_v33 = vadd.f32 %v962_v27, %v516_v11 }
 0x10d   :  { %v771_v34 = vadd.f32 %v770_v23, %v756_v32  ;;  %v895_v35 = vpack.c.bf16 %v517_v33, %v514_v28  ;;  %v735_v36 = vadd.f32 %v734_v31, %v517_v33  ;;  %v757_v37 = vmul.f32 %v517_v33, %v517_v33  ;;  %v963_v38 = vpop.f32.mrb[12].mxu0 }
 0x10e   :  { %v964_v39 = vpop.f32.mrb[13].mxu0 }
 0x10f   :  { %923 = vst [vmem:[%s1296_s2 + $0x10] sm:$0xff] %v895_v35   ;;  %v772_v40 = vadd.f32 %v771_v34, %v757_v37  ;;  %v965_v41 = vadd.f32 %v964_v39, %v963_v38  ;;  %v966_v42 = vpop.f32.mrb[14].mxu0  ;;  %v1270_v43 = vpop.f32.mrb[12].mxu1 }
 0x110   :  { %v967_v44 = vpop.f32.mrb[15].mxu0  ;;  %v545_v45 = vpop.f32.mrb[13].mxu1 }
 0x111   :  { %v522_v46 = vadd.f32 %v1031_v5, %v965_v41  ;;  %v968_v47 = vadd.f32 %v967_v44, %v966_v42  ;;  %v1272_v48 = vpop.f32.mrb[14].mxu1 }
 0x112   :  { %v548_v49 = vpop.f32.mrb[15].mxu1 }
 0x113   :  { %v736_v50 = vadd.f32 %v735_v36, %v522_v46  ;;  %v758_v51 = vmul.f32 %v522_v46, %v522_v46  ;;  %v525_v52 = vadd.f32 %v1032_v10, %v968_v47 }
 0x115   :  { %v773_v53 = vadd.f32 %v772_v40, %v758_v51  ;;  %v900_v54 = vpack.c.bf16 %v525_v52, %v522_v46  ;;  %v759_v55 = vmul.f32 %v525_v52, %v525_v52  ;;  %v969_v56 = vpop.f32.mrb[16].mxu0  ;;  %v737_v57 = vadd.f32 %v736_v50, %v525_v52 }
 0x116   :  { %v970_v58 = vpop.f32.mrb[17].mxu0 }
 0x117   :  { %924 = vst [vmem:[%s1296_s2 + $0x18] sm:$0xff] %v900_v54   ;;  %v971_v59 = vadd.f32 %v970_v58, %v969_v56  ;;  %v972_v60 = vpop.f32.mrb[18].mxu0  ;;  %v774_v61 = vadd.f32 %v773_v53, %v759_v55 }
 0x118   :  { %v973_v62 = vpop.f32.mrb[19].mxu0 }
 0x119   :  { %v974_v63 = vadd.f32 %v973_v62, %v972_v60  ;;  %v530_v0 = vadd.f32 %v971_v59, %v529_v26 }
 0x11b   :  { %v738_v1 = vadd.f32 %v737_v57, %v530_v0  ;;  %v760_v2 = vmul.f32 %v530_v0, %v530_v0  ;;  %v533_v3 = vadd.f32 %v974_v63, %v532_v30 }
 0x11d   :  { %v775_v4 = vadd.f32 %v774_v61, %v760_v2  ;;  %v905_v5 = vpack.c.bf16 %v533_v3, %v530_v0  ;;  %v739_v6 = vadd.f32 %v738_v1, %v533_v3  ;;  %v761_v7 = vmul.f32 %v533_v3, %v533_v3  ;;  %v975_v8 = vpop.f32.mrb[20].mxu0 }
 0x11e   :  { %v976_v9 = vpop.f32.mrb[21].mxu0 }
 0x11f   :  { %925 = vst [vmem:[%s1296_s2 + $0x20] sm:$0xff] %v905_v5   ;;  %v776_v10 = vadd.f32 %v775_v4, %v761_v7  ;;  %v977_v11 = vadd.f32 %v976_v9, %v975_v8  ;;  %v978_v12 = vpop.f32.mrb[22].mxu0 }
 0x120   :  { %v979_v13 = vpop.f32.mrb[23].mxu0 }
 0x121   :  { %v538_v14 = vadd.f32 %v1035_v24, %v977_v11  ;;  %v980_v15 = vadd.f32 %v979_v13, %v978_v12 }
 0x123   :  { %v740_v16 = vadd.f32 %v739_v6, %v538_v14  ;;  %v762_v17 = vmul.f32 %v538_v14, %v538_v14  ;;  %v541_v18 = vadd.f32 %v1036_v29, %v980_v15 }
 0x125   :  { %v777_v19 = vadd.f32 %v776_v10, %v762_v17  ;;  %v910_v20 = vpack.c.bf16 %v541_v18, %v538_v14  ;;  %v763_v21 = vmul.f32 %v541_v18, %v541_v18  ;;  %v981_v22 = vpop.f32.mrb[24].mxu0  ;;  %v741_v23 = vadd.f32 %v740_v16, %v541_v18 }
 0x126   :  { %v982_v25 = vpop.f32.mrb[25].mxu0 }
 0x127   :  { %926 = vst [vmem:[%s1296_s2 + $0x28] sm:$0xff] %v910_v20   ;;  %v983_v26 = vadd.f32 %v982_v25, %v981_v22  ;;  %v984_v27 = vpop.f32.mrb[26].mxu0  ;;  %v778_v28 = vadd.f32 %v777_v19, %v763_v21 }
 0x128   :  { %v985_v30 = vpop.f32.mrb[27].mxu0 }
 0x129   :  { %v986_v31 = vadd.f32 %v985_v30, %v984_v27  ;;  %v546_v24 = vadd.f32 %v983_v26, %v545_v45 }
 0x12b   :  { %v742_v32 = vadd.f32 %v741_v23, %v546_v24  ;;  %v764_v33 = vmul.f32 %v546_v24, %v546_v24  ;;  %v549_v34 = vadd.f32 %v986_v31, %v548_v49 }
 0x12d   :  { %v779_v29 = vadd.f32 %v778_v28, %v764_v33  ;;  %v915_v35 = vpack.c.bf16 %v549_v34, %v546_v24  ;;  %v743_v36 = vadd.f32 %v742_v32, %v549_v34  ;;  %v765_v37 = vmul.f32 %v549_v34, %v549_v34  ;;  %v987_v38 = vpop.f32.mrb[28].mxu0 }
 0x12e   :  { %v988_v39 = vpop.f32.mrb[29].mxu0 }
 0x12f   :  { %927 = vst [vmem:[%s1296_s2 + $0x30] sm:$0xff] %v915_v35   ;;  %v780_v40 = vadd.f32 %v779_v29, %v765_v37  ;;  %v989_v41 = vadd.f32 %v988_v39, %v987_v38  ;;  %v990_v42 = vpop.f32.mrb[30].mxu0 }
 0x130   :  { %v991_v44 = vpop.f32.mrb[31].mxu0 }
 0x131   :  { %v554_v46 = vadd.f32 %v1270_v43, %v989_v41  ;;  %v992_v45 = vadd.f32 %v991_v44, %v990_v42 }
 0x133   :  { %v744_v47 = vadd.f32 %v743_v36, %v554_v46  ;;  %v766_v50 = vmul.f32 %v554_v46, %v554_v46  ;;  %v557_v49 = vadd.f32 %v1272_v48, %v992_v45 }
 0x135   :  { %v781_v51 = vadd.f32 %v780_v40, %v766_v50  ;;  %v920_v52 = vpack.c.bf16 %v557_v49, %v554_v46  ;;  %v745_v53 = vadd.f32 %v744_v47, %v557_v49  ;;  %v767_v54 = vmul.f32 %v557_v49, %v557_v49 }
 0x137   :  { %928 = vst [vmem:[%s1296_s2 + $0x38] sm:$0xff] %v920_v52   ;;  %v746_v55 = vrot.slane %v745_v53, 4  ;;  %v782_v56 = vadd.f32 %v781_v51, %v767_v54 }
 0x139   :  { %v747_v57 = vadd.f32 %v746_v55, %v745_v53  ;;  %v783_v58 = vrot.slane %v782_v56, 4 }
 0x13b   :  { %v748_v59 = vrot.slane %v747_v57, 2  ;;  %v784_v60 = vadd.f32 %v783_v58, %v782_v56 }
 0x13d   :  { %v749_v43 = vadd.f32 %v748_v59, %v747_v57  ;;  %v785_v61 = vrot.slane %v784_v60, 2 }
 0x13f   :  { %v750_v62 = vrot.slane %v749_v43, 1  ;;  %v786_v63 = vadd.f32 %v785_v61, %v784_v60 }
 0x141   :  { %v787_v0 = vrot.slane %v786_v63, 1  ;;  %v751_v48 = vadd.f32 %v750_v62, %v749_v43 }
 0x143   :  { %v788_v1 = vadd.f32 %v787_v0, %v786_v63 }
 0x145   :  { %v790_v2 = vsel %vm789_vm0, %v751_v48, %v788_v1 }
 0x146   :  { %v792_v3 = vsel %vm791_vm1, %v790_v2, 0.0 }
 0x147   :  { %793 = vst [vmem:[%s1297_s3] sm:$0xff] %v792_v3 }

// kernel: unet_forward.21
= control target key start
LH: loop header
LB: loop body
LE: loop exit
PB: predicated region body
PF: predicated region fallthrough
CT: control target
= control target key end

     0   :  { %s1456_s12 = smov 0   ;;  %s1458_s13 = smov 0   ;;  %s1649_s0 = inlined_call_operand.vmem [shape: bf16[512,256], index: 0, kind: input, shape index: {}]   ;;  %s1650_s1 = inlined_call_operand.vmem [shape: bf16[256,128], index: 1, kind: input, shape index: {}]   ;;  %s1651_s2 = inlined_call_operand.vmem [shape: f32[1,128], index: 2, kind: input, shape index: {}]   ;;  %s1652_s3 = inlined_call_operand.vmem [shape: f32[512,128], index: 3, kind: output, shape index: {}]  }
   0x1   :  { %s1460_s14 = smov 0  }
   0x2 LB: > { %s25_s15 = sadd.s32 1, %s1430_s13  ;;  %p1074_p0 = scmp.ge.s32.totalorder %s1434_s14, 1  ;;  %s1434_s14 = sphi %s1460_s14, %s13_s14   ;;  %s1430_s13 = sphi %s1458_s13, %s1654_s13   ;;  %s1426_s12 = sphi %s1456_s12, %s1653_s12  }
   0x3   : > { %p27_p1 = scmp.ge.s32.totalorder %s25_s15, 2  ;;  %p169_p2 = scmp.lt.s32.totalorder %s1434_s14, 3 }
   0x5   : > { %s1656_s15 = smov (%p27_p1, %s25_s15), 0  ;;  %p170_p3 = pnand %p1074_p0, %p169_p2 }
   0x6   : > { %v1284_v0 = vld [vmem:[%s1650_s1 + $0x40] sm:$0xff] (!%p170_p3)   ;;  %s1075_s18 = sshll.u32 (!%p170_p3), %s1426_s12, 5  ;;  %v1286_v2 = vld [vmem:[%s1650_s1 + $0x48] sm:$0xff] (!%p170_p3)   ;;  %v1288_v4 = vld [vmem:[%s1650_s1 + $0x50] sm:$0xff] (!%p170_p3)  }
   0x7   : > { %173 = sbr.rel (%p170_p3) target bundleno = 329 (0x149), region = 32  ;;  %v1285_v1 = vld [vmem:[%s1650_s1] sm:$0xff] (!%p170_p3)   ;;  %1132 = vmatprep.subr.bf16.mxu0 (!%p170_p3), %v1284_v0  ;;  %1244 = vmatprep.subr.bf16.mxu1 (!%p170_p3), %v1284_v0  ;;  %v1287_v3 = vld [vmem:[%s1650_s1 + $0x8] sm:$0xff] (!%p170_p3)   ;;  %p205_p4 = scmp.lt.s32.totalorder (!%p170_p3), %s1075_s18, 63  ;;  %v1289_v5 = vld [vmem:[%s1650_s1 + $0x10] sm:$0xff] (!%p170_p3)  }
   0x8   : > { %1133 = vmatpush3.bf16.msra.mxu0 (!%p170_p3), %v1285_v1  ;;  %1252 = vmatpush3.bf16.msra.mxu1 (!%p170_p3), %v1285_v1  ;;  %v1290_v6 = vld [vmem:[%s1650_s1 + $0x58] sm:$0xff] (!%p170_p3)   ;;  %v1292_v8 = vld [vmem:[%s1650_s1 + $0x60] sm:$0xff] (!%p170_p3)   ;;  %v1294_v10 = vld [vmem:[%s1650_s1 + $0x68] sm:$0xff] (!%p170_p3)  }
   0x9   : > { %1134 = vmatprep.subr.bf16.mxu0 (!%p170_p3), %v1286_v2  ;;  %1245 = vmatprep.subr.bf16.mxu1 (!%p170_p3), %v1286_v2  ;;  %v1291_v7 = vld [vmem:[%s1650_s1 + $0x18] sm:$0xff] (!%p170_p3)   ;;  %v1293_v9 = vld [vmem:[%s1650_s1 + $0x20] sm:$0xff] (!%p170_p3)   ;;  %v1295_v13 = vld [vmem:[%s1650_s1 + $0x28] sm:$0xff] (!%p170_p3)  }
   0xa   : > { %v1296_v14 = vld [vmem:[%s1650_s1 + $0x70] sm:$0xff] (!%p170_p3)   ;;  %v1298_v16 = vld [vmem:[%s1650_s1 + $0x78] sm:$0xff] (!%p170_p3)   ;;  %v1567_v51 = vld [vmem:[%s1651_s2] ss:$0 sm:$0xff] (!%p170_p3) }
   0xb   : > { %v1297_v15 = vld [vmem:[%s1650_s1 + $0x30] sm:$0xff] (!%p170_p3)   ;;  %v1299_v17 = vld [vmem:[%s1650_s1 + $0x38] sm:$0xff] (!%p170_p3)  }
   0xc   : > { %1135 = vmatpush3.bf16.msra.mxu0 (!%p170_p3), %v1287_v3  ;;  %1253 = vmatpush3.bf16.msra.mxu1 (!%p170_p3), %v1287_v3 }
   0xd   : > { %1136 = vmatprep.subr.bf16.mxu0 (!%p170_p3), %v1288_v4  ;;  %1246 = vmatprep.subr.bf16.mxu1 (!%p170_p3), %v1288_v4 }
   0xe   : > { %s1658_s18 = smov (!%p205_p4, %s1075_s18), 63 }
   0xf   : > { %s1131_s6 = sshll.u32 %s1658_s18, 3 }
  0x10   : > { %1137 = vmatpush3.bf16.msra.mxu0 %v1289_v5  ;;  %1254 = vmatpush3.bf16.msra.mxu1 %v1289_v5  ;;  %s1509_s11 = scalar_lea.vmem %s1649_s0, %s1131_s6  ;;  %s1580_s8 = scalar_lea.vmem %s1652_s3, %s1131_s6 }
  0x11   : > { %1138 = vmatprep.subr.bf16.mxu0 %v1290_v6  ;;  %1247 = vmatprep.subr.bf16.mxu1 %v1290_v6  ;;  %v1302_v11 = vld [vmem:[%s1509_s11 + $0x4] ss:$8 sps:$4 sm:$0xff]   ;;  %v1300_v18 = vld [vmem:[%s1509_s11] ss:$8 sps:$4 sm:$0xff]   ;;  %v1306_v20 = vld [vmem:[%s1509_s11 + $0x14] ss:$8 sps:$4 sm:$0xff]  }
  0x12   : > { %v1305_v12 = vld [vmem:[%s1509_s11 + $0x84] ss:$8 sps:$4 sm:$0xff]   ;;  %580 = vmatprep.mubr.bf16.mxu0 %v1302_v11  ;;  %v1303_v19 = vld [vmem:[%s1509_s11 + $0x80] ss:$8 sps:$4 sm:$0xff]   ;;  %v1308_v21 = vld [vmem:[%s1509_s11 + $0x94] ss:$8 sps:$4 sm:$0xff]  }
  0x13   : > { %644 = vmatprep.mubr.bf16.mxu1 %v1305_v12  ;;  %v1310_v22 = vld [vmem:[%s1509_s11 + $0x10] ss:$8 sps:$4 sm:$0xff]   ;;  %v1312_v24 = vld [vmem:[%s1509_s11 + $0x24] ss:$8 sps:$4 sm:$0xff]   ;;  %v1316_v26 = vld [vmem:[%s1509_s11 + $0x20] ss:$8 sps:$4 sm:$0xff]  }
  0x14   : > { %1139 = vmatpush3.bf16.msra.mxu0 %v1291_v7  ;;  %1255 = vmatpush3.bf16.msra.mxu1 %v1291_v7  ;;  %v1311_v23 = vld [vmem:[%s1509_s11 + $0x90] ss:$8 sps:$4 sm:$0xff]   ;;  %v1314_v25 = vld [vmem:[%s1509_s11 + $0xa4] ss:$8 sps:$4 sm:$0xff]   ;;  %v1317_v27 = vld [vmem:[%s1509_s11 + $0xa0] ss:$8 sps:$4 sm:$0xff]  }
  0x15   : > { %1140 = vmatprep.subr.bf16.mxu0 %v1292_v8  ;;  %1248 = vmatprep.subr.bf16.mxu1 %v1292_v8  ;;  %v1318_v28 = vld [vmem:[%s1509_s11 + $0x34] ss:$8 sps:$4 sm:$0xff]   ;;  %v1322_v30 = vld [vmem:[%s1509_s11 + $0x30] ss:$8 sps:$4 sm:$0xff]   ;;  %v1324_v32 = vld [vmem:[%s1509_s11 + $0x44] ss:$8 sps:$4 sm:$0xff]  }
  0x16   : > { %v1320_v29 = vld [vmem:[%s1509_s11 + $0xb4] ss:$8 sps:$4 sm:$0xff]   ;;  %v1323_v31 = vld [vmem:[%s1509_s11 + $0xb0] ss:$8 sps:$4 sm:$0xff]   ;;  %v1326_v33 = vld [vmem:[%s1509_s11 + $0xc4] ss:$8 sps:$4 sm:$0xff]  }
  0x17   : > { %v1328_v34 = vld [vmem:[%s1509_s11 + $0x40] ss:$8 sps:$4 sm:$0xff]   ;;  %v1330_v36 = vld [vmem:[%s1509_s11 + $0x54] ss:$8 sps:$4 sm:$0xff]   ;;  %v1334_v38 = vld [vmem:[%s1509_s11 + $0x50] ss:$8 sps:$4 sm:$0xff]  }
  0x18   : > { %1141 = vmatpush3.bf16.msra.mxu0 %v1293_v9  ;;  %1256 = vmatpush3.bf16.msra.mxu1 %v1293_v9  ;;  %v1329_v35 = vld [vmem:[%s1509_s11 + $0xc0] ss:$8 sps:$4 sm:$0xff]   ;;  %v1332_v37 = vld [vmem:[%s1509_s11 + $0xd4] ss:$8 sps:$4 sm:$0xff]   ;;  %v1335_v39 = vld [vmem:[%s1509_s11 + $0xd0] ss:$8 sps:$4 sm:$0xff]  }
  0x19   : > { %1142 = vmatprep.subr.bf16.mxu0 %v1294_v10  ;;  %1249 = vmatprep.subr.bf16.mxu1 %v1294_v10  ;;  %v1336_v40 = vld [vmem:[%s1509_s11 + $0x64] ss:$8 sps:$4 sm:$0xff]   ;;  %v1340_v42 = vld [vmem:[%s1509_s11 + $0x60] ss:$8 sps:$4 sm:$0xff]   ;;  %v1342_v44 = vld [vmem:[%s1509_s11 + $0x74] ss:$8 sps:$4 sm:$0xff]  }
  0x1a   : > { %v1338_v41 = vld [vmem:[%s1509_s11 + $0xe4] ss:$8 sps:$4 sm:$0xff]   ;;  %v1341_v43 = vld [vmem:[%s1509_s11 + $0xe0] ss:$8 sps:$4 sm:$0xff]   ;;  %v1344_v45 = vld [vmem:[%s1509_s11 + $0xf4] ss:$8 sps:$4 sm:$0xff]  }
  0x1b   : > { %v1346_v46 = vld [vmem:[%s1509_s11 + $0x70] ss:$8 sps:$4 sm:$0xff]  }
  0x1c   : > { %1143 = vmatpush3.bf16.msra.mxu0 %v1295_v13  ;;  %1257 = vmatpush3.bf16.msra.mxu1 %v1295_v13  ;;  %v1347_v47 = vld [vmem:[%s1509_s11 + $0xf0] ss:$8 sps:$4 sm:$0xff]  }
  0x1d   : > { %1144 = vmatprep.subr.bf16.mxu0 %v1296_v14  ;;  %1250 = vmatprep.subr.bf16.mxu1 %v1296_v14 }
  0x20   : > { %1145 = vmatpush3.bf16.msra.mxu0 %v1297_v15  ;;  %1258 = vmatpush3.bf16.msra.mxu1 %v1297_v15 }
  0x21   : > { %1146 = vmatprep.subr.bf16.mxu0 %v1298_v16  ;;  %1251 = vmatprep.subr.bf16.mxu1 %v1298_v16 }
  0x24   : > { %1147 = vmatpush3.bf16.msra.mxu0 %v1299_v17  ;;  %1259 = vmatpush3.bf16.msra.mxu1 %v1299_v17 }
  0x27   : > { %581 = vmatmul.mubr.bf16.vlgmr.msra.gmra.mrb[0].mxu0 %v1300_v18  ;;  %645 = vmatmul.mubr.bf16.vlgmr.msra.gmra.mrb[0].mxu1 %v1303_v19 }
  0x28   : > { %588 = vmatprep.mubr.bf16.mxu0 %v1306_v20  ;;  %652 = vmatprep.mubr.bf16.mxu1 %v1308_v21 }
  0x2f   : > { %589 = vmatmul.mubr.bf16.gmra.mrb[4].mxu0 %v1310_v22  ;;  %653 = vmatmul.mubr.bf16.gmra.mrb[4].mxu1 %v1311_v23 }
  0x30   : > { %596 = vmatprep.mubr.bf16.mxu0 %v1312_v24  ;;  %660 = vmatprep.mubr.bf16.mxu1 %v1314_v25 }
  0x37   : > { %597 = vmatmul.mubr.bf16.gmra.mrb[8].mxu0 %v1316_v26  ;;  %661 = vmatmul.mubr.bf16.gmra.mrb[8].mxu1 %v1317_v27 }
  0x38   : > { %604 = vmatprep.mubr.bf16.mxu0 %v1318_v28  ;;  %668 = vmatprep.mubr.bf16.mxu1 %v1320_v29 }
  0x3f   : > { %605 = vmatmul.mubr.bf16.gmra.mrb[12].mxu0 %v1322_v30  ;;  %669 = vmatmul.mubr.bf16.gmra.mrb[12].mxu1 %v1323_v31 }
  0x40   : > { %612 = vmatprep.mubr.bf16.mxu0 %v1324_v32  ;;  %676 = vmatprep.mubr.bf16.mxu1 %v1326_v33 }
  0x47   : > { %613 = vmatmul.mubr.bf16.gmra.mrb[16].mxu0 %v1328_v34  ;;  %677 = vmatmul.mubr.bf16.gmra.mrb[16].mxu1 %v1329_v35 }
  0x48   : > { %620 = vmatprep.mubr.bf16.mxu0 %v1330_v36  ;;  %684 = vmatprep.mubr.bf16.mxu1 %v1332_v37 }
  0x4f   : > { %621 = vmatmul.mubr.bf16.gmra.mrb[20].mxu0 %v1334_v38  ;;  %685 = vmatmul.mubr.bf16.gmra.mrb[20].mxu1 %v1335_v39 }
  0x50   : > { %628 = vmatprep.mubr.bf16.mxu0 %v1336_v40  ;;  %692 = vmatprep.mubr.bf16.mxu1 %v1338_v41 }
  0x57   : > { %629 = vmatmul.mubr.bf16.gmra.mrb[24].mxu0 %v1340_v42  ;;  %693 = vmatmul.mubr.bf16.gmra.mrb[24].mxu1 %v1341_v43 }
  0x58   : > { %636 = vmatprep.mubr.bf16.mxu0 %v1342_v44  ;;  %700 = vmatprep.mubr.bf16.mxu1 %v1344_v45 }
  0x5f   : > { %637 = vmatmul.mubr.bf16.gmra.mrb[28].mxu0 %v1346_v46  ;;  %701 = vmatmul.mubr.bf16.gmra.mrb[28].mxu1 %v1347_v47 }
  0xfa   : > { %v1148_v48 = vpop.f32.mrb[0].mxu0  ;;  %v1196_v49 = vpop.f32.mrb[0].mxu1 }
  0xfb   : > { %v1149_v50 = vpop.f32.mrb[1].mxu0  ;;  %v1197_v52 = vpop.f32.mrb[1].mxu1 }
  0xfc   : > { %v1150_v53 = vadd.f32 %v1149_v50, %v1148_v48  ;;  %v1198_v54 = vadd.f32 %v1197_v52, %v1196_v49  ;;  %v1151_v55 = vpop.f32.mrb[2].mxu0  ;;  %v1199_v56 = vpop.f32.mrb[2].mxu1 }
  0xfd   : > { %v1152_v57 = vpop.f32.mrb[3].mxu0  ;;  %v1200_v58 = vpop.f32.mrb[3].mxu1 }
  0xfe   : > { %v720_v59 = vadd.f32 %v1150_v53, %v1567_v51  ;;  %v736_v60 = vadd.f32 %v1198_v54, %v1567_v51  ;;  %v1153_v61 = vadd.f32 %v1152_v57, %v1151_v55  ;;  %v1201_v62 = vadd.f32 %v1200_v58, %v1199_v56 }
 0x100   : > { %1348 = vtanh.f32 %v720_v59  ;;  %v721_v63 = vadd.f32 %v1153_v61, %v1567_v51  ;;  %v737_v0 = vadd.f32 %v1201_v62, %v1567_v51 }
 0x101   : > { %1350 = vtanh.f32 %v736_v60 }
 0x102   : > { %1352 = vtanh.f32 %v721_v63  ;;  %v1154_v1 = vpop.f32.mrb[4].mxu0  ;;  %v1202_v2 = vpop.f32.mrb[4].mxu1 }
 0x103   : > { %1354 = vtanh.f32 %v737_v0  ;;  %v1155_v3 = vpop.f32.mrb[5].mxu0  ;;  %v1203_v4 = vpop.f32.mrb[5].mxu1 }
 0x104   : > { %v1156_v5 = vadd.f32 %v1155_v3, %v1154_v1  ;;  %v1204_v6 = vadd.f32 %v1203_v4, %v1202_v2  ;;  %v1157_v7 = vpop.f32.mrb[6].mxu0  ;;  %v1205_v8 = vpop.f32.mrb[6].mxu1 }
 0x105   : > { %v1158_v9 = vpop.f32.mrb[7].mxu0  ;;  %v1206_v10 = vpop.f32.mrb[7].mxu1 }
 0x106   : > { %v722_v11 = vadd.f32 %v1156_v5, %v1567_v51  ;;  %v738_v12 = vadd.f32 %v1204_v6, %v1567_v51  ;;  %v1159_v13 = vadd.f32 %v1158_v9, %v1157_v7  ;;  %v1207_v14 = vadd.f32 %v1206_v10, %v1205_v8 }
 0x108   : > { %1356 = vtanh.f32 %v722_v11  ;;  %v723_v15 = vadd.f32 %v1159_v13, %v1567_v51  ;;  %v739_v16 = vadd.f32 %v1207_v14, %v1567_v51 }
 0x109   : > { %1358 = vtanh.f32 %v738_v12 }
 0x10a   : > { %v1349_v17 = vpop.eup %1348  ;;  %1360 = vtanh.f32 %v723_v15  ;;  %v1160_v18 = vpop.f32.mrb[8].mxu0 }
 0x10b   : > { %v1208_v19 = vpop.f32.mrb[8].mxu1  ;;  %v1351_v20 = vpop.eup %1350  ;;  %951 = vst [vmem:[%s1580_s8] sm:$0xff] %v1349_v17  ;;  %1362 = vtanh.f32 %v739_v16 }
 0x10c   : > { %v1161_v21 = vpop.f32.mrb[9].mxu0  ;;  %v1209_v22 = vpop.f32.mrb[9].mxu1  ;;  %967 = vst [vmem:[%s1580_s8 + $0x80] sm:$0xff] %v1351_v20 }
 0x10d   : > { %v1353_v23 = vpop.eup %1352  ;;  %v1162_v24 = vadd.f32 %v1161_v21, %v1160_v18  ;;  %v1210_v25 = vadd.f32 %v1209_v22, %v1208_v19  ;;  %v1163_v26 = vpop.f32.mrb[10].mxu0 }
 0x10e   : > { %v1211_v27 = vpop.f32.mrb[10].mxu1  ;;  %v1355_v28 = vpop.eup %1354  ;;  %952 = vst [vmem:[%s1580_s8 + $0x8] sm:$0xff] %v1353_v23 }
 0x10f   : > { %v1164_v29 = vpop.f32.mrb[11].mxu0  ;;  %v1212_v30 = vpop.f32.mrb[11].mxu1  ;;  %968 = vst [vmem:[%s1580_s8 + $0x88] sm:$0xff] %v1355_v28  ;;  %v724_v31 = vadd.f32 %v1162_v24, %v1567_v51  ;;  %v740_v32 = vadd.f32 %v1210_v25, %v1567_v51 }
 0x110   : > { %v1165_v33 = vadd.f32 %v1164_v29, %v1163_v26  ;;  %v1213_v34 = vadd.f32 %v1212_v30, %v1211_v27 }
 0x111   : > { %1364 = vtanh.f32 %v724_v31 }
 0x112   : > { %v725_v35 = vadd.f32 %v1165_v33, %v1567_v51  ;;  %v741_v36 = vadd.f32 %v1213_v34, %v1567_v51  ;;  %1366 = vtanh.f32 %v740_v32  ;;  %v1357_v37 = vpop.eup %1356  ;;  %v1166_v38 = vpop.f32.mrb[12].mxu0 }
 0x113   : > { %v1214_v39 = vpop.f32.mrb[12].mxu1  ;;  %v1359_v40 = vpop.eup %1358  ;;  %953 = vst [vmem:[%s1580_s8 + $0x10] sm:$0xff] %v1357_v37 }
 0x114   : > { %1368 = vtanh.f32 %v725_v35  ;;  %v1167_v41 = vpop.f32.mrb[13].mxu0  ;;  %v1215_v42 = vpop.f32.mrb[13].mxu1  ;;  %969 = vst [vmem:[%s1580_s8 + $0x90] sm:$0xff] %v1359_v40 }
 0x115   : > { %1370 = vtanh.f32 %v741_v36  ;;  %v1361_v43 = vpop.eup %1360  ;;  %v1168_v44 = vadd.f32 %v1167_v41, %v1166_v38  ;;  %v1216_v45 = vadd.f32 %v1215_v42, %v1214_v39  ;;  %v1169_v46 = vpop.f32.mrb[14].mxu0 }
 0x116   : > { %v1217_v47 = vpop.f32.mrb[14].mxu1  ;;  %v1363_v48 = vpop.eup %1362  ;;  %954 = vst [vmem:[%s1580_s8 + $0x18] sm:$0xff] %v1361_v43 }
 0x117   : > { %v1170_v49 = vpop.f32.mrb[15].mxu0  ;;  %v1218_v50 = vpop.f32.mrb[15].mxu1  ;;  %970 = vst [vmem:[%s1580_s8 + $0x98] sm:$0xff] %v1363_v48  ;;  %v726_v52 = vadd.f32 %v1168_v44, %v1567_v51  ;;  %v742_v53 = vadd.f32 %v1216_v45, %v1567_v51 }
 0x118   : > { %v1171_v54 = vadd.f32 %v1170_v49, %v1169_v46  ;;  %v1219_v55 = vadd.f32 %v1218_v50, %v1217_v47 }
 0x119   : > { %1372 = vtanh.f32 %v726_v52 }
 0x11a   : > { %v727_v56 = vadd.f32 %v1171_v54, %v1567_v51  ;;  %v743_v57 = vadd.f32 %v1219_v55, %v1567_v51  ;;  %1374 = vtanh.f32 %v742_v53  ;;  %v1172_v59 = vpop.f32.mrb[16].mxu0  ;;  %v1220_v60 = vpop.f32.mrb[16].mxu1 }
 0x11b   : > { %v1365_v58 = vpop.eup %1364  ;;  %v1173_v62 = vpop.f32.mrb[17].mxu0 }
 0x11c   : > { %1376 = vtanh.f32 %v727_v56  ;;  %v1367_v61 = vpop.eup %1366  ;;  %955 = vst [vmem:[%s1580_s8 + $0x20] sm:$0xff] %v1365_v58  ;;  %v1221_v63 = vpop.f32.mrb[17].mxu1  ;;  %v1174_v1 = vadd.f32 %v1173_v62, %v1172_v59 }
 0x11d   : > { %1378 = vtanh.f32 %v743_v57  ;;  %971 = vst [vmem:[%s1580_s8 + $0xa0] sm:$0xff] %v1367_v61  ;;  %v1222_v2 = vadd.f32 %v1221_v63, %v1220_v60  ;;  %v1175_v3 = vpop.f32.mrb[18].mxu0  ;;  %v1223_v4 = vpop.f32.mrb[18].mxu1 }
 0x11e   : > { %v1369_v0 = vpop.eup %1368  ;;  %v1176_v6 = vpop.f32.mrb[19].mxu0  ;;  %v728_v8 = vadd.f32 %v1174_v1, %v1567_v51 }
 0x11f   : > { %v1371_v5 = vpop.eup %1370  ;;  %956 = vst [vmem:[%s1580_s8 + $0x28] sm:$0xff] %v1369_v0  ;;  %v1224_v7 = vpop.f32.mrb[19].mxu1  ;;  %v744_v9 = vadd.f32 %v1222_v2, %v1567_v51  ;;  %v1177_v10 = vadd.f32 %v1176_v6, %v1175_v3 }
 0x120   : > { %972 = vst [vmem:[%s1580_s8 + $0xa8] sm:$0xff] %v1371_v5  ;;  %v1225_v11 = vadd.f32 %v1224_v7, %v1223_v4  ;;  %1380 = vtanh.f32 %v728_v8 }
 0x121   : > { %v729_v12 = vadd.f32 %v1177_v10, %v1567_v51  ;;  %1382 = vtanh.f32 %v744_v9 }
 0x122   : > { %v745_v13 = vadd.f32 %v1225_v11, %v1567_v51  ;;  %v1178_v15 = vpop.f32.mrb[20].mxu0  ;;  %v1226_v16 = vpop.f32.mrb[20].mxu1 }
 0x123   : > { %v1373_v14 = vpop.eup %1372  ;;  %1384 = vtanh.f32 %v729_v12  ;;  %v1179_v18 = vpop.f32.mrb[21].mxu0 }
 0x124   : > { %v1375_v17 = vpop.eup %1374  ;;  %957 = vst [vmem:[%s1580_s8 + $0x30] sm:$0xff] %v1373_v14  ;;  %1386 = vtanh.f32 %v745_v13  ;;  %v1227_v19 = vpop.f32.mrb[21].mxu1  ;;  %v1180_v21 = vadd.f32 %v1179_v18, %v1178_v15 }
 0x125   : > { %973 = vst [vmem:[%s1580_s8 + $0xb0] sm:$0xff] %v1375_v17  ;;  %v1228_v22 = vadd.f32 %v1227_v19, %v1226_v16  ;;  %v1181_v23 = vpop.f32.mrb[22].mxu0  ;;  %v1229_v24 = vpop.f32.mrb[22].mxu1 }
 0x126   : > { %v1377_v20 = vpop.eup %1376  ;;  %v1182_v26 = vpop.f32.mrb[23].mxu0  ;;  %v730_v28 = vadd.f32 %v1180_v21, %v1567_v51 }
 0x127   : > { %v1379_v25 = vpop.eup %1378  ;;  %958 = vst [vmem:[%s1580_s8 + $0x38] sm:$0xff] %v1377_v20  ;;  %v1230_v27 = vpop.f32.mrb[23].mxu1  ;;  %v746_v29 = vadd.f32 %v1228_v22, %v1567_v51  ;;  %v1183_v30 = vadd.f32 %v1182_v26, %v1181_v23 }
 0x128   : > { %974 = vst [vmem:[%s1580_s8 + $0xb8] sm:$0xff] %v1379_v25  ;;  %v1231_v31 = vadd.f32 %v1230_v27, %v1229_v24  ;;  %1388 = vtanh.f32 %v730_v28 }
 0x129   : > { %v731_v32 = vadd.f32 %v1183_v30, %v1567_v51  ;;  %1390 = vtanh.f32 %v746_v29 }
 0x12a   : > { %v747_v33 = vadd.f32 %v1231_v31, %v1567_v51  ;;  %v1381_v34 = vpop.eup %1380  ;;  %v1184_v35 = vpop.f32.mrb[24].mxu0 }
 0x12b   : > { %1392 = vtanh.f32 %v731_v32  ;;  %v1232_v36 = vpop.f32.mrb[24].mxu1  ;;  %v1383_v37 = vpop.eup %1382  ;;  %959 = vst [vmem:[%s1580_s8 + $0x40] sm:$0xff] %v1381_v34 }
 0x12c   : > { %1394 = vtanh.f32 %v747_v33  ;;  %v1185_v38 = vpop.f32.mrb[25].mxu0  ;;  %v1233_v39 = vpop.f32.mrb[25].mxu1  ;;  %975 = vst [vmem:[%s1580_s8 + $0xc0] sm:$0xff] %v1383_v37 }
 0x12d   : > { %v1385_v40 = vpop.eup %1384  ;;  %v1186_v41 = vadd.f32 %v1185_v38, %v1184_v35  ;;  %v1234_v42 = vadd.f32 %v1233_v39, %v1232_v36  ;;  %v1187_v43 = vpop.f32.mrb[26].mxu0 }
 0x12e   : > { %v1235_v44 = vpop.f32.mrb[26].mxu1  ;;  %v1387_v45 = vpop.eup %1386  ;;  %960 = vst [vmem:[%s1580_s8 + $0x48] sm:$0xff] %v1385_v40 }
 0x12f   : > { %v1188_v46 = vpop.f32.mrb[27].mxu0  ;;  %v1236_v47 = vpop.f32.mrb[27].mxu1  ;;  %976 = vst [vmem:[%s1580_s8 + $0xc8] sm:$0xff] %v1387_v45  ;;  %v732_v48 = vadd.f32 %v1186_v41, %v1567_v51  ;;  %v748_v49 = vadd.f32 %v1234_v42, %v1567_v51 }
 0x130   : > { %v1189_v50 = vadd.f32 %v1188_v46, %v1187_v43  ;;  %v1237_v52 = vadd.f32 %v1236_v47, %v1235_v44 }
 0x131   : > { %1396 = vtanh.f32 %v732_v48 }
 0x132   : > { %v733_v53 = vadd.f32 %v1189_v50, %v1567_v51  ;;  %v749_v54 = vadd.f32 %v1237_v52, %v1567_v51  ;;  %1398 = vtanh.f32 %v748_v49  ;;  %v1389_v55 = vpop.eup %1388  ;;  %v1190_v56 = vpop.f32.mrb[28].mxu0 }
 0x133   : > { %v1238_v57 = vpop.f32.mrb[28].mxu1  ;;  %v1391_v58 = vpop.eup %1390  ;;  %961 = vst [vmem:[%s1580_s8 + $0x50] sm:$0xff] %v1389_v55 }
 0x134   : > { %1400 = vtanh.f32 %v733_v53  ;;  %v1191_v59 = vpop.f32.mrb[29].mxu0  ;;  %v1239_v60 = vpop.f32.mrb[29].mxu1  ;;  %977 = vst [vmem:[%s1580_s8 + $0xd0] sm:$0xff] %v1391_v58 }
 0x135   : > { %1402 = vtanh.f32 %v749_v54  ;;  %v1393_v61 = vpop.eup %1392  ;;  %v1192_v62 = vadd.f32 %v1191_v59, %v1190_v56  ;;  %v1240_v63 = vadd.f32 %v1239_v60, %v1238_v57  ;;  %v1193_v0 = vpop.f32.mrb[30].mxu0 }
 0x136   : > { %v1241_v1 = vpop.f32.mrb[30].mxu1  ;;  %v1395_v2 = vpop.eup %1394  ;;  %962 = vst [vmem:[%s1580_s8 + $0x58] sm:$0xff] %v1393_v61 }
 0x137   : > { %v1194_v3 = vpop.f32.mrb[31].mxu0  ;;  %v1242_v4 = vpop.f32.mrb[31].mxu1  ;;  %978 = vst [vmem:[%s1580_s8 + $0xd8] sm:$0xff] %v1395_v2  ;;  %v734_v5 = vadd.f32 %v1192_v62, %v1567_v51  ;;  %v750_v6 = vadd.f32 %v1240_v63, %v1567_v51 }
 0x138   : > { %v1195_v7 = vadd.f32 %v1194_v3, %v1193_v0  ;;  %v1243_v8 = vadd.f32 %v1242_v4, %v1241_v1 }
 0x139   : > { %1404 = vtanh.f32 %v734_v5 }
 0x13a   : > { %v735_v9 = vadd.f32 %v1195_v7, %v1567_v51  ;;  %v751_v10 = vadd.f32 %v1243_v8, %v1567_v51  ;;  %1406 = vtanh.f32 %v750_v6 }
 0x13b   : > { %v1397_v11 = vpop.eup %1396 }
 0x13c   : > { %1408 = vtanh.f32 %v735_v9  ;;  %v1399_v12 = vpop.eup %1398  ;;  %963 = vst [vmem:[%s1580_s8 + $0x60] sm:$0xff] %v1397_v11 }
 0x13d   : > { %1410 = vtanh.f32 %v751_v10  ;;  %979 = vst [vmem:[%s1580_s8 + $0xe0] sm:$0xff] %v1399_v12 }
 0x13e   : > { %v1401_v13 = vpop.eup %1400 }
 0x13f   : > { %v1403_v14 = vpop.eup %1402  ;;  %964 = vst [vmem:[%s1580_s8 + $0x68] sm:$0xff] %v1401_v13 }
 0x140   : > { %980 = vst [vmem:[%s1580_s8 + $0xe8] sm:$0xff] %v1403_v14 }
 0x143   : > { %v1405_v15 = vpop.eup %1404 }
 0x144   : > { %v1407_v16 = vpop.eup %1406  ;;  %965 = vst [vmem:[%s1580_s8 + $0x70] sm:$0xff] %v1405_v15 }
 0x145   : > { %981 = vst [vmem:[%s1580_s8 + $0xf0] sm:$0xff] %v1407_v16 }
 0x146   : > { %v1409_v17 = vpop.eup %1408 }
 0x147   : > { %v1411_v51 = vpop.eup %1410  ;;  %966 = vst [vmem:[%s1580_s8 + $0x78] sm:$0xff] %v1409_v17 }
 0x148   : > { %982 = vst [vmem:[%s1580_s8 + $0xf8] sm:$0xff] %v1411_v51 }
 0x149 PF: > { %s13_s14 = sadd.s32 1, %s1434_s14   ;;  %s1653_s12 = smov %s1430_s13 }
 0x14a   : > { %p10_p5 = scmp.ge.s32.totalorder %s13_s14, 4   ;;  %s1654_s13 = smov %s1656_s15 }
 0x14c   :  { %12 = sbr.rel (!%p10_p5) target bundleno = 2 (0x2), region = 77 }

</bundles_post_ra>
